<compile_context>
chip_gen: v7x
topology: tpu7x:2x2x1
jax: 0.10.0
libtpu: 0.0.40
codegen_flags: <defaults>
</compile_context>

<pallas_src>
import functools

import jax
import jax.numpy as jnp
import numpy as np
from jax.experimental import pallas as pl
from jax.experimental.pallas import tpu as pltpu

KERNEL_SIZE = 3
DILATIONS = (1, 3, 5)
EPS = 1e-5
LANE = 128
LPAD = 128   # lane-aligned left halo of the conv scratch (>= max dilation)
RHALO = 8    # right halo (>= max dilation)


# ----------------------------------------------------------------------------
# Pallas kernel: full AdaINResBlock1 forward for one batch element.
# ----------------------------------------------------------------------------
def adain_resblock_kernel(x_ref, gb_ref, w1_ref, w2_ref, cvec_ref,
                          o_ref, pad_ref, *, t):
    C = x_ref.shape[0]
    W = pad_ref.shape[1]

    # Zero only the halo strips; the middle region is overwritten by every conv
    # store, so re-zeroing it would be a wasted full-slab store pass.
    pad_ref[:, :LPAD] = jnp.zeros((C, LPAD), pad_ref.dtype)
    t_floor = (t // LANE) * LANE
    pad_ref[:, LPAD + t_floor:] = jnp.zeros((C, W - LPAD - t_floor), pad_ref.dtype)

    gb = gb_ref[...]        # (3, C, 4): gamma1, beta1, gamma2, beta2  (sublane = C)
    cv = cvec_ref[...]      # (3, C, 6): b1, b2, 2*a1, 0.5/a1, 2*a2, 0.5/a2

    x = x_ref[...].astype(jnp.float32)   # (C, T) residual carry in f32
    inv_t = 1.0 / t

    def adain(v, gamma, beta):
        # InstanceNorm1d (affine=False, biased var, eps=1e-5), single-pass
        # statistics, then (1 + gamma) * xn + beta.  Partial-lane tails of the
        # last vreg group are masked by the compiler (logical width = t).
        s1 = jnp.sum(v, axis=1, keepdims=True)
        s2 = jnp.sum(v * v, axis=1, keepdims=True)
        mean = s1 * inv_t
        var = s2 * inv_t - mean * mean
        scale = (1.0 + gamma) * jax.lax.rsqrt(var + EPS)
        return scale * (v - mean) + beta

    def snake(v, two_a, half_inv_a):
        # x + (1/a) * sin(a x)^2  ==  x + (0.5/a) * (1 - cos(2 a x))
        # TODO(synk): on v6e/v7x the cosine could run in bf16 for ~2x EUP
        # throughput; kept f32 so the kernel verifies tightly on all chips.
        return v + half_inv_a * (1.0 - jnp.cos(two_a * v))

    def conv1d(v, w_ref, branch, bias, d):
        # "Same" dilated conv (kernel_size=3, padding=d) via the zero-haloed
        # bf16 scratch.  The 3 taps are fused into ONE MXU contraction: the
        # three shifted windows are stacked on the sublane axis and contracted
        # against the (C_out, 3*C_in) bf16 weight slab.
        pad_ref[:, LPAD:LPAD + t] = v.astype(pad_ref.dtype)   # masked tail store
        win = jnp.concatenate(
            [pad_ref[:, LPAD + (k - 1) * d: LPAD + (k - 1) * d + t]
             for k in range(KERNEL_SIZE)], axis=0)            # (3*C, t) bf16
        out = jnp.dot(w_ref[branch], win, preferred_element_type=jnp.float32)
        return out + bias

    for i, d in enumerate(DILATIONS):
        xt = adain(x, gb[i, :, 0:1], gb[i, :, 1:2])
        xt = snake(xt, cv[i, :, 2:3], cv[i, :, 3:4])
        xt = conv1d(xt, w1_ref, i, cv[i, :, 0:1], d)
        xt = adain(xt, gb[i, :, 2:3], gb[i, :, 3:4])
        xt = snake(xt, cv[i, :, 4:5], cv[i, :, 5:6])
        xt = conv1d(xt, w2_ref, i, cv[i, :, 1:2], 1)
        x = xt + x                                   # f32 residual carry

    o_ref[...] = x.astype(o_ref.dtype)


# ----------------------------------------------------------------------------
# Wrapper: AdaIN fc (style -> gamma/beta) in plain JAX, hot path in Pallas.
# ----------------------------------------------------------------------------
def fold_weight_norm(v, g):
    # weight_norm(dim=0): w = g * v / ||v||, norm over (C_in, K) per out channel.
    norm = jnp.sqrt(jnp.sum(v * v, axis=(2, 3), keepdims=True))
    return v * (g[..., None, None] / norm)


def adain_resblock1(x, s, params):
    B, C, T = x.shape
    t_scr = pl.cdiv(T + RHALO, LANE) * LANE   # scratch data width (lane aligned)

    # Tiny per-batch style matmuls (glue): h = fc(s); gamma, beta = chunk(h).
    h1 = jnp.einsum("bs,ics->bic", s, params["fc1_w"]) + params["fc1_b"][None]
    h2 = jnp.einsum("bs,ics->bic", s, params["fc2_w"]) + params["fc2_b"][None]
    # (B, 3, C, 4): C on the sublane axis so the per-channel columns broadcast
    # along lanes in-kernel (no XLU lane->sublane relayout).
    gb = jnp.stack([h1[..., :C], h1[..., C:], h2[..., :C], h2[..., C:]], axis=-1)

    # Constant per-channel pack: conv bias + precomputed snake coefficients.
    a1, a2 = params["alpha1"], params["alpha2"]                    # (3, C)
    cvec = jnp.stack([params["b1"], params["b2"],
                      2.0 * a1, 0.5 / a1, 2.0 * a2, 0.5 / a2],
                     axis=-1)                                      # (3, C, 6)

    # Fold weight_norm and fuse the 3 taps into lane-dense bf16 MXU slabs:
    # (branch, C_out, C_in, K) -> (branch, C_out, K*C_in), row index = k*C + c_in.
    w1 = fold_weight_norm(params["w1"], params["g1"])
    w2 = fold_weight_norm(params["w2"], params["g2"])
    w1f = jnp.transpose(w1, (0, 1, 3, 2)).reshape(3, C, KERNEL_SIZE * C)
    w2f = jnp.transpose(w2, (0, 1, 3, 2)).reshape(3, C, KERNEL_SIZE * C)
    w1f = w1f.astype(jnp.bfloat16)
    w2f = w2f.astype(jnp.bfloat16)

    # Shape-aware VMEM budget (no hard-coded cap; clamp below the smallest
    # part's capacity — re-derive if the v7x T-tiling below is added).
    est = (2 * 2 * C * T * 4                          # x + out blocks, 2x buffered
           + 2 * (3 * C * KERNEL_SIZE * C) * 2        # resident bf16 weights
           + C * (LPAD + t_scr) * 2                   # halo scratch (bf16)
           + 5 * C * T * 4                            # live temps (carry, xt, acc, window)
           + (B * 3 * C * 4 + 3 * C * 6) * 4)         # conditioning packs
    vmem_limit = int(min(100 << 20, max(32 << 20, 2 * est)))

    kernel = functools.partial(adain_resblock_kernel, t=T)
    vmem_resident = pl.BlockSpec(memory_space=pltpu.MemorySpace.VMEM)

    return pl.pallas_call(
        kernel,
        out_shape=jax.ShapeDtypeStruct((B, C, T), x.dtype),
        grid=(B,),
        in_specs=[
            pl.BlockSpec((None, C, T), lambda b: (b, 0, 0)),        # x (per batch)
            pl.BlockSpec((None, 3, C, 4), lambda b: (b, 0, 0, 0)),  # gamma/beta pack
            vmem_resident,                                          # w1 (grid-invariant)
            vmem_resident,                                          # w2 (grid-invariant)
            vmem_resident,                                          # bias/snake pack
        ],
        out_specs=pl.BlockSpec((None, C, T), lambda b: (b, 0, 0)),
        scratch_shapes=[pltpu.VMEM((C, LPAD + t_scr), jnp.bfloat16)],
        compiler_params=pltpu.CompilerParams(
            dimension_semantics=("parallel",),
            vmem_limit_bytes=vmem_limit),
        # TODO(synk): for production C*T on v7x (64 MiB VMEM, 2 TCs) add a
        # second "parallel" T-tile grid axis with a max-dilation halo and a
        # two-pass (accumulate-then-apply) AdaIN so both cores get work and
        # tiles fit; unnecessary at these shapes.
    )(x, gb, w1f, w2f, cvec)


# ----------------------------------------------------------------------------
# Pure-JAX f32 reference (mirrors the PyTorch forward) for verification.
# ----------------------------------------------------------------------------
def reference(x, s, params):
    B, C, T = x.shape
    h1 = jnp.einsum("bs,ics->bic", s, params["fc1_w"]) + params["fc1_b"][None]
    h2 = jnp.einsum("bs,ics->bic", s, params["fc2_w"]) + params["fc2_b"][None]
    w1 = fold_weight_norm(params["w1"], params["g1"])
    w2 = fold_weight_norm(params["w2"], params["g2"])

    def adain(v, gamma, beta):
        mean = jnp.mean(v, axis=2, keepdims=True)
        var = jnp.mean((v - mean) ** 2, axis=2, keepdims=True)
        vn = (v - mean) / jnp.sqrt(var + EPS)
        return (1.0 + gamma[:, :, None]) * vn + beta[:, :, None]

    def conv(v, w, b, d):
        out = jax.lax.conv_general_dilated(
            v, w, window_strides=(1,), padding=[(d, d)],
            rhs_dilation=(d,), dimension_numbers=("NCH", "OIH", "NCH"))
        return out + b[None, :, None]

    for i, d in enumerate(DILATIONS):
        a1 = params["alpha1"][i][None, :, None]
        a2 = params["alpha2"][i][None, :, None]
        xt = adain(x, h1[:, i, :C], h1[:, i, C:])
        xt = xt + (1.0 / a1) * jnp.sin(a1 * xt) ** 2
        xt = conv(xt, w1[i], params["b1"][i], d)
        xt = adain(xt, h2[:, i, :C], h2[:, i, C:])
        xt = xt + (1.0 / a2) * jnp.sin(a2 * xt) ** 2
        xt = conv(xt, w2[i], params["b2"][i], 1)
        x = xt + x
    return x


# ----------------------------------------------------------------------------
def make_params(key, channels, style_dim):
    C, S, K = channels, style_dim, KERNEL_SIZE
    ks = jax.random.split(key, 8)
    # init_weights: conv weights ~ N(0, 0.01); weight_norm g at init == ||v||.
    w1 = 0.01 * jax.random.normal(ks[0], (3, C, C, K), jnp.float32)
    w2 = 0.01 * jax.random.normal(ks[2], (3, C, C, K), jnp.float32)
    params = {
        "w1": w1, "g1": jnp.sqrt(jnp.sum(w1 * w1, axis=(2, 3))),
        "b1": 0.01 * jax.random.normal(ks[1], (3, C), jnp.float32),
        "w2": w2, "g2": jnp.sqrt(jnp.sum(w2 * w2, axis=(2, 3))),
        "b2": 0.01 * jax.random.normal(ks[3], (3, C), jnp.float32),
        # AdaIN fc: Linear(style_dim, 2*C) per layer.
        "fc1_w": 0.1 * jax.random.normal(ks[4], (3, 2 * C, S), jnp.float32),
        "fc1_b": 0.1 * jax.random.normal(ks[5], (3, 2 * C), jnp.float32),
        "fc2_w": 0.1 * jax.random.normal(ks[6], (3, 2 * C, S), jnp.float32),
        "fc2_b": 0.1 * jax.random.normal(ks[7], (3, 2 * C), jnp.float32),
        # Snake alphas: torch.ones(1, C, 1) -> (3, C).
        "alpha1": jnp.ones((3, C), jnp.float32),
        "alpha2": jnp.ones((3, C), jnp.float32),
    }
    return params


if __name__ == "__main__":
    # T deliberately not a multiple of 128 to exercise the partial-lane paths.
    B, C, T, S = 2, 16, 200, 64

    key = jax.random.PRNGKey(0)
    kx, ks_, kp = jax.random.split(key, 3)
    x = jax.random.normal(kx, (B, C, T), jnp.float32)
    s = jax.random.normal(ks_, (B, S), jnp.float32)
    params = make_params(kp, C, S)

    out = jax.block_until_ready(adain_resblock1(x, s, params))
    ref = jax.block_until_ready(reference(x, s, params))

    # bf16 MXU operands (weights + conv windows) vs. an f32 reference: allow a
    # commensurately looser tolerance.
    np.testing.assert_allclose(np.asarray(out), np.asarray(ref),
                               rtol=2e-2, atol=2e-2)
    print("KERNEL_OK")
</pallas_src>

<mosaic_0001>
module attributes {stable_mosaic.version = 11 : i64} {
  func.func @adain_resblock_kernel(%arg0: i32, %arg1: memref<1x16x200xf32, #tpu.memory_space<vmem>>, %arg2: memref<1x3x16x4xf32, #tpu.memory_space<vmem>>, %arg3: memref<3x16x48xbf16, #tpu.memory_space<vmem>>, %arg4: memref<3x16x48xbf16, #tpu.memory_space<vmem>>, %arg5: memref<3x16x6xf32, #tpu.memory_space<vmem>>, %arg6: memref<1x16x200xf32, #tpu.memory_space<vmem>>, %arg7: memref<16x384xbf16, #tpu.memory_space<vmem>>) attributes {dimension_semantics = [#tpu.dimension_semantics<parallel>], iteration_bounds = array<i64: 2>, scalar_prefetch = 0 : i64, scratch_operands = 1 : i64, tpu.core_type = #tpu.core_type<tc>, window_params = [{transform_indices = @transform_0, window_bounds = array<i64: 1, 16, 200>}, {transform_indices = @transform_1, window_bounds = array<i64: 1, 3, 16, 4>}, {pipeline_mode = #tpu.pipeline_mode<synchronous>, transform_indices = @transform_2, window_bounds = array<i64: 3, 16, 48>}, {pipeline_mode = #tpu.pipeline_mode<synchronous>, transform_indices = @transform_3, window_bounds = array<i64: 3, 16, 48>}, {pipeline_mode = #tpu.pipeline_mode<synchronous>, transform_indices = @transform_4, window_bounds = array<i64: 3, 16, 6>}, {transform_indices = @transform_5, window_bounds = array<i64: 1, 16, 200>}]} {
    %cst = arith.constant 0.000000e+00 : bf16
    %0 = vector.broadcast %cst : bf16 to vector<16x128xbf16>
    %c0 = arith.constant 0 : index
    %c0_0 = arith.constant 0 : index
    %1 = vector.load %arg7[%c0, %c0_0] : memref<16x384xbf16, #tpu.memory_space<vmem>>, vector<16x128xbf16>
    tpu.vector_store %arg7[%c0, %c0_0], %0 {strides = array<i32>} : memref<16x384xbf16, #tpu.memory_space<vmem>>, vector<16x128xbf16>,
    %cst_1 = arith.constant 0.000000e+00 : bf16
    %2 = vector.broadcast %cst_1 : bf16 to vector<16x128xbf16>
    %c0_2 = arith.constant 0 : index
    %c256 = arith.constant 256 : index
    %3 = vector.load %arg7[%c0_2, %c256] : memref<16x384xbf16, #tpu.memory_space<vmem>>, vector<16x128xbf16>
    tpu.vector_store %arg7[%c0_2, %c256], %2 {strides = array<i32>} : memref<16x384xbf16, #tpu.memory_space<vmem>>, vector<16x128xbf16>,
    %c0_3 = arith.constant 0 : index
    %c0_4 = arith.constant 0 : index
    %c0_5 = arith.constant 0 : index
    %c0_6 = arith.constant 0 : index
    %4 = vector.load %arg2[%c0_3, %c0_4, %c0_5, %c0_6] : memref<1x3x16x4xf32, #tpu.memory_space<vmem>>, vector<1x3x16x4xf32>
    %5 = vector.shape_cast %4 : vector<1x3x16x4xf32> to vector<3x16x4xf32>
    %c0_7 = arith.constant 0 : index
    %c0_8 = arith.constant 0 : index
    %c0_9 = arith.constant 0 : index
    %6 = vector.load %arg5[%c0_7, %c0_8, %c0_9] : memref<3x16x6xf32, #tpu.memory_space<vmem>>, vector<3x16x6xf32>
    %c0_10 = arith.constant 0 : index
    %c0_11 = arith.constant 0 : index
    %c0_12 = arith.constant 0 : index
    %7 = vector.load %arg1[%c0_10, %c0_11, %c0_12] : memref<1x16x200xf32, #tpu.memory_space<vmem>>, vector<1x16x200xf32>
    %8 = vector.shape_cast %7 : vector<1x16x200xf32> to vector<16x200xf32>
    %9 = vector.extract_strided_slice %5 {offsets = [0, 0, 0], sizes = [1, 16, 1], strides = [1, 1, 1]} : vector<3x16x4xf32> to vector<1x16x1xf32>
    %10 = vector.shape_cast %9 : vector<1x16x1xf32> to vector<16x1xf32>
    %11 = vector.extract_strided_slice %5 {offsets = [0, 0, 1], sizes = [1, 16, 1], strides = [1, 1, 1]} : vector<3x16x4xf32> to vector<1x16x1xf32>
    %12 = vector.shape_cast %11 : vector<1x16x1xf32> to vector<16x1xf32>
    %cst_13 = arith.constant dense<0.000000e+00> : vector<16xf32>
    %13 = vector.multi_reduction <add>, %8, %cst_13 [1] : vector<16x200xf32> to vector<16xf32>
    %14 = vector.shape_cast %13 : vector<16xf32> to vector<16x1xf32>
    %15 = arith.mulf %8, %8 : vector<16x200xf32>
    %cst_14 = arith.constant dense<0.000000e+00> : vector<16xf32>
    %16 = vector.multi_reduction <add>, %15, %cst_14 [1] : vector<16x200xf32> to vector<16xf32>
    %17 = vector.shape_cast %16 : vector<16xf32> to vector<16x1xf32>
    %cst_15 = arith.constant 5.000000e-03 : f32
    %18 = vector.broadcast %cst_15 : f32 to vector<16x1xf32>
    %19 = arith.mulf %14, %18 : vector<16x1xf32>
    %cst_16 = arith.constant 5.000000e-03 : f32
    %20 = vector.broadcast %cst_16 : f32 to vector<16x1xf32>
    %21 = arith.mulf %17, %20 : vector<16x1xf32>
    %22 = arith.mulf %19, %19 : vector<16x1xf32>
    %23 = arith.subf %21, %22 : vector<16x1xf32>
    %cst_17 = arith.constant 1.000000e+00 : f32
    %24 = vector.broadcast %cst_17 : f32 to vector<16x1xf32>
    %25 = arith.addf %24, %10 : vector<16x1xf32>
    %cst_18 = arith.constant 9.99999974E-6 : f32
    %26 = vector.broadcast %cst_18 : f32 to vector<16x1xf32>
    %27 = arith.addf %23, %26 : vector<16x1xf32>
    %28 = math.rsqrt %27 : vector<16x1xf32>
    %29 = arith.mulf %25, %28 : vector<16x1xf32>
    %30 = vector.broadcast %19 : vector<16x1xf32> to vector<16x200xf32>
    %31 = arith.subf %8, %30 : vector<16x200xf32>
    %32 = vector.broadcast %29 : vector<16x1xf32> to vector<16x200xf32>
    %33 = arith.mulf %32, %31 : vector<16x200xf32>
    %34 = vector.broadcast %12 : vector<16x1xf32> to vector<16x200xf32>
    %35 = arith.addf %33, %34 : vector<16x200xf32>
    %36 = vector.extract_strided_slice %6 {offsets = [0, 0, 2], sizes = [1, 16, 1], strides = [1, 1, 1]} : vector<3x16x6xf32> to vector<1x16x1xf32>
    %37 = vector.shape_cast %36 : vector<1x16x1xf32> to vector<16x1xf32>
    %38 = vector.extract_strided_slice %6 {offsets = [0, 0, 3], sizes = [1, 16, 1], strides = [1, 1, 1]} : vector<3x16x6xf32> to vector<1x16x1xf32>
    %39 = vector.shape_cast %38 : vector<1x16x1xf32> to vector<16x1xf32>
    %40 = vector.broadcast %37 : vector<16x1xf32> to vector<16x200xf32>
    %41 = arith.mulf %40, %35 : vector<16x200xf32>
    %42 = math.cos %41 : vector<16x200xf32>
    %cst_19 = arith.constant 1.000000e+00 : f32
    %43 = vector.broadcast %cst_19 : f32 to vector<16x200xf32>
    %44 = arith.subf %43, %42 : vector<16x200xf32>
    %45 = vector.broadcast %39 : vector<16x1xf32> to vector<16x200xf32>
    %46 = arith.mulf %45, %44 : vector<16x200xf32>
    %47 = arith.addf %35, %46 : vector<16x200xf32>
    %48 = vector.extract_strided_slice %6 {offsets = [0, 0, 0], sizes = [1, 16, 1], strides = [1, 1, 1]} : vector<3x16x6xf32> to vector<1x16x1xf32>
    %49 = vector.shape_cast %48 : vector<1x16x1xf32> to vector<16x1xf32>
    %50 = arith.truncf %47 : vector<16x200xf32> to vector<16x200xbf16>
    %c0_20 = arith.constant 0 : index
    %c128 = arith.constant 128 : index
    %51 = vector.load %arg7[%c0_20, %c128] : memref<16x384xbf16, #tpu.memory_space<vmem>>, vector<16x200xbf16>
    tpu.vector_store %arg7[%c0_20, %c128], %50 {strides = array<i32>} : memref<16x384xbf16, #tpu.memory_space<vmem>>, vector<16x200xbf16>,
    %c0_21 = arith.constant 0 : index
    %c127 = arith.constant 127 : index
    %52 = vector.load %arg7[%c0_21, %c127] : memref<16x384xbf16, #tpu.memory_space<vmem>>, vector<16x200xbf16>
    %c0_22 = arith.constant 0 : index
    %c128_23 = arith.constant 128 : index
    %53 = vector.load %arg7[%c0_22, %c128_23] : memref<16x384xbf16, #tpu.memory_space<vmem>>, vector<16x200xbf16>
    %c0_24 = arith.constant 0 : index
    %c129 = arith.constant 129 : index
    %54 = vector.load %arg7[%c0_24, %c129] : memref<16x384xbf16, #tpu.memory_space<vmem>>, vector<16x200xbf16>
    %55 = tpu.concatenate %52, %53, %54 in 0 : vector<16x200xbf16>, vector<16x200xbf16>, vector<16x200xbf16> -> vector<48x200xbf16>
    %c0_25 = arith.constant 0 : index
    %c0_26 = arith.constant 0 : index
    %c0_27 = arith.constant 0 : index
    %56 = vector.load %arg3[%c0_25, %c0_26, %c0_27] : memref<3x16x48xbf16, #tpu.memory_space<vmem>>, vector<1x16x48xbf16>
    %57 = vector.shape_cast %56 : vector<1x16x48xbf16> to vector<16x48xbf16>
    %cst_28 = arith.constant dense<0.000000e+00> : vector<16x200xf32>
    %58 = tpu.matmul %57, %55, %cst_28 {dimension_numbers = #tpu.dot_dimension_numbers<[1], [0], [0], [1], [0, 0, 1, 1], [], []>} : vector<16x48xbf16>, vector<48x200xbf16>, vector<16x200xf32> -> vector<16x200xf32>
    %59 = vector.broadcast %49 : vector<16x1xf32> to vector<16x200xf32>
    %60 = arith.addf %58, %59 : vector<16x200xf32>
    %61 = vector.extract_strided_slice %5 {offsets = [0, 0, 2], sizes = [1, 16, 1], strides = [1, 1, 1]} : vector<3x16x4xf32> to vector<1x16x1xf32>
    %62 = vector.shape_cast %61 : vector<1x16x1xf32> to vector<16x1xf32>
    %63 = vector.extract_strided_slice %5 {offsets = [0, 0, 3], sizes = [1, 16, 1], strides = [1, 1, 1]} : vector<3x16x4xf32> to vector<1x16x1xf32>
    %64 = vector.shape_cast %63 : vector<1x16x1xf32> to vector<16x1xf32>
    %cst_29 = arith.constant dense<0.000000e+00> : vector<16xf32>
    %65 = vector.multi_reduction <add>, %60, %cst_29 [1] : vector<16x200xf32> to vector<16xf32>
    %66 = vector.shape_cast %65 : vector<16xf32> to vector<16x1xf32>
    %67 = arith.mulf %60, %60 : vector<16x200xf32>
    %cst_30 = arith.constant dense<0.000000e+00> : vector<16xf32>
    %68 = vector.multi_reduction <add>, %67, %cst_30 [1] : vector<16x200xf32> to vector<16xf32>
    %69 = vector.shape_cast %68 : vector<16xf32> to vector<16x1xf32>
    %cst_31 = arith.constant 5.000000e-03 : f32
    %70 = vector.broadcast %cst_31 : f32 to vector<16x1xf32>
    %71 = arith.mulf %66, %70 : vector<16x1xf32>
    %cst_32 = arith.constant 5.000000e-03 : f32
    %72 = vector.broadcast %cst_32 : f32 to vector<16x1xf32>
    %73 = arith.mulf %69, %72 : vector<16x1xf32>
    %74 = arith.mulf %71, %71 : vector<16x1xf32>
    %75 = arith.subf %73, %74 : vector<16x1xf32>
    %cst_33 = arith.constant 1.000000e+00 : f32
    %76 = vector.broadcast %cst_33 : f32 to vector<16x1xf32>
    %77 = arith.addf %76, %62 : vector<16x1xf32>
    %cst_34 = arith.constant 9.99999974E-6 : f32
    %78 = vector.broadcast %cst_34 : f32 to vector<16x1xf32>
    %79 = arith.addf %75, %78 : vector<16x1xf32>
    %80 = math.rsqrt %79 : vector<16x1xf32>
    %81 = arith.mulf %77, %80 : vector<16x1xf32>
    %82 = vector.broadcast %71 : vector<16x1xf32> to vector<16x200xf32>
    %83 = arith.subf %60, %82 : vector<16x200xf32>
    %84 = vector.broadcast %81 : vector<16x1xf32> to vector<16x200xf32>
    %85 = arith.mulf %84, %83 : vector<16x200xf32>
    %86 = vector.broadcast %64 : vector<16x1xf32> to vector<16x200xf32>
    %87 = arith.addf %85, %86 : vector<16x200xf32>
    %88 = vector.extract_strided_slice %6 {offsets = [0, 0, 4], sizes = [1, 16, 1], strides = [1, 1, 1]} : vector<3x16x6xf32> to vector<1x16x1xf32>
    %89 = vector.shape_cast %88 : vector<1x16x1xf32> to vector<16x1xf32>
    %90 = vector.extract_strided_slice %6 {offsets = [0, 0, 5], sizes = [1, 16, 1], strides = [1, 1, 1]} : vector<3x16x6xf32> to vector<1x16x1xf32>
    %91 = vector.shape_cast %90 : vector<1x16x1xf32> to vector<16x1xf32>
    %92 = vector.broadcast %89 : vector<16x1xf32> to vector<16x200xf32>
    %93 = arith.mulf %92, %87 : vector<16x200xf32>
    %94 = math.cos %93 : vector<16x200xf32>
    %cst_35 = arith.constant 1.000000e+00 : f32
    %95 = vector.broadcast %cst_35 : f32 to vector<16x200xf32>
    %96 = arith.subf %95, %94 : vector<16x200xf32>
    %97 = vector.broadcast %91 : vector<16x1xf32> to vector<16x200xf32>
    %98 = arith.mulf %97, %96 : vector<16x200xf32>
    %99 = arith.addf %87, %98 : vector<16x200xf32>
    %100 = vector.extract_strided_slice %6 {offsets = [0, 0, 1], sizes = [1, 16, 1], strides = [1, 1, 1]} : vector<3x16x6xf32> to vector<1x16x1xf32>
    %101 = vector.shape_cast %100 : vector<1x16x1xf32> to vector<16x1xf32>
    %102 = arith.truncf %99 : vector<16x200xf32> to vector<16x200xbf16>
    %c0_36 = arith.constant 0 : index
    %c128_37 = arith.constant 128 : index
    %103 = vector.load %arg7[%c0_36, %c128_37] : memref<16x384xbf16, #tpu.memory_space<vmem>>, vector<16x200xbf16>
    tpu.vector_store %arg7[%c0_36, %c128_37], %102 {strides = array<i32>} : memref<16x384xbf16, #tpu.memory_space<vmem>>, vector<16x200xbf16>,
    %c0_38 = arith.constant 0 : index
    %c127_39 = arith.constant 127 : index
    %104 = vector.load %arg7[%c0_38, %c127_39] : memref<16x384xbf16, #tpu.memory_space<vmem>>, vector<16x200xbf16>
    %c0_40 = arith.constant 0 : index
    %c128_41 = arith.constant 128 : index
    %105 = vector.load %arg7[%c0_40, %c128_41] : memref<16x384xbf16, #tpu.memory_space<vmem>>, vector<16x200xbf16>
    %c0_42 = arith.constant 0 : index
    %c129_43 = arith.constant 129 : index
    %106 = vector.load %arg7[%c0_42, %c129_43] : memref<16x384xbf16, #tpu.memory_space<vmem>>, vector<16x200xbf16>
    %107 = tpu.concatenate %104, %105, %106 in 0 : vector<16x200xbf16>, vector<16x200xbf16>, vector<16x200xbf16> -> vector<48x200xbf16>
    %c0_44 = arith.constant 0 : index
    %c0_45 = arith.constant 0 : index
    %c0_46 = arith.constant 0 : index
    %108 = vector.load %arg4[%c0_44, %c0_45, %c0_46] : memref<3x16x48xbf16, #tpu.memory_space<vmem>>, vector<1x16x48xbf16>
    %109 = vector.shape_cast %108 : vector<1x16x48xbf16> to vector<16x48xbf16>
    %cst_47 = arith.constant dense<0.000000e+00> : vector<16x200xf32>
    %110 = tpu.matmul %109, %107, %cst_47 {dimension_numbers = #tpu.dot_dimension_numbers<[1], [0], [0], [1], [0, 0, 1, 1], [], []>} : vector<16x48xbf16>, vector<48x200xbf16>, vector<16x200xf32> -> vector<16x200xf32>
    %111 = vector.broadcast %101 : vector<16x1xf32> to vector<16x200xf32>
    %112 = arith.addf %110, %111 : vector<16x200xf32>
    %113 = arith.addf %112, %8 : vector<16x200xf32>
    %114 = vector.extract_strided_slice %5 {offsets = [1, 0, 0], sizes = [1, 16, 1], strides = [1, 1, 1]} : vector<3x16x4xf32> to vector<1x16x1xf32>
    %115 = vector.shape_cast %114 : vector<1x16x1xf32> to vector<16x1xf32>
    %116 = vector.extract_strided_slice %5 {offsets = [1, 0, 1], sizes = [1, 16, 1], strides = [1, 1, 1]} : vector<3x16x4xf32> to vector<1x16x1xf32>
    %117 = vector.shape_cast %116 : vector<1x16x1xf32> to vector<16x1xf32>
    %cst_48 = arith.constant dense<0.000000e+00> : vector<16xf32>
    %118 = vector.multi_reduction <add>, %113, %cst_48 [1] : vector<16x200xf32> to vector<16xf32>
    %119 = vector.shape_cast %118 : vector<16xf32> to vector<16x1xf32>
    %120 = arith.mulf %113, %113 : vector<16x200xf32>
    %cst_49 = arith.constant dense<0.000000e+00> : vector<16xf32>
    %121 = vector.multi_reduction <add>, %120, %cst_49 [1] : vector<16x200xf32> to vector<16xf32>
    %122 = vector.shape_cast %121 : vector<16xf32> to vector<16x1xf32>
    %cst_50 = arith.constant 5.000000e-03 : f32
    %123 = vector.broadcast %cst_50 : f32 to vector<16x1xf32>
    %124 = arith.mulf %119, %123 : vector<16x1xf32>
    %cst_51 = arith.constant 5.000000e-03 : f32
    %125 = vector.broadcast %cst_51 : f32 to vector<16x1xf32>
    %126 = arith.mulf %122, %125 : vector<16x1xf32>
    %127 = arith.mulf %124, %124 : vector<16x1xf32>
    %128 = arith.subf %126, %127 : vector<16x1xf32>
    %cst_52 = arith.constant 1.000000e+00 : f32
    %129 = vector.broadcast %cst_52 : f32 to vector<16x1xf32>
    %130 = arith.addf %129, %115 : vector<16x1xf32>
    %cst_53 = arith.constant 9.99999974E-6 : f32
    %131 = vector.broadcast %cst_53 : f32 to vector<16x1xf32>
    %132 = arith.addf %128, %131 : vector<16x1xf32>
    %133 = math.rsqrt %132 : vector<16x1xf32>
    %134 = arith.mulf %130, %133 : vector<16x1xf32>
    %135 = vector.broadcast %124 : vector<16x1xf32> to vector<16x200xf32>
    %136 = arith.subf %113, %135 : vector<16x200xf32>
    %137 = vector.broadcast %134 : vector<16x1xf32> to vector<16x200xf32>
    %138 = arith.mulf %137, %136 : vector<16x200xf32>
    %139 = vector.broadcast %117 : vector<16x1xf32> to vector<16x200xf32>
    %140 = arith.addf %138, %139 : vector<16x200xf32>
    %141 = vector.extract_strided_slice %6 {offsets = [1, 0, 2], sizes = [1, 16, 1], strides = [1, 1, 1]} : vector<3x16x6xf32> to vector<1x16x1xf32>
    %142 = vector.shape_cast %141 : vector<1x16x1xf32> to vector<16x1xf32>
    %143 = vector.extract_strided_slice %6 {offsets = [1, 0, 3], sizes = [1, 16, 1], strides = [1, 1, 1]} : vector<3x16x6xf32> to vector<1x16x1xf32>
    %144 = vector.shape_cast %143 : vector<1x16x1xf32> to vector<16x1xf32>
    %145 = vector.broadcast %142 : vector<16x1xf32> to vector<16x200xf32>
    %146 = arith.mulf %145, %140 : vector<16x200xf32>
    %147 = math.cos %146 : vector<16x200xf32>
    %cst_54 = arith.constant 1.000000e+00 : f32
    %148 = vector.broadcast %cst_54 : f32 to vector<16x200xf32>
    %149 = arith.subf %148, %147 : vector<16x200xf32>
    %150 = vector.broadcast %144 : vector<16x1xf32> to vector<16x200xf32>
    %151 = arith.mulf %150, %149 : vector<16x200xf32>
    %152 = arith.addf %140, %151 : vector<16x200xf32>
    %153 = vector.extract_strided_slice %6 {offsets = [1, 0, 0], sizes = [1, 16, 1], strides = [1, 1, 1]} : vector<3x16x6xf32> to vector<1x16x1xf32>
    %154 = vector.shape_cast %153 : vector<1x16x1xf32> to vector<16x1xf32>
    %155 = arith.truncf %152 : vector<16x200xf32> to vector<16x200xbf16>
    %c0_55 = arith.constant 0 : index
    %c128_56 = arith.constant 128 : index
    %156 = vector.load %arg7[%c0_55, %c128_56] : memref<16x384xbf16, #tpu.memory_space<vmem>>, vector<16x200xbf16>
    tpu.vector_store %arg7[%c0_55, %c128_56], %155 {strides = array<i32>} : memref<16x384xbf16, #tpu.memory_space<vmem>>, vector<16x200xbf16>,
    %c0_57 = arith.constant 0 : index
    %c125 = arith.constant 125 : index
    %157 = vector.load %arg7[%c0_57, %c125] : memref<16x384xbf16, #tpu.memory_space<vmem>>, vector<16x200xbf16>
    %c0_58 = arith.constant 0 : index
    %c128_59 = arith.constant 128 : index
    %158 = vector.load %arg7[%c0_58, %c128_59] : memref<16x384xbf16, #tpu.memory_space<vmem>>, vector<16x200xbf16>
    %c0_60 = arith.constant 0 : index
    %c131 = arith.constant 131 : index
    %159 = vector.load %arg7[%c0_60, %c131] : memref<16x384xbf16, #tpu.memory_space<vmem>>, vector<16x200xbf16>
    %160 = tpu.concatenate %157, %158, %159 in 0 : vector<16x200xbf16>, vector<16x200xbf16>, vector<16x200xbf16> -> vector<48x200xbf16>
    %c1 = arith.constant 1 : index
    %c0_61 = arith.constant 0 : index
    %c0_62 = arith.constant 0 : index
    %161 = vector.load %arg3[%c1, %c0_61, %c0_62] : memref<3x16x48xbf16, #tpu.memory_space<vmem>>, vector<1x16x48xbf16>
    %162 = vector.shape_cast %161 : vector<1x16x48xbf16> to vector<16x48xbf16>
    %cst_63 = arith.constant dense<0.000000e+00> : vector<16x200xf32>
    %163 = tpu.matmul %162, %160, %cst_63 {dimension_numbers = #tpu.dot_dimension_numbers<[1], [0], [0], [1], [0, 0, 1, 1], [], []>} : vector<16x48xbf16>, vector<48x200xbf16>, vector<16x200xf32> -> vector<16x200xf32>
    %164 = vector.broadcast %154 : vector<16x1xf32> to vector<16x200xf32>
    %165 = arith.addf %163, %164 : vector<16x200xf32>
    %166 = vector.extract_strided_slice %5 {offsets = [1, 0, 2], sizes = [1, 16, 1], strides = [1, 1, 1]} : vector<3x16x4xf32> to vector<1x16x1xf32>
    %167 = vector.shape_cast %166 : vector<1x16x1xf32> to vector<16x1xf32>
    %168 = vector.extract_strided_slice %5 {offsets = [1, 0, 3], sizes = [1, 16, 1], strides = [1, 1, 1]} : vector<3x16x4xf32> to vector<1x16x1xf32>
    %169 = vector.shape_cast %168 : vector<1x16x1xf32> to vector<16x1xf32>
    %cst_64 = arith.constant dense<0.000000e+00> : vector<16xf32>
    %170 = vector.multi_reduction <add>, %165, %cst_64 [1] : vector<16x200xf32> to vector<16xf32>
    %171 = vector.shape_cast %170 : vector<16xf32> to vector<16x1xf32>
    %172 = arith.mulf %165, %165 : vector<16x200xf32>
    %cst_65 = arith.constant dense<0.000000e+00> : vector<16xf32>
    %173 = vector.multi_reduction <add>, %172, %cst_65 [1] : vector<16x200xf32> to vector<16xf32>
    %174 = vector.shape_cast %173 : vector<16xf32> to vector<16x1xf32>
    %cst_66 = arith.constant 5.000000e-03 : f32
    %175 = vector.broadcast %cst_66 : f32 to vector<16x1xf32>
    %176 = arith.mulf %171, %175 : vector<16x1xf32>
    %cst_67 = arith.constant 5.000000e-03 : f32
    %177 = vector.broadcast %cst_67 : f32 to vector<16x1xf32>
    %178 = arith.mulf %174, %177 : vector<16x1xf32>
    %179 = arith.mulf %176, %176 : vector<16x1xf32>
    %180 = arith.subf %178, %179 : vector<16x1xf32>
    %cst_68 = arith.constant 1.000000e+00 : f32
    %181 = vector.broadcast %cst_68 : f32 to vector<16x1xf32>
    %182 = arith.addf %181, %167 : vector<16x1xf32>
    %cst_69 = arith.constant 9.99999974E-6 : f32
    %183 = vector.broadcast %cst_69 : f32 to vector<16x1xf32>
    %184 = arith.addf %180, %183 : vector<16x1xf32>
    %185 = math.rsqrt %184 : vector<16x1xf32>
    %186 = arith.mulf %182, %185 : vector<16x1xf32>
    %187 = vector.broadcast %176 : vector<16x1xf32> to vector<16x200xf32>
    %188 = arith.subf %165, %187 : vector<16x200xf32>
    %189 = vector.broadcast %186 : vector<16x1xf32> to vector<16x200xf32>
    %190 = arith.mulf %189, %188 : vector<16x200xf32>
    %191 = vector.broadcast %169 : vector<16x1xf32> to vector<16x200xf32>
    %192 = arith.addf %190, %191 : vector<16x200xf32>
    %193 = vector.extract_strided_slice %6 {offsets = [1, 0, 4], sizes = [1, 16, 1], strides = [1, 1, 1]} : vector<3x16x6xf32> to vector<1x16x1xf32>
    %194 = vector.shape_cast %193 : vector<1x16x1xf32> to vector<16x1xf32>
    %195 = vector.extract_strided_slice %6 {offsets = [1, 0, 5], sizes = [1, 16, 1], strides = [1, 1, 1]} : vector<3x16x6xf32> to vector<1x16x1xf32>
    %196 = vector.shape_cast %195 : vector<1x16x1xf32> to vector<16x1xf32>
    %197 = vector.broadcast %194 : vector<16x1xf32> to vector<16x200xf32>
    %198 = arith.mulf %197, %192 : vector<16x200xf32>
    %199 = math.cos %198 : vector<16x200xf32>
    %cst_70 = arith.constant 1.000000e+00 : f32
    %200 = vector.broadcast %cst_70 : f32 to vector<16x200xf32>
    %201 = arith.subf %200, %199 : vector<16x200xf32>
    %202 = vector.broadcast %196 : vector<16x1xf32> to vector<16x200xf32>
    %203 = arith.mulf %202, %201 : vector<16x200xf32>
    %204 = arith.addf %192, %203 : vector<16x200xf32>
    %205 = vector.extract_strided_slice %6 {offsets = [1, 0, 1], sizes = [1, 16, 1], strides = [1, 1, 1]} : vector<3x16x6xf32> to vector<1x16x1xf32>
    %206 = vector.shape_cast %205 : vector<1x16x1xf32> to vector<16x1xf32>
    %207 = arith.truncf %204 : vector<16x200xf32> to vector<16x200xbf16>
    %c0_71 = arith.constant 0 : index
    %c128_72 = arith.constant 128 : index
    %208 = vector.load %arg7[%c0_71, %c128_72] : memref<16x384xbf16, #tpu.memory_space<vmem>>, vector<16x200xbf16>
    tpu.vector_store %arg7[%c0_71, %c128_72], %207 {strides = array<i32>} : memref<16x384xbf16, #tpu.memory_space<vmem>>, vector<16x200xbf16>,
    %c0_73 = arith.constant 0 : index
    %c127_74 = arith.constant 127 : index
    %209 = vector.load %arg7[%c0_73, %c127_74] : memref<16x384xbf16, #tpu.memory_space<vmem>>, vector<16x200xbf16>
    %c0_75 = arith.constant 0 : index
    %c128_76 = arith.constant 128 : index
    %210 = vector.load %arg7[%c0_75, %c128_76] : memref<16x384xbf16, #tpu.memory_space<vmem>>, vector<16x200xbf16>
    %c0_77 = arith.constant 0 : index
    %c129_78 = arith.constant 129 : index
    %211 = vector.load %arg7[%c0_77, %c129_78] : memref<16x384xbf16, #tpu.memory_space<vmem>>, vector<16x200xbf16>
    %212 = tpu.concatenate %209, %210, %211 in 0 : vector<16x200xbf16>, vector<16x200xbf16>, vector<16x200xbf16> -> vector<48x200xbf16>
    %c1_79 = arith.constant 1 : index
    %c0_80 = arith.constant 0 : index
    %c0_81 = arith.constant 0 : index
    %213 = vector.load %arg4[%c1_79, %c0_80, %c0_81] : memref<3x16x48xbf16, #tpu.memory_space<vmem>>, vector<1x16x48xbf16>
    %214 = vector.shape_cast %213 : vector<1x16x48xbf16> to vector<16x48xbf16>
    %cst_82 = arith.constant dense<0.000000e+00> : vector<16x200xf32>
    %215 = tpu.matmul %214, %212, %cst_82 {dimension_numbers = #tpu.dot_dimension_numbers<[1], [0], [0], [1], [0, 0, 1, 1], [], []>} : vector<16x48xbf16>, vector<48x200xbf16>, vector<16x200xf32> -> vector<16x200xf32>
    %216 = vector.broadcast %206 : vector<16x1xf32> to vector<16x200xf32>
    %217 = arith.addf %215, %216 : vector<16x200xf32>
    %218 = arith.addf %217, %113 : vector<16x200xf32>
    %219 = vector.extract_strided_slice %5 {offsets = [2, 0, 0], sizes = [1, 16, 1], strides = [1, 1, 1]} : vector<3x16x4xf32> to vector<1x16x1xf32>
    %220 = vector.shape_cast %219 : vector<1x16x1xf32> to vector<16x1xf32>
    %221 = vector.extract_strided_slice %5 {offsets = [2, 0, 1], sizes = [1, 16, 1], strides = [1, 1, 1]} : vector<3x16x4xf32> to vector<1x16x1xf32>
    %222 = vector.shape_cast %221 : vector<1x16x1xf32> to vector<16x1xf32>
    %cst_83 = arith.constant dense<0.000000e+00> : vector<16xf32>
    %223 = vector.multi_reduction <add>, %218, %cst_83 [1] : vector<16x200xf32> to vector<16xf32>
    %224 = vector.shape_cast %223 : vector<16xf32> to vector<16x1xf32>
    %225 = arith.mulf %218, %218 : vector<16x200xf32>
    %cst_84 = arith.constant dense<0.000000e+00> : vector<16xf32>
    %226 = vector.multi_reduction <add>, %225, %cst_84 [1] : vector<16x200xf32> to vector<16xf32>
    %227 = vector.shape_cast %226 : vector<16xf32> to vector<16x1xf32>
    %cst_85 = arith.constant 5.000000e-03 : f32
    %228 = vector.broadcast %cst_85 : f32 to vector<16x1xf32>
    %229 = arith.mulf %224, %228 : vector<16x1xf32>
    %cst_86 = arith.constant 5.000000e-03 : f32
    %230 = vector.broadcast %cst_86 : f32 to vector<16x1xf32>
    %231 = arith.mulf %227, %230 : vector<16x1xf32>
    %232 = arith.mulf %229, %229 : vector<16x1xf32>
    %233 = arith.subf %231, %232 : vector<16x1xf32>
    %cst_87 = arith.constant 1.000000e+00 : f32
    %234 = vector.broadcast %cst_87 : f32 to vector<16x1xf32>
    %235 = arith.addf %234, %220 : vector<16x1xf32>
    %cst_88 = arith.constant 9.99999974E-6 : f32
    %236 = vector.broadcast %cst_88 : f32 to vector<16x1xf32>
    %237 = arith.addf %233, %236 : vector<16x1xf32>
    %238 = math.rsqrt %237 : vector<16x1xf32>
    %239 = arith.mulf %235, %238 : vector<16x1xf32>
    %240 = vector.broadcast %229 : vector<16x1xf32> to vector<16x200xf32>
    %241 = arith.subf %218, %240 : vector<16x200xf32>
    %242 = vector.broadcast %239 : vector<16x1xf32> to vector<16x200xf32>
    %243 = arith.mulf %242, %241 : vector<16x200xf32>
    %244 = vector.broadcast %222 : vector<16x1xf32> to vector<16x200xf32>
    %245 = arith.addf %243, %244 : vector<16x200xf32>
    %246 = vector.extract_strided_slice %6 {offsets = [2, 0, 2], sizes = [1, 16, 1], strides = [1, 1, 1]} : vector<3x16x6xf32> to vector<1x16x1xf32>
    %247 = vector.shape_cast %246 : vector<1x16x1xf32> to vector<16x1xf32>
    %248 = vector.extract_strided_slice %6 {offsets = [2, 0, 3], sizes = [1, 16, 1], strides = [1, 1, 1]} : vector<3x16x6xf32> to vector<1x16x1xf32>
    %249 = vector.shape_cast %248 : vector<1x16x1xf32> to vector<16x1xf32>
    %250 = vector.broadcast %247 : vector<16x1xf32> to vector<16x200xf32>
    %251 = arith.mulf %250, %245 : vector<16x200xf32>
    %252 = math.cos %251 : vector<16x200xf32>
    %cst_89 = arith.constant 1.000000e+00 : f32
    %253 = vector.broadcast %cst_89 : f32 to vector<16x200xf32>
    %254 = arith.subf %253, %252 : vector<16x200xf32>
    %255 = vector.broadcast %249 : vector<16x1xf32> to vector<16x200xf32>
    %256 = arith.mulf %255, %254 : vector<16x200xf32>
    %257 = arith.addf %245, %256 : vector<16x200xf32>
    %258 = vector.extract_strided_slice %6 {offsets = [2, 0, 0], sizes = [1, 16, 1], strides = [1, 1, 1]} : vector<3x16x6xf32> to vector<1x16x1xf32>
    %259 = vector.shape_cast %258 : vector<1x16x1xf32> to vector<16x1xf32>
    %260 = arith.truncf %257 : vector<16x200xf32> to vector<16x200xbf16>
    %c0_90 = arith.constant 0 : index
    %c128_91 = arith.constant 128 : index
    %261 = vector.load %arg7[%c0_90, %c128_91] : memref<16x384xbf16, #tpu.memory_space<vmem>>, vector<16x200xbf16>
    tpu.vector_store %arg7[%c0_90, %c128_91], %260 {strides = array<i32>} : memref<16x384xbf16, #tpu.memory_space<vmem>>, vector<16x200xbf16>,
    %c0_92 = arith.constant 0 : index
    %c123 = arith.constant 123 : index
    %262 = vector.load %arg7[%c0_92, %c123] : memref<16x384xbf16, #tpu.memory_space<vmem>>, vector<16x200xbf16>
    %c0_93 = arith.constant 0 : index
    %c128_94 = arith.constant 128 : index
    %263 = vector.load %arg7[%c0_93, %c128_94] : memref<16x384xbf16, #tpu.memory_space<vmem>>, vector<16x200xbf16>
    %c0_95 = arith.constant 0 : index
    %c133 = arith.constant 133 : index
    %264 = vector.load %arg7[%c0_95, %c133] : memref<16x384xbf16, #tpu.memory_space<vmem>>, vector<16x200xbf16>
    %265 = tpu.concatenate %262, %263, %264 in 0 : vector<16x200xbf16>, vector<16x200xbf16>, vector<16x200xbf16> -> vector<48x200xbf16>
    %c2 = arith.constant 2 : index
    %c0_96 = arith.constant 0 : index
    %c0_97 = arith.constant 0 : index
    %266 = vector.load %arg3[%c2, %c0_96, %c0_97] : memref<3x16x48xbf16, #tpu.memory_space<vmem>>, vector<1x16x48xbf16>
    %267 = vector.shape_cast %266 : vector<1x16x48xbf16> to vector<16x48xbf16>
    %cst_98 = arith.constant dense<0.000000e+00> : vector<16x200xf32>
    %268 = tpu.matmul %267, %265, %cst_98 {dimension_numbers = #tpu.dot_dimension_numbers<[1], [0], [0], [1], [0, 0, 1, 1], [], []>} : vector<16x48xbf16>, vector<48x200xbf16>, vector<16x200xf32> -> vector<16x200xf32>
    %269 = vector.broadcast %259 : vector<16x1xf32> to vector<16x200xf32>
    %270 = arith.addf %268, %269 : vector<16x200xf32>
    %271 = vector.extract_strided_slice %5 {offsets = [2, 0, 2], sizes = [1, 16, 1], strides = [1, 1, 1]} : vector<3x16x4xf32> to vector<1x16x1xf32>
    %272 = vector.shape_cast %271 : vector<1x16x1xf32> to vector<16x1xf32>
    %273 = vector.extract_strided_slice %5 {offsets = [2, 0, 3], sizes = [1, 16, 1], strides = [1, 1, 1]} : vector<3x16x4xf32> to vector<1x16x1xf32>
    %274 = vector.shape_cast %273 : vector<1x16x1xf32> to vector<16x1xf32>
    %cst_99 = arith.constant dense<0.000000e+00> : vector<16xf32>
    %275 = vector.multi_reduction <add>, %270, %cst_99 [1] : vector<16x200xf32> to vector<16xf32>
    %276 = vector.shape_cast %275 : vector<16xf32> to vector<16x1xf32>
    %277 = arith.mulf %270, %270 : vector<16x200xf32>
    %cst_100 = arith.constant dense<0.000000e+00> : vector<16xf32>
    %278 = vector.multi_reduction <add>, %277, %cst_100 [1] : vector<16x200xf32> to vector<16xf32>
    %279 = vector.shape_cast %278 : vector<16xf32> to vector<16x1xf32>
    %cst_101 = arith.constant 5.000000e-03 : f32
    %280 = vector.broadcast %cst_101 : f32 to vector<16x1xf32>
    %281 = arith.mulf %276, %280 : vector<16x1xf32>
    %cst_102 = arith.constant 5.000000e-03 : f32
    %282 = vector.broadcast %cst_102 : f32 to vector<16x1xf32>
    %283 = arith.mulf %279, %282 : vector<16x1xf32>
    %284 = arith.mulf %281, %281 : vector<16x1xf32>
    %285 = arith.subf %283, %284 : vector<16x1xf32>
    %cst_103 = arith.constant 1.000000e+00 : f32
    %286 = vector.broadcast %cst_103 : f32 to vector<16x1xf32>
    %287 = arith.addf %286, %272 : vector<16x1xf32>
    %cst_104 = arith.constant 9.99999974E-6 : f32
    %288 = vector.broadcast %cst_104 : f32 to vector<16x1xf32>
    %289 = arith.addf %285, %288 : vector<16x1xf32>
    %290 = math.rsqrt %289 : vector<16x1xf32>
    %291 = arith.mulf %287, %290 : vector<16x1xf32>
    %292 = vector.broadcast %281 : vector<16x1xf32> to vector<16x200xf32>
    %293 = arith.subf %270, %292 : vector<16x200xf32>
    %294 = vector.broadcast %291 : vector<16x1xf32> to vector<16x200xf32>
    %295 = arith.mulf %294, %293 : vector<16x200xf32>
    %296 = vector.broadcast %274 : vector<16x1xf32> to vector<16x200xf32>
    %297 = arith.addf %295, %296 : vector<16x200xf32>
    %298 = vector.extract_strided_slice %6 {offsets = [2, 0, 4], sizes = [1, 16, 1], strides = [1, 1, 1]} : vector<3x16x6xf32> to vector<1x16x1xf32>
    %299 = vector.shape_cast %298 : vector<1x16x1xf32> to vector<16x1xf32>
    %300 = vector.extract_strided_slice %6 {offsets = [2, 0, 5], sizes = [1, 16, 1], strides = [1, 1, 1]} : vector<3x16x6xf32> to vector<1x16x1xf32>
    %301 = vector.shape_cast %300 : vector<1x16x1xf32> to vector<16x1xf32>
    %302 = vector.broadcast %299 : vector<16x1xf32> to vector<16x200xf32>
    %303 = arith.mulf %302, %297 : vector<16x200xf32>
    %304 = math.cos %303 : vector<16x200xf32>
    %cst_105 = arith.constant 1.000000e+00 : f32
    %305 = vector.broadcast %cst_105 : f32 to vector<16x200xf32>
    %306 = arith.subf %305, %304 : vector<16x200xf32>
    %307 = vector.broadcast %301 : vector<16x1xf32> to vector<16x200xf32>
    %308 = arith.mulf %307, %306 : vector<16x200xf32>
    %309 = arith.addf %297, %308 : vector<16x200xf32>
    %310 = vector.extract_strided_slice %6 {offsets = [2, 0, 1], sizes = [1, 16, 1], strides = [1, 1, 1]} : vector<3x16x6xf32> to vector<1x16x1xf32>
    %311 = vector.shape_cast %310 : vector<1x16x1xf32> to vector<16x1xf32>
    %312 = arith.truncf %309 : vector<16x200xf32> to vector<16x200xbf16>
    %c0_106 = arith.constant 0 : index
    %c128_107 = arith.constant 128 : index
    %313 = vector.load %arg7[%c0_106, %c128_107] : memref<16x384xbf16, #tpu.memory_space<vmem>>, vector<16x200xbf16>
    tpu.vector_store %arg7[%c0_106, %c128_107], %312 {strides = array<i32>} : memref<16x384xbf16, #tpu.memory_space<vmem>>, vector<16x200xbf16>,
    %c0_108 = arith.constant 0 : index
    %c127_109 = arith.constant 127 : index
    %314 = vector.load %arg7[%c0_108, %c127_109] : memref<16x384xbf16, #tpu.memory_space<vmem>>, vector<16x200xbf16>
    %c0_110 = arith.constant 0 : index
    %c128_111 = arith.constant 128 : index
    %315 = vector.load %arg7[%c0_110, %c128_111] : memref<16x384xbf16, #tpu.memory_space<vmem>>, vector<16x200xbf16>
    %c0_112 = arith.constant 0 : index
    %c129_113 = arith.constant 129 : index
    %316 = vector.load %arg7[%c0_112, %c129_113] : memref<16x384xbf16, #tpu.memory_space<vmem>>, vector<16x200xbf16>
    %317 = tpu.concatenate %314, %315, %316 in 0 : vector<16x200xbf16>, vector<16x200xbf16>, vector<16x200xbf16> -> vector<48x200xbf16>
    %c2_114 = arith.constant 2 : index
    %c0_115 = arith.constant 0 : index
    %c0_116 = arith.constant 0 : index
    %318 = vector.load %arg4[%c2_114, %c0_115, %c0_116] : memref<3x16x48xbf16, #tpu.memory_space<vmem>>, vector<1x16x48xbf16>
    %319 = vector.shape_cast %318 : vector<1x16x48xbf16> to vector<16x48xbf16>
    %cst_117 = arith.constant dense<0.000000e+00> : vector<16x200xf32>
    %320 = tpu.matmul %319, %317, %cst_117 {dimension_numbers = #tpu.dot_dimension_numbers<[1], [0], [0], [1], [0, 0, 1, 1], [], []>} : vector<16x48xbf16>, vector<48x200xbf16>, vector<16x200xf32> -> vector<16x200xf32>
    %321 = vector.broadcast %311 : vector<16x1xf32> to vector<16x200xf32>
    %322 = arith.addf %320, %321 : vector<16x200xf32>
    %323 = arith.addf %322, %218 : vector<16x200xf32>
    %c0_118 = arith.constant 0 : index
    %c0_119 = arith.constant 0 : index
    %c0_120 = arith.constant 0 : index
    %324 = vector.load %arg6[%c0_118, %c0_119, %c0_120] : memref<1x16x200xf32, #tpu.memory_space<vmem>>, vector<1x16x200xf32>
    %325 = vector.shape_cast %324 : vector<1x16x200xf32> to vector<16x200xf32>
    %326 = vector.shape_cast %323 : vector<16x200xf32> to vector<1x16x200xf32>
    tpu.vector_store %arg6[%c0_118, %c0_119, %c0_120], %326 {strides = array<i32>} : memref<1x16x200xf32, #tpu.memory_space<vmem>>, vector<1x16x200xf32>,
    return
  }
  func.func @transform_0(%arg0: i32) -> (i32, i32, i32) {
    %c0_i32 = arith.constant 0 : i32
    %c0_i32_0 = arith.constant 0 : i32
    %c0_i32_1 = arith.constant 0 : i32
    return %arg0, %c0_i32, %c0_i32_0 : i32, i32, i32
  }
  func.func @transform_1(%arg0: i32) -> (i32, i32, i32, i32) {
    %c0_i32 = arith.constant 0 : i32
    %c0_i32_0 = arith.constant 0 : i32
    %c0_i32_1 = arith.constant 0 : i32
    %c0_i32_2 = arith.constant 0 : i32
    return %arg0, %c0_i32, %c0_i32_0, %c0_i32_1 : i32, i32, i32, i32
  }
  func.func @transform_2(%arg0: i32) -> (i32, i32, i32) {
    %c0_i32 = arith.constant 0 : i32
    %c0_i32_0 = arith.constant 0 : i32
    %c0_i32_1 = arith.constant 0 : i32
    %c0_i32_2 = arith.constant 0 : i32
    return %c0_i32, %c0_i32_0, %c0_i32_1 : i32, i32, i32
  }
  func.func @transform_3(%arg0: i32) -> (i32, i32, i32) {
    %c0_i32 = arith.constant 0 : i32
    %c0_i32_0 = arith.constant 0 : i32
    %c0_i32_1 = arith.constant 0 : i32
    %c0_i32_2 = arith.constant 0 : i32
    return %c0_i32, %c0_i32_0, %c0_i32_1 : i32, i32, i32
  }
  func.func @transform_4(%arg0: i32) -> (i32, i32, i32) {
    %c0_i32 = arith.constant 0 : i32
    %c0_i32_0 = arith.constant 0 : i32
    %c0_i32_1 = arith.constant 0 : i32
    %c0_i32_2 = arith.constant 0 : i32
    return %c0_i32, %c0_i32_0, %c0_i32_1 : i32, i32, i32
  }
  func.func @transform_5(%arg0: i32) -> (i32, i32, i32) {
    %c0_i32 = arith.constant 0 : i32
    %c0_i32_0 = arith.constant 0 : i32
    %c0_i32_1 = arith.constant 0 : i32
    return %arg0, %c0_i32, %c0_i32_0 : i32, i32, i32
  }
}

</mosaic_0001>

<bundles_post_ra>
// kernel: tpu_custom_call.1
= control target key start
LH: loop header
LB: loop body
LE: loop exit
PB: predicated region body
PF: predicated region fallthrough
CT: control target
= control target key end

     0   :  { %10 = vsyncpa [#allocation4], 0  ;;  %s7282_s0 = inlined_call_operand.vmem [shape: f32[2,16,200], index: 0, kind: input, shape index: {}]   ;;  %s7283_s1 = inlined_call_operand.vmem [shape: f32[2,3,16,4], index: 1, kind: input, shape index: {}]   ;;  %s7284_s2 = inlined_call_operand.vmem [shape: bf16[3,16,48], index: 2, kind: input, shape index: {}]   ;;  %s7285_s3 = inlined_call_operand.vmem [shape: bf16[3,16,48], index: 3, kind: input, shape index: {}]   ;;  %s7286_s4 = inlined_call_operand.vmem [shape: f32[3,16,6], index: 4, kind: input, shape index: {}]   ;;  %s7287_s5 = inlined_call_operand.hbm [shape: f32[2,16,200], index: 5, kind: output, shape index: {}]  }
   0x1   :  { %12 = vsyncpa [#allocation4 + $0x1], 0  ;;  %s4709_s18 = smov 0   ;;  %s4711_s19 = smov 0  }
   0x2   :  { %s4713_s20 = smov 0   ;;  %s4715_s21 = smov 0  }
   0x3 LB: > { %s4730_s22 = sadd.s32 4294967295, %s4653_s21   ;;  %s4113_s23 = sadd.s32 4294967294, %s4653_s21   ;;  %s4653_s21 = sphi %s4715_s21, %s7396_s21   ;;  %s4649_s20 = sphi %s4713_s20, %s7395_s20   ;;  %s4645_s19 = sphi %s4711_s19, %s7394_s19   ;;  %s4641_s18 = sphi %s4709_s18, %s7393_s18  }
   0x4   : > { %s4734_s24 = sadd.s32 1, %s4653_s21   ;;  %s140_s25 = sadd.s32 1, %s4649_s20 }
   0x5   : > { %s137_s26 = ssub.s32 %s4653_s21, %s4734_s24  ;;  %p150_p0 = scmp.ne.s32.totalorder %s4649_s20, %s4645_s19 }
   0x6   : > { %p138_p1 = scmp.eq.s32.totalorder %s137_s26, 0  ;;  %p151_p2 = scmp.eq.s32.totalorder %s4730_s22, 1 }
   0x7   : > { %p156_p3 = scmp.ne.s32.totalorder %s4645_s19, %s4641_s18  ;;  %p157_p4 = scmp.eq.s32.totalorder %s4113_s23, 1 }
   0x8   : > { %s4745_s27 = scalar_select %p138_p1, %s4649_s20, %s140_s25  }
   0x9   : > { %p4747_p5 = por %p151_p2, %p150_p0  ;;  %p4751_p6 = por %p157_p4, %p156_p3 }
   0xa   : > { %p4116_p7 = scmp.ge.s32.totalorder %s4653_s21, 1  ;;  %p200_p8 = scmp.lt.s32.totalorder %s4653_s21, 3 }
   0xc   : > { %p201_p9 = pnand %p4116_p7, %p200_p8 }
   0xd   : > { %p233_p10 = scmp.lt.s32.totalorder (!%p201_p9), %s4730_s22, 1  ;;  %vm262_vm0 = vcmask (!%p201_p9), 588800   ;;  %v7288_v16 = vmov (!%p201_p9), 1   ;;  %v7294_v19 = vmov (!%p201_p9), 0   ;;  %v4808_v20 = vld [vmem:[%s7286_s4] sm:$0xff] (!%p201_p9)  ;;  %v7292_v21 = vmov (!%p201_p9), 2  }
   0xe   : > { %204 = sbr.rel (%p201_p9) target bundleno = 5484 (0x156c), region = 40  ;;  %4404 = vset.pattern.permute.xlu1 (!%p201_p9), %v7288_v16  ;;  %4403 = vset.pattern.permute.xlu0 (!%p201_p9), %v7294_v19  ;;  %244 = vst [vmem:[#allocation2] sm:$0xff] (!%p201_p9), %v7294_v19  ;;  %245 = vst [vmem:[#allocation2 + $0x10] sm:$0xff] (!%p201_p9), %v7294_v19  ;;  %v4822_v42 = vld [vmem:[%s7286_s4 + $0x8] sm:$0xff] (!%p201_p9)  ;;  %v7290_v43 = vmov (!%p201_p9), 3   ;;  %s4665_s23 = smov (!%p201_p9), 127  }
   0xf   : > { %881 = vmatprep.mubr.bf16.mxu0 (!%p201_p9), %v7294_v19  ;;  %1500 = vmatprep.mubr.bf16.mxu1 (!%p201_p9), %v7294_v19  ;;  %s4666_s25 = smov (!%p201_p9), 126   ;;  %s4667_s26 = smov (!%p201_p9), 1  }
  0x10   : > { %s4672_s7 = smov (!%p201_p9), 3   ;;  %s4673_s8 = smov (!%p201_p9), 123  }
  0x11   : > { %s4675_s11 = smov (!%p201_p9), 5   ;;  %s4676_s14 = smov (!%p201_p9), [#allocation3]  }
  0x15   : > { %s234_s30 = scalar_select %p233_p10, %s4730_s22, 1 }
  0x17   : > { %s4242_s6 = sshll.u32 %s234_s30, 5  ;;  %s4244_s10 = smul.u32 48, %s234_s30 }
  0x18   : > { %s4762_s9 = scalar_lea.vmem %s7282_s0, %s4242_s6  ;;  %s4670_s30 = smov 125  }
  0x19   : > { %v4765_v0 = vld [vmem:[%s4762_s9] sm:$0xff]  ;;  %v4768_v1 = vld [vmem:[%s4762_s9 + $0x8] sm:$0xff]  ;;  %v4771_v2 = vld [vmem:[%s4762_s9 + $0x10] sm:$0xff]  ;;  %s4795_s13 = scalar_lea.vmem %s7283_s1, %s4244_s10  ;;  %s4671_s6 = smov 122  }
  0x1a   : > { %v263_v3 = vsel %vm262_vm0, %v4768_v1, 0.0  ;;  %v271_v4 = vmul.f32 %v4765_v0, %v4765_v0  ;;  %v272_v5 = vmul.f32 %v4768_v1, %v4768_v1  ;;  %v4780_v6 = vld [vmem:[%s4762_s9 + $0x18] sm:$0xff]  ;;  %v273_v9 = vmul.f32 %v4771_v2, %v4771_v2  ;;  %v246_v17 = vld [vmem:[%s4795_s13] sm:$0xff]  ;;  %v247_v18 = vld [vmem:[%s4795_s13 + $0x8] sm:$0xff]  ;;  %s4674_s10 = smov 118  }
  0x1b   : > { %v264_v7 = vadd.f32 %v263_v3, %v4765_v0  ;;  %v267_v8 = vsel %vm262_vm0, %v4780_v6, 0.0  ;;  %v274_v10 = vmul.f32 %v4780_v6, %v4780_v6  ;;  %v4813_v36 = vadd.f32 1.0, %v246_v17 }
  0x1c   : > { %v275_v11 = vsel %vm262_vm0, %v272_v5, 0.0  ;;  %v268_v13 = vadd.f32 %v267_v8, %v4771_v2  ;;  %v4815_v38 = vadd.f32 1.0, %v247_v18 }
  0x1d   : > { %265 = vadd.xlane.f32.xlu0 %v264_v7  ;;  %v276_v12 = vadd.f32 %v275_v11, %v271_v4  ;;  %v279_v14 = vsel %vm262_vm0, %v274_v10, 0.0 }
  0x1e   : > { %v280_v15 = vadd.f32 %v279_v14, %v273_v9 }
  0x1f   : > { %277 = vadd.xlane.f32.xlu1 %v276_v12 }
  0x21   : > { %269 = vadd.xlane.f32.xlu0 %v268_v13 }
  0x23   : > { %281 = vadd.xlane.f32.xlu1 %v280_v15 }
  0x34   : > { %319 = vperm.xlu1 %4404, %v246_v17  }
  0x38   : > { %324 = vperm.xlu1 %4404, %v247_v18  }
  0x3c   : > { %4405 = vset.pattern.permute.xlu1 %v7292_v21 }
  0x3d   : > { %333 = vperm.xlu1 %4405, %v4808_v20  }
  0x41   : > { %4406 = vset.pattern.permute.xlu1 %v7294_v19 }
  0xaa   : > { %v266_v22 = vpop.xlane.xlu0 %265 }
  0xab   : > { %v283_v23 = vmul.f32 0.005, %v266_v22 }
  0xac   : > { %v278_v24 = vpop.xlane.xlu1 %277 }
  0xad   : > { %v285_v25 = vmul.f32 0.005, %v278_v24  ;;  %v287_v26 = vmul.f32 %v283_v23, %v283_v23  ;;  %v299_v47 = vsub.f32 %v4765_v0, %v283_v23  ;;  %v300_v48 = vsub.f32 %v4768_v1, %v283_v23 }
  0xae   : > { %v270_v27 = vpop.xlane.xlu0 %269 }
  0xaf   : > { %v289_v28 = vsub.f32 %v285_v25, %v287_v26  ;;  %v284_v29 = vmul.f32 0.005, %v270_v27 }
  0xb0   : > { %v282_v30 = vpop.xlane.xlu1 %281 }
  0xb1   : > { %v293_v31 = vadd.f32 1e-05, %v289_v28  ;;  %v286_v32 = vmul.f32 0.005, %v282_v30  ;;  %v288_v33 = vmul.f32 %v284_v29, %v284_v29  ;;  %v301_v54 = vsub.f32 %v4771_v2, %v284_v29 }
  0xb2   : > { %v302_v55 = vsub.f32 %v4780_v6, %v284_v29 }
  0xb3   : > { %4449 = vrsqrt.f32 %v293_v31  ;;  %v290_v34 = vsub.f32 %v286_v32, %v288_v33 }
  0xb4   : > { %v320_v44 = vpop.permute.xlu1 %319 }
  0xb5   : > { %v294_v35 = vadd.f32 1e-05, %v290_v34 }
  0xb7   : > { %4451 = vrsqrt.f32 %v294_v35 }
  0xb8   : > { %v325_v45 = vpop.permute.xlu1 %324 }
  0xbc   : > { %v334_v46 = vpop.permute.xlu1 %333 }
  0xbd   : > { %v4450_v37 = vpop.eup %4449 }
  0xbe   : > { %v297_v39 = vmul.f32 %v4450_v37, %v4813_v36 }
  0xc0   : > { %305 = vperm.xlu0 %4403, %v297_v39  }
  0xc1   : > { %v4452_v40 = vpop.eup %4451 }
  0xc2   : > { %v298_v41 = vmul.f32 %v4452_v40, %v4815_v38 }
  0xc4   : > { %310 = vperm.xlu1 %4406, %v298_v41   ;;  %v7314_v41 = vmov 683565275  }
  0xc8   : > { %4407 = vset.pattern.permute.xlu1 %v7292_v21 }
  0xc9   : > { %338 = vperm.xlu1 %4407, %v4822_v42  }
  0xcd   : > { %4408 = vset.pattern.permute.xlu1 %v7290_v43 }
  0xce   : > { %762 = vperm.xlu1 %4408, %v4808_v20  }
  0xd2   : > { %766 = vperm.xlu1 %4408, %v4822_v42  }
  0xd6   : > { %4409 = vset.pattern.permute.xlu1 %v7294_v19 }
 0x13f   : > { %v306_v49 = vpop.permute.xlu0 %305 }
 0x140   : > { %v313_v50 = vmul.f32 %v306_v49, %v299_v47  ;;  %v314_v51 = vmul.f32 %v306_v49, %v300_v48  ;;  %v7311_v47 = vmov 2475754826  }
 0x142   : > { %v4832_v52 = vadd.f32 %v320_v44, %v313_v50  ;;  %v4834_v53 = vadd.f32 %v320_v44, %v314_v51 }
 0x143   : > { %v311_v56 = vpop.permute.xlu1 %310 }
 0x144   : > { %v4839_v57 = vmul.f32 %v334_v46, %v4832_v52  ;;  %v4842_v58 = vmul.f32 %v334_v46, %v4834_v53  ;;  %v315_v59 = vmul.f32 %v311_v56, %v301_v54  ;;  %v316_v60 = vmul.f32 %v311_v56, %v302_v55 }
 0x145   : > { %v7305_v54 = vmov 2131351028  }
 0x146   : > { %v348_v61 = vand.u32 2139095040, %v4839_v57  ;;  %v451_v62 = vand.u32 2139095040, %v4842_v58  ;;  %v4846_v63 = vadd.f32 %v325_v45, %v315_v59  ;;  %v4848_v0 = vadd.f32 %v325_v45, %v316_v60 }
 0x147   : > { %v345_v8 = vand.u32 2147483647, %v4839_v57  ;;  %v448_v32 = vand.u32 2147483647, %v4842_v58 }
 0x148   : > { %v349_v1 = vshrl.u32 %v348_v61, 23  ;;  %v452_v2 = vshrl.u32 %v451_v62, 23  ;;  %v339_v3 = vpop.permute.xlu1 %338  ;;  %v7303_v61 = vmov 2102212464  }
 0x149   : > { %v4851_v4 = vmul.f32 %v339_v3, %v4846_v63  ;;  %v4854_v5 = vmul.f32 %v339_v3, %v4848_v0  ;;  %v4867_v23 = vand.u32 8388607, %v345_v8 }
 0x14a   : > { %v4121_v6 = vadd.s32 4294967169, %v349_v1  ;;  %v4125_v7 = vadd.s32 4294967169, %v452_v2 }
 0x14b   : > { %v551_v9 = vand.u32 2147483647, %v4851_v4  ;;  %v554_v10 = vand.u32 2139095040, %v4851_v4  ;;  %v7295_v11 = vand.u32 2147483647, %v4854_v5  ;;  %v657_v14 = vand.u32 2139095040, %v4854_v5 }
 0x14c   : > { %v355_v12 = vadd.s32 1, %v4121_v6  ;;  %v458_v13 = vadd.s32 1, %v4125_v7  ;;  %v353_v37 = vor.u32 8388608, %v4867_v23 }
 0x14d   : > { %v555_v15 = vshrl.u32 %v554_v10, 23  ;;  %v558_v17 = vand.u32 8388607, %v551_v9  ;;  %v661_v18 = vand.u32 8388607, %v7295_v11  ;;  %v658_v22 = vshrl.u32 %v657_v14, 23 }
 0x14e   : > { %vm356_vm1 = vcmp.gt.s32.totalorder %v355_v12, 0  ;;  %vm459_vm2 = vcmp.gt.s32.totalorder %v458_v13, 0 }
 0x14f   : > { %v357_v24 = vsel %vm356_vm1, %v355_v12, 0  ;;  %v4869_v25 = vsel %vm459_vm2, %v458_v13, 0  ;;  %v4129_v26 = vadd.s32 4294967169, %v555_v15  ;;  %v559_v27 = vor.u32 8388608, %v558_v17 }
 0x150   : > { %v4871_v28 = vand.u32 31, %v357_v24  ;;  %v4133_v30 = vadd.s32 4294967169, %v658_v22  ;;  %v662_v31 = vor.u32 8388608, %v661_v18  ;;  %v4874_v33 = vshrl.u32 %v357_v24, 5 }
 0x151   : > { %v561_v29 = vadd.s32 1, %v4129_v26  ;;  %v4880_v35 = vand.u32 31, %v4869_v25  ;;  %v4883_v39 = vshll.u32 %v559_v27, 8  ;;  %v7307_v13 = vmov 920167782  }
 0x152   : > { %v4877_v34 = vsub.s32 32, %v4871_v28  ;;  %v664_v40 = vadd.s32 1, %v4133_v30  ;;  %v362_v44 = vshll.u32 %v7314_v41, %v4871_v28  ;;  %v4887_v46 = vshll.u32 %v662_v31, 8 }
 0x153   : > { %vm562_vm3 = vcmp.gt.s32.totalorder %v561_v29, 0  ;;  %v4893_v49 = vshll.u32 %v7311_v47, %v4871_v28  ;;  %v4897_v55 = vshll.u32 %v7305_v54, %v4871_v28  ;;  %v4916_v6 = vshll.u32 %v7303_v61, %v4871_v28 }
 0x154   : > { %v563_v45 = vsel %vm562_vm3, %v561_v29, 0  ;;  %v363_v48 = vshrl.u32 %v7311_v47, %v4877_v34  ;;  %vm665_vm4 = vcmp.gt.s32.totalorder %v664_v40, 0  ;;  %v4901_v59 = vshrl.u32 %v7314_v41, %v4877_v34 }
 0x155   : > { %v564_v50 = vshrl.u32 %v563_v45, 5  ;;  %v565_v51 = vand.u32 31, %v563_v45  ;;  %v666_v56 = vsel %vm665_vm4, %v664_v40, 0  ;;  %v4905_v60 = vshrl.u32 %v7305_v54, %v4877_v34 }
 0x156   : > { %v4909_v62 = vshrl.u32 %v7303_v61, %v4877_v34  ;;  %v4912_v3 = vor.u32 %v363_v48, %v362_v44  ;;  %v7309_v26 = vmov 1326507024   ;;  %v668_v45 = vand.u32 31, %v666_v56 }
 0x157   : > { %v566_v1 = vsub.s32 32, %v565_v51  ;;  %v568_v2 = vshll.u32 %v7314_v41, %v565_v51  ;;  %v571_v7 = vshll.u32 %v7311_v47, %v565_v51  ;;  %v574_v10 = vshll.u32 %v7305_v54, %v565_v51 }
 0x158   : > { %v577_v12 = vshll.u32 %v7303_v61, %v565_v51  ;;  %v580_v14 = vshll.u32 %v7307_v13, %v565_v51  ;;  %vm583_vm5 = vcmp.lt.s32.totalorder %v564_v50, 1  ;;  %vm584_vm6 = vcmp.lt.s32.totalorder %v564_v50, 2 }
 0x159   : > { %v569_v15 = vshrl.u32 %v7311_v47, %v566_v1  ;;  %v572_v17 = vshrl.u32 %v7305_v54, %v566_v1  ;;  %v575_v18 = vshrl.u32 %v7303_v61, %v566_v1  ;;  %v567_v22 = vshrl.u32 %v7314_v41, %v566_v1 }
 0x15a   : > { %v578_v24 = vshrl.u32 %v7307_v13, %v566_v1  ;;  %v581_v27 = vshrl.u32 %v7309_v26, %v566_v1  ;;  %vm585_vm7 = vcmp.lt.s32.totalorder %v564_v50, 3  ;;  %vm586_vm8 = vcmp.lt.s32.totalorder %v564_v50, 4 }
 0x15b   : > { %v570_v29 = vor.u32 %v569_v15, %v568_v2  ;;  %v573_v30 = vor.u32 %v572_v17, %v571_v7  ;;  %v576_v31 = vor.u32 %v575_v18, %v574_v10  ;;  %v669_v1 = vsub.s32 32, %v668_v45 }
 0x15c   : > { %v579_v40 = vor.u32 %v578_v24, %v577_v12  ;;  %v582_v44 = vor.u32 %v581_v27, %v580_v14  ;;  %v667_v15 = vshrl.u32 %v666_v56, 5  ;;  %v671_v18 = vshll.u32 %v7314_v41, %v668_v45 }
 0x15d   : > { %v587_v48 = vsel %vm583_vm5, %v567_v22, %v570_v29  ;;  %v588_v51 = vsel %vm586_vm8, %v576_v31, 2102212464  ;;  %v591_v16 = vsel %vm583_vm5, %v570_v29, %v573_v30  ;;  %v595_v43 = vsel %vm583_vm5, %v573_v30, %v576_v31 }
 0x15e   : > { %v589_v21 = vsel %vm585_vm7, %v573_v30, %v588_v51  ;;  %v592_v19 = vsel %vm586_vm8, %v579_v40, 920167782  ;;  %v596_v11 = vsel %vm586_vm8, %v582_v44, 1326507024  ;;  %v678_v50 = vshrl.u32 %v7303_v61, %v669_v1 }
 0x15f   : > { %v590_v2 = vsel %vm584_vm6, %v587_v48, %v589_v21  ;;  %v593_v7 = vsel %vm585_vm7, %v576_v31, %v592_v19  ;;  %v597_v10 = vsel %vm585_vm7, %v579_v40, %v596_v11  ;;  %v670_v19 = vshrl.u32 %v7314_v41, %v669_v1 }
 0x160   : > { %v594_v12 = vsel %vm584_vm6, %v591_v16, %v593_v7  ;;  %v598_v14 = vsel %vm584_vm6, %v595_v43, %v597_v10  ;;  %v606_v17 = vmul.u32 %v4883_v39, %v590_v2  ;;  %v672_v21 = vshrl.u32 %v7311_v47, %v669_v1 }
 0x161   : > { %v4937_v22 = vmul.u32.u64.low %v4883_v39, %v598_v14  ;;  %v4938_v24 = vmul.u32.u64.high %v4883_v39, %v598_v14, %v4937_v22  ;;  %v4941_v27 = vmul.u32.u64.low %v4883_v39, %v594_v12  ;;  %v4942_v29 = vmul.u32.u64.high %v4883_v39, %v594_v12, %v4941_v27 }
 0x162   : > { %v674_v16 = vshll.u32 %v7311_v47, %v668_v45  ;;  %v675_v43 = vshrl.u32 %v7305_v54, %v669_v1  ;;  %v677_v11 = vshll.u32 %v7305_v54, %v668_v45  ;;  %v680_v56 = vshll.u32 %v7303_v61, %v668_v45 }
 0x163   : > { %v681_v30 = vshrl.u32 %v7307_v13, %v669_v1  ;;  %v673_v31 = vor.u32 %v672_v21, %v671_v18  ;;  %v683_v40 = vshll.u32 %v7307_v13, %v668_v45  ;;  %v684_v44 = vshrl.u32 %v7309_v26, %v669_v1 }
 0x164   : > { %v676_v39 = vor.u32 %v675_v43, %v674_v16  ;;  %vm608_vm9 = vc.u32 %v4938_v24, %v4941_v27  ;;  %v609_v48 = vadd.s32 1, %v4942_v29  ;;  %v679_v51 = vor.u32 %v678_v50, %v677_v11 }
 0x165   : > { %vm686_vm10 = vcmp.lt.s32.totalorder %v667_v15, 1  ;;  %v682_v2 = vor.u32 %v681_v30, %v680_v56  ;;  %v685_v7 = vor.u32 %v684_v44, %v683_v40  ;;  %vm687_vm11 = vcmp.lt.s32.totalorder %v667_v15, 2 }
 0x166   : > { %vm688_vm12 = vcmp.lt.s32.totalorder %v667_v15, 3  ;;  %v610_v10 = vsel %vm608_vm9, %v609_v48, %v4942_v29  ;;  %vm689_vm13 = vcmp.lt.s32.totalorder %v667_v15, 4  ;;  %v690_v12 = vsel %vm686_vm10, %v670_v19, %v673_v31 }
 0x167   : > { %v694_v14 = vsel %vm686_vm10, %v673_v31, %v676_v39  ;;  %v611_v18 = vadd.s32 %v610_v10, %v606_v17  ;;  %v691_v45 = vsel %vm689_vm13, %v679_v51, 2102212464  ;;  %v695_v22 = vsel %vm689_vm13, %v682_v2, 920167782 }
 0x168   : > { %v698_v1 = vsel %vm686_vm10, %v676_v39, %v679_v51  ;;  %v692_v21 = vsel %vm688_vm12, %v676_v39, %v691_v45  ;;  %v696_v16 = vsel %vm688_vm12, %v679_v51, %v695_v22  ;;  %v699_v43 = vsel %vm689_vm13, %v685_v7, 1326507024 }
 0x169   : > { %v372_v11 = vshrl.u32 %v7307_v13, %v4877_v34  ;;  %v612_v50 = vadd.s32 536870912, %v611_v18  ;;  %v693_v56 = vsel %vm687_vm11, %v690_v12, %v692_v21  ;;  %v697_v29 = vsel %vm687_vm11, %v694_v14, %v696_v16 }
 0x16a   : > { %v700_v19 = vsel %vm688_vm12, %v682_v2, %v699_v43  ;;  %v4968_v30 = vmul.u32.u64.low %v4887_v46, %v697_v29  ;;  %v4969_v31 = vmul.u32.u64.high %v4887_v46, %v697_v29, %v4968_v30  ;;  %v370_v39 = vor.u32 %v4909_v62, %v4897_v55 }
 0x16b   : > { %v701_v17 = vsel %vm687_vm11, %v698_v1, %v700_v19  ;;  %v4974_v40 = vshrl.u32 %v612_v50, 30  ;;  %v367_v51 = vor.u32 %v4905_v60, %v4893_v49  ;;  %v709_v15 = vmul.u32 %v4887_v46, %v693_v56 }
 0x16c   : > { %v4977_v44 = vmul.u32.u64.low %v4887_v46, %v701_v17  ;;  %v4978_v48 = vmul.u32.u64.high %v4887_v46, %v701_v17, %v4977_v44  ;;  %v373_v2 = vor.u32 %v372_v11, %v4916_v6  ;;  %v374_v7 = vshll.u32 %v7307_v13, %v4871_v28 }
 0x16d   : > { %v375_v10 = vshrl.u32 %v7309_v26, %v4877_v34  ;;  %v614_v55 = vshll.u32 %v4974_v40, 30  ;;  %vm377_vm14 = vcmp.lt.s32.totalorder %v4874_v33, 1  ;;  %vm378_vm15 = vcmp.lt.s32.totalorder %v4874_v33, 2 }
 0x16e   : > { %vm380_vm1 = vcmp.lt.s32.totalorder %v4874_v33, 4  ;;  %v712_v49 = vadd.s32 1, %v4969_v31  ;;  %vm379_vm2 = vcmp.lt.s32.totalorder %v4874_v33, 3  ;;  %vm711_vm3 = vc.u32 %v4978_v48, %v4968_v30 }
 0x16f   : > { %v376_v60 = vor.u32 %v375_v10, %v374_v7  ;;  %v382_v46 = vsel %vm380_vm1, %v370_v39, 2102212464  ;;  %v615_v28 = vsub.s32 %v611_v18, %v614_v55  ;;  %v381_v34 = vsel %vm377_vm14, %v4901_v59, %v4912_v3 }
 0x170   : > { %v385_v62 = vsel %vm377_vm14, %v4912_v3, %v367_v51  ;;  %v713_v6 = vsel %vm711_vm3, %v712_v49, %v4969_v31  ;;  %v383_v12 = vsel %vm379_vm2, %v367_v51, %v382_v46  ;;  %v386_v14 = vsel %vm380_vm1, %v373_v2, 920167782 }
 0x171   : > { %v389_v45 = vsel %vm377_vm14, %v367_v51, %v370_v39  ;;  %v617_v22 = vsub.s32 0, %v615_v28  ;;  %v714_v1 = vadd.s32 %v713_v6, %v709_v15  ;;  %v387_v18 = vsel %vm379_vm2, %v370_v39, %v386_v14 }
 0x172   : > { %v390_v21 = vsel %vm380_vm1, %v376_v60, 1326507024  ;;  %v5011_v59 = vsub.s32 32, %v4880_v35  ;;  %v388_v3 = vsel %vm378_vm15, %v385_v62, %v387_v18  ;;  %v393_v43 = vshll.u32 %v353_v37, 8 }
 0x173   : > { %v391_v16 = vsel %vm379_vm2, %v373_v2, %v390_v21  ;;  %v4130_v11 = vmin.u32 %v617_v22, %v615_v28  ;;  %v715_v50 = vadd.s32 536870912, %v714_v1  ;;  %v384_v56 = vsel %vm378_vm15, %v381_v34, %v383_v12 }
 0x174   : > { %v392_v29 = vsel %vm378_vm15, %v389_v45, %v391_v16  ;;  %v5026_v31 = vmul.u32.u64.low %v393_v43, %v388_v3  ;;  %v5027_v39 = vmul.u32.u64.high %v393_v43, %v388_v3, %v5026_v31  ;;  %v5033_v23 = vshrl.u32 %v4869_v25, 5 }
 0x175   : > { %v5023_v19 = vmul.u32.u64.low %v393_v43, %v392_v29  ;;  %v5024_v17 = vmul.u32.u64.high %v393_v43, %v392_v29, %v5023_v19  ;;  %v619_v44 = vclz %v4130_v11  ;;  %v5030_v51 = vshrl.u32 %v715_v50, 30 }
 0x176   : > { %v607_v37 = vadd.s32 %v4941_v27, %v4938_v24  ;;  %v5039_v33 = vand.u32 8388607, %v448_v32  ;;  %v400_v7 = vmul.u32 %v393_v43, %v384_v56  ;;  %v465_v10 = vshll.u32 %v7314_v41, %v4880_v35 }
 0x177   : > { %v4131_v15 = vadd.s32 4294967294, %v619_v44  ;;  %v717_v2 = vshll.u32 %v5030_v51, 30  ;;  %vm402_vm4 = vc.u32 %v5024_v17, %v5026_v31  ;;  %v403_v25 = vadd.s32 1, %v5027_v39 }
 0x178   : > { %v466_v55 = vshrl.u32 %v7311_v47, %v5011_v59  ;;  %v468_v24 = vshll.u32 %v7311_v47, %v4880_v35  ;;  %v469_v49 = vshrl.u32 %v7305_v54, %v5011_v59  ;;  %v475_v60 = vshrl.u32 %v7307_v13, %v5011_v59 }
 0x179   : > { %vm4132_vm5 = vcmp.lt.s32.totalorder %v4131_v15, 0  ;;  %v5051_v27 = vsub.s32 %v714_v1, %v717_v2  ;;  %v404_v34 = vsel %vm402_vm4, %v403_v25, %v5027_v39  ;;  %v472_v62 = vshrl.u32 %v7303_v61, %v5011_v59 }
 0x17a   : > { %v622_v46 = vsel %vm4132_vm5, 0, %v4131_v15  ;;  %v474_v6 = vshll.u32 %v7303_v61, %v4880_v35  ;;  %v478_v22 = vshrl.u32 %v7309_v26, %v5011_v59  ;;  %v405_v18 = vadd.s32 %v404_v34, %v400_v7 }
 0x17b   : > { %v623_v12 = vsub.s32 32, %v622_v46  ;;  %v627_v14 = vsub.s32 4294967266, %v622_v46  ;;  %v720_v45 = vsub.s32 0, %v5051_v27  ;;  %v624_v1 = vshll.u32 %v615_v28, %v622_v46 }
 0x17c   : > { %v471_v21 = vshll.u32 %v7305_v54, %v4880_v35  ;;  %v477_v3 = vshll.u32 %v7307_v13, %v4880_v35  ;;  %v476_v50 = vor.u32 %v475_v60, %v474_v6  ;;  %v406_v56 = vadd.s32 536870912, %v405_v18 }
 0x17d   : > { %v625_v16 = vshrl.u32 %v607_v37, %v623_v12  ;;  %v628_v43 = vadd.s32 127, %v627_v14  ;;  %v4134_v11 = vmin.u32 %v720_v45, %v5051_v27  ;;  %v467_v29 = vor.u32 %v466_v55, %v465_v10 }
 0x17e   : > { %v470_v19 = vor.u32 %v469_v49, %v468_v24  ;;  %v473_v39 = vor.u32 %v472_v62, %v471_v21  ;;  %v479_v28 = vor.u32 %v478_v22, %v477_v3  ;;  %v5070_v7 = vshrl.u32 %v406_v56, 30 }
 0x17f   : > { %v626_v44 = vor.u32 %v625_v16, %v624_v1  ;;  %v629_v15 = vshll.u32 %v628_v43, 23  ;;  %v722_v2 = vclz %v4134_v11  ;;  %v456_v25 = vor.u32 8388608, %v5039_v33 }
 0x180   : > { %vm483_vm6 = vcmp.lt.s32.totalorder %v5033_v23, 4  ;;  %vm480_vm7 = vcmp.lt.s32.totalorder %v5033_v23, 1  ;;  %v408_v55 = vshll.u32 %v5070_v7, 30  ;;  %vm482_vm8 = vcmp.lt.s32.totalorder %v5033_v23, 3 }
 0x181   : > { %v630_v35 = vor.u32 4788187, %v629_v15  ;;  %v4135_v37 = vadd.s32 4294967294, %v722_v2  ;;  %v489_v60 = vsel %vm483_vm6, %v476_v50, 920167782  ;;  %v633_v10 = vcvt.s32.f32 %v626_v44 }
 0x182   : > { %v488_v24 = vsel %vm480_vm7, %v467_v29, %v470_v19  ;;  %v492_v33 = vsel %vm480_vm7, %v470_v19, %v473_v39  ;;  %v493_v46 = vsel %vm483_vm6, %v479_v28, 1326507024  ;;  %v409_v62 = vsub.s32 %v405_v18, %v408_v55 }
 0x183   : > { %v631_v49 = vand.u32 2147483647, %v630_v35  ;;  %vm4136_vm9 = vcmp.lt.s32.totalorder %v4135_v37, 0  ;;  %v490_v6 = vsel %vm482_vm8, %v473_v39, %v489_v60  ;;  %v494_v12 = vsel %vm482_vm8, %v476_v50, %v493_v46 }
 0x184   : > { %v725_v34 = vsel %vm4136_vm9, 0, %v4135_v37  ;;  %vm481_vm10 = vcmp.lt.s32.totalorder %v5033_v23, 2  ;;  %v411_v22 = vsub.s32 0, %v409_v62  ;;  %v485_v1 = vsel %vm483_vm6, %v473_v39, 2102212464 }
 0x185   : > { %v634_v14 = vmul.f32 %v633_v10, %v631_v49  ;;  %v730_v45 = vsub.s32 4294967266, %v725_v34  ;;  %v495_v21 = vsel %vm481_vm10, %v492_v33, %v494_v12  ;;  %v496_v3 = vshll.u32 %v456_v25, 8 }
 0x186   : > { %v464_v18 = vshrl.u32 %v7314_v41, %v5011_v59  ;;  %v491_v43 = vsel %vm481_vm10, %v488_v24, %v490_v6  ;;  %v4122_v50 = vmin.u32 %v411_v22, %v409_v62  ;;  %vm553_vm11 = vcmp.lt.s32.totalorder %v4851_v4, 0 }
 0x187   : > { %v635_v16 = vxor.u32 2147483648, %v634_v14  ;;  %v731_v11 = vadd.s32 127, %v730_v45  ;;  %v5098_v56 = vmul.u32.u64.low %v496_v3, %v495_v21  ;;  %v5099_v44 = vmul.u32.u64.high %v496_v3, %v495_v21, %v5098_v56 }
 0x188   : > { %v726_v15 = vsub.s32 32, %v725_v34  ;;  %v484_v39 = vsel %vm480_vm7, %v464_v18, %v467_v29  ;;  %v486_v2 = vsel %vm482_vm8, %v470_v19, %v485_v1  ;;  %v413_v28 = vclz %v4122_v50 }
 0x189   : > { %v636_v59 = vsel %vm553_vm11, %v635_v16, %v634_v14  ;;  %v710_v25 = vadd.s32 %v4968_v30, %v4978_v48  ;;  %v5110_v35 = vmul.u32.u64.low %v496_v3, %v491_v43  ;;  %v5111_v37 = vmul.u32.u64.high %v496_v3, %v491_v43, %v5110_v35 }
 0x18a   : > { %v732_v60 = vshll.u32 %v731_v11, 23  ;;  %v4123_v10 = vadd.s32 4294967294, %v413_v28  ;;  %v487_v55 = vsel %vm481_vm10, %v484_v39, %v486_v2  ;;  %vm5118_vm12 = vcmp.le.f32.partialorder %v551_v9, 0.7853982 }
 0x18b   : > { %v728_v19 = vshrl.u32 %v710_v25, %v726_v15  ;;  %v639_v30 = vsel %vm5118_vm12, %v4851_v4, %v636_v59  ;;  %v401_v48 = vadd.s32 %v5026_v31, %v5024_v17  ;;  %vm505_vm14 = vc.u32 %v5099_v44, %v5110_v35 }
 0x18c   : > { %vm4124_vm13 = vcmp.lt.s32.totalorder %v4123_v10, 0  ;;  %v727_v23 = vshll.u32 %v5051_v27, %v725_v34  ;;  %v503_v49 = vmul.u32 %v496_v3, %v487_v55  ;;  %v506_v9 = vadd.s32 1, %v5111_v37 }
 0x18d   : > { %v416_v24 = vsel %vm4124_vm13, 0, %v4123_v10  ;;  %v733_v33 = vor.u32 4788187, %v732_v60  ;;  %4453 = vcosq.f32 %v639_v30  ;;  %v637_v1 = vsub.s32 4, %v4974_v40 }
 0x18e   : > { %v417_v46 = vsub.s32 32, %v416_v24  ;;  %v421_v6 = vsub.s32 4294967266, %v416_v24  ;;  %v729_v12 = vor.u32 %v728_v19, %v727_v23  ;;  %v507_v14 = vsel %vm505_vm14, %v506_v9, %v5111_v37 }
 0x18f   : > { %4455 = vsinq.f32 %v639_v30  ;;  %v418_v45 = vshll.u32 %v409_v62, %v416_v24  ;;  %v508_v22 = vadd.s32 %v507_v14, %v503_v49  ;;  %v734_v21 = vand.u32 2147483647, %v733_v33 }
 0x190   : > { %v419_v17 = vshrl.u32 %v401_v48, %v417_v46  ;;  %v422_v31 = vadd.s32 127, %v421_v6  ;;  %v736_v16 = vcvt.s32.f32 %v729_v12  ;;  %v638_v11 = vsel %vm553_vm11, %v637_v1, %v4974_v40 }
 0x191   : > { %v509_v3 = vadd.s32 536870912, %v508_v22  ;;  %v640_v28 = vsel %vm5118_vm12, 0, %v638_v11  ;;  %vm5143_vm15 = vcmp.le.f32.partialorder %v345_v8, 0.7853982  ;;  %vm347_vm1 = vcmp.lt.s32.totalorder %v4839_v57, 0 }
 0x192   : > { %v420_v27 = vor.u32 %v419_v17, %v418_v45  ;;  %v423_v34 = vshll.u32 %v422_v31, 23  ;;  %v737_v50 = vmul.f32 %v736_v16, %v734_v21  ;;  %v431_v40 = vsub.s32 4, %v5070_v7 }
 0x193   : > { %v5133_v43 = vshrl.u32 %v509_v3, 30  ;;  %v644_v19 = vand.u32 3, %v640_v28  ;;  %vm656_vm2 = vcmp.lt.s32.totalorder %v4854_v5, 0  ;;  %v7325_v12 = vand.u32 2147483647, %v4854_v5 }
 0x194   : > { %v424_v18 = vor.u32 4788187, %v423_v34  ;;  %v427_v62 = vcvt.s32.f32 %v420_v27  ;;  %v738_v37 = vxor.u32 2147483648, %v737_v50  ;;  %v432_v9 = vsel %vm347_vm1, %v431_v40, %v5070_v7  ;;  %v5170_v34 = vpop.permute.xlu1 %762 }
 0x195   : > { %v511_v15 = vshll.u32 %v5133_v43, 30  ;;  %vm646_vm3 = vcmp.eq.s32.totalorder %v644_v19, 0  ;;  %vm649_vm4 = vcmp.eq.s32.totalorder %v644_v19, 2  ;;  %vm5158_vm5 = vcmp.le.f32.partialorder %v7325_v12, 0.7853982 }
 0x196   : > { %v425_v56 = vand.u32 2147483647, %v424_v18  ;;  %v739_v8 = vsel %vm656_vm2, %v738_v37, %v737_v50  ;;  %v434_v17 = vsel %vm5143_vm15, 0, %v432_v9  ;;  %vm645_vm7 = vcmp.lt.s32.totalorder %v644_v19, 2 }
 0x197   : > { %v4454_v39 = vpop.eup %4453  ;;  %v512_v59 = vsub.s32 %v508_v22, %v511_v15  ;;  %v742_v45 = vsel %vm5158_vm5, %v4854_v5, %v739_v8  ;;  %v504_v22 = vadd.s32 %v5110_v35, %v5099_v44  ;;  %v438_v27 = vand.u32 3, %v434_v17 }
 0x198   : > { %v428_v2 = vmul.f32 %v427_v62, %v425_v56  ;;  %v650_v29 = vxor.u32 2147483648, %v4454_v39  ;;  %vm643_vm8 = vweird.f32 %v4851_v4  ;;  %v740_v50 = vsub.s32 4, %v5030_v51 }
 0x199   : > { %v4456_v25 = vpop.eup %4455  ;;  %v514_v10 = vsub.s32 0, %v512_v59  ;;  %vm443_vm9 = vcmp.eq.s32.totalorder %v438_v27, 2  ;;  %vm440_vm10 = vcmp.eq.s32.totalorder %v438_v27, 0  ;;  %vm439_vm11 = vcmp.lt.s32.totalorder %v438_v27, 2 }
 0x19a   : > { %v429_v60 = vxor.u32 2147483648, %v428_v2  ;;  %v647_v23 = vxor.u32 2147483648, %v4456_v25  ;;  %v651_v6 = vsel %vm649_vm4, %v650_v29, %v4456_v25  ;;  %vm437_vm12 = vweird.f32 %v4839_v57 }
 0x19b   : > { %v4126_v48 = vmin.u32 %v514_v10, %v512_v59  ;;  %v767_v10 = vpop.permute.xlu1 %766  ;;  %vm450_vm13 = vcmp.lt.s32.totalorder %v4842_v58, 0  ;;  %vm5182_vm14 = vcmp.le.f32.partialorder %v448_v32, 0.7853982 }
 0x19c   : > { %v430_v30 = vsel %vm347_vm1, %v429_v60, %v428_v2  ;;  %v648_v46 = vsel %vm646_vm3, %v4454_v39, %v647_v23  ;;  %vm746_vm3 = vweird.f32 %v4854_v5 }
 0x19d   : > { %v433_v24 = vsel %vm5143_vm15, %v4839_v57, %v430_v30  ;;  %v516_v49 = vclz %v4126_v48  ;;  %v652_v31 = vsel %vm645_vm7, %v648_v46, %v651_v6  ;;  %v534_v46 = vsub.s32 4, %v5133_v43 }
 0x19e   : > { %4457 = vcosq.f32 %v433_v24  ;;  %v653_v11 = vsel %vm643_vm8, nan, %v652_v31  ;;  %vm540_vm7 = vweird.f32 %v4842_v58  ;;  %vm790_vm8 = vcmask 1039360  }
 0x19f   : > { %4459 = vsinq.f32 %v433_v24  ;;  %v4127_v33 = vadd.s32 4294967294, %v516_v49  ;;  %v759_v35 = vsub.f32 1.0, %v653_v11 }
 0x1a0   : > { %4461 = vcosq.f32 %v742_v45 }
 0x1a1   : > { %vm4128_vm6 = vcmp.lt.s32.totalorder %v4127_v33, 0  ;;  %4463 = vsinq.f32 %v742_v45  ;;  %v771_v40 = vmul.f32 %v767_v10, %v759_v35 }
 0x1a2   : > { %v519_v7 = vsel %vm4128_vm6, 0, %v4127_v33 }
 0x1a3   : > { %v520_v1 = vsub.s32 32, %v519_v7  ;;  %v524_v21 = vsub.s32 4294967266, %v519_v7  ;;  %v521_v3 = vshll.u32 %v512_v59, %v519_v7  ;;  %v741_v59 = vsel %vm656_vm2, %v740_v50, %v5030_v51 }
 0x1a4   : > { %v743_v23 = vsel %vm5158_vm5, 0, %v741_v59  ;;  %v775_v9 = vadd.f32 %v771_v40, %v4846_v63  ;;  %v535_v63 = vsel %vm450_vm13, %v534_v46, %v5133_v43  ;;  %v7331_v40 = vmov 2  }
 0x1a5   : > { %v522_v16 = vshrl.u32 %v504_v22, %v520_v1  ;;  %v525_v18 = vadd.s32 127, %v524_v21  ;;  %v747_v49 = vand.u32 3, %v743_v23  ;;  %v537_v31 = vsel %vm5182_vm14, 0, %v535_v63 }
 0x1a7   : > { %v523_v62 = vor.u32 %v522_v16, %v521_v3  ;;  %v526_v15 = vshll.u32 %v525_v18, 23  ;;  %vm749_vm15 = vcmp.eq.s32.totalorder %v747_v49, 0  ;;  %vm752_vm1 = vcmp.eq.s32.totalorder %v747_v49, 2 }
 0x1a8   : > { %v4458_v56 = vpop.eup %4457  ;;  %vm748_vm2 = vcmp.lt.s32.totalorder %v747_v49, 2  ;;  %v7330_v16 = vmov 0   ;;  %v5236_v49 = vld [vmem:[#allocation2] sm:$0xff] }
 0x1a9   : > { %v4460_v39 = vpop.eup %4459  ;;  %v444_v44 = vxor.u32 2147483648, %v4458_v56  ;;  %v527_v28 = vor.u32 4788187, %v526_v15  ;;  %v530_v60 = vcvt.s32.f32 %v523_v62 }
 0x1aa   : > { %v441_v2 = vxor.u32 2147483648, %v4460_v39  ;;  %v4462_v19 = vpop.eup %4461 }
 0x1ab   : > { %v445_v4 = vsel %vm443_vm9, %v444_v44, %v4460_v39  ;;  %v528_v37 = vand.u32 2147483647, %v527_v28  ;;  %v4464_v29 = vpop.eup %4463  ;;  %v753_v12 = vxor.u32 2147483648, %v4462_v19  ;;  %vm796_vm9 = vcmask 1031168  }
 0x1ac   : > { %v442_v25 = vsel %vm440_vm10, %v4458_v56, %v441_v2  ;;  %v750_v6 = vxor.u32 2147483648, %v4464_v29  ;;  %vm832_vm10 = vcmask 7168  }
 0x1ad   : > { %v446_v55 = vsel %vm439_vm11, %v442_v25, %v445_v4  ;;  %v531_v48 = vmul.f32 %v530_v60, %v528_v37  ;;  %v754_v7 = vsel %vm752_vm1, %v753_v12, %v4464_v29  ;;  %vm845_vm11 = vcmask 392192  }
 0x1ae   : > { %v447_v30 = vsel %vm437_vm12, nan, %v446_v55  ;;  %v751_v17 = vsel %vm749_vm15, %v4462_v19, %v750_v6 }
 0x1af   : > { %v757_v24 = vsub.f32 1.0, %v447_v30  ;;  %v532_v51 = vxor.u32 2147483648, %v531_v48  ;;  %v755_v22 = vsel %vm748_vm2, %v751_v17, %v754_v7 }
 0x1b0   : > { %v756_v1 = vsel %vm746_vm3, nan, %v755_v22 }
 0x1b1   : > { %v769_v57 = vmul.f32 %v5170_v34, %v757_v24  ;;  %v533_v33 = vsel %vm450_vm13, %v532_v51, %v531_v48  ;;  %v760_v3 = vsub.f32 1.0, %v756_v1 }
 0x1b2   : > { %v536_v14 = vsel %vm5182_vm14, %v4842_v58, %v533_v33 }
 0x1b3   : > { %v773_v32 = vadd.f32 %v769_v57, %v4832_v52  ;;  %4465 = vcosq.f32 %v536_v14  ;;  %v541_v52 = vand.u32 3, %v537_v31  ;;  %v772_v56 = vmul.f32 %v767_v10, %v760_v3  ;;  %v4443_v57 = vld [vmem:[%s7284_s2] sm:$0xff]  }
 0x1b4   : > { %4467 = vsinq.f32 %v536_v14 }
 0x1b5   : > { %v777_v45 = vpack.c.bf16 %v775_v9, %v773_v32  ;;  %vm546_vm4 = vcmp.eq.s32.totalorder %v541_v52, 2  ;;  %vm543_vm5 = vcmp.eq.s32.totalorder %v541_v52, 0  ;;  %vm542_vm6 = vcmp.lt.s32.totalorder %v541_v52, 2 }
 0x1b6   : > { %v776_v44 = vadd.f32 %v772_v56, %v4848_v0 }
 0x1b7   : > { %786 = vrot.lane.b32.xlu1 %v777_v45, %s4665_s23 }
 0x1bb   : > { %792 = vrot.lane.b32.xlu1 %v777_v45, %s4666_s25 }
 0x1bd   : > { %v4466_v21 = vpop.eup %4465 }
 0x1be   : > { %v4468_v27 = vpop.eup %4467  ;;  %v547_v43 = vxor.u32 2147483648, %v4466_v21 }
 0x1bf   : > { %814 = vrot.lane.b32.xlu1 %v7330_v16, %s4667_s26  ;;  %v544_v18 = vxor.u32 2147483648, %v4468_v27 }
 0x1c0   : > { %v548_v11 = vsel %vm546_vm4, %v547_v43, %v4468_v27 }
 0x1c1   : > { %v545_v50 = vsel %vm543_vm5, %v4466_v21, %v544_v18 }
 0x1c2   : > { %v549_v5 = vsel %vm542_vm6, %v545_v50, %v548_v11 }
 0x1c3   : > { %816 = vrot.lane.b32.xlu1 %v777_v45, %s4667_s26  ;;  %v550_v62 = vsel %vm540_vm7, nan, %v549_v5 }
 0x1c4   : > { %v758_v15 = vsub.f32 1.0, %v550_v62 }
 0x1c6   : > { %v770_v39 = vmul.f32 %v5170_v34, %v758_v15 }
 0x1c8   : > { %v774_v35 = vadd.f32 %v770_v39, %v4834_v53 }
 0x1ca   : > { %v778_v2 = vpack.c.bf16 %v776_v44, %v774_v35 }
 0x1cc   : > { %780 = vst.msk [vmem:[#allocation2 + $0x10] sm:$0xff] %vm262_vm0, %v778_v2 }
 0x1d3   : > { %v783_v28 = vld [vmem:[#allocation2 + $0x10] sm:$0xff] }
 0x1d4   : > { %788 = vrot.lane.b32.xlu0 %v783_v28, %s4665_s23 }
 0x1d8   : > { %794 = vrot.lane.b32.xlu0 %v783_v28, %s4666_s25 }
 0x1dc   : > { %818 = vrot.lane.b32.xlu0 %v783_v28, %s4667_s26 }
 0x229   : > { %v787_v58 = vpop.permute.xlu1 %786 }
 0x22a   : > { %820 = vrot.lane.b32.xlu0 %v787_v58, %s4667_s26 }
 0x22d   : > { %v793_v4 = vpop.permute.xlu1 %792 }
 0x231   : > { %v815_v0 = vpop.permute.xlu1 %814 }
 0x235   : > { %v817_v60 = vpop.permute.xlu1 %816 }
 0x236   : > { %v833_v55 = vsel %vm832_vm10, %v815_v0, %v817_v60 }
 0x246   : > { %v789_v34 = vpop.permute.xlu0 %788 }
 0x247   : > { %824 = vrot.lane.b32.xlu1 %v789_v34, %s4667_s26  ;;  %v791_v53 = vsel %vm790_vm8, %v787_v58, %v789_v34 }
 0x248   : > { %822 = vrot.lane.b32.xlu0 %v791_v53, %s4667_s26 }
 0x24a   : > { %v795_v59 = vpop.permute.xlu0 %794 }
 0x24b   : > { %v797_v25 = vsel %vm796_vm9, %v793_v4, %v795_v59 }
 0x24c   : > { %828 = vrot.lane.b32.xlu1 %v797_v25, %s4667_s26  ;;  %830 = vrot.lane.b32.xlu0 %v795_v59, %s4667_s26 }
 0x24e   : > { %v819_v37 = vpop.permute.xlu0 %818 }
 0x24f   : > { %v834_v10 = vsel %vm832_vm10, %v817_v60, %v819_v37  ;;  %v7332_v60 = vmov 3  }
 0x250   : > { %826 = vrot.lane.b32.xlu1 %v793_v4, %s4667_s26  ;;  %801 = vperm.xlu0 %4403, %v4808_v20  }
 0x251   : > { %849 = vmatprep.subr.bf16.mxu0 %v834_v10  ;;  %v4570_v10 = vld [vmem:[%s4795_s13] sm:$0xff] }
 0x252   : > { %850 = vmatpush1.bf16.msra.mxu0 %v833_v55  ;;  %v7333_v55 = vmov 1  }
 0x254   : > { %805 = vperm.xlu1 %4409, %v4822_v42   ;;  %4411 = vset.pattern.permute.xlu0 %v7331_v40 }
 0x258   : > { %4410 = vset.pattern.permute.xlu1 %v7331_v40 }
 0x29c   : > { %v821_v19 = vpop.permute.xlu0 %820 }
 0x2b9   : > { %v825_v30 = vpop.permute.xlu1 %824 }
 0x2ba   : > { %v823_v48 = vpop.permute.xlu0 %822 }
 0x2bb   : > { %v836_v23 = vsel %vm832_vm10, %v823_v48, %v825_v30  ;;  %v835_v29 = vsel %vm832_vm10, %v821_v19, %v823_v48  ;;  %v4571_v19 = vld [vmem:[%s4795_s13 + $0x8] sm:$0xff]  ;;  %v7298_v30 = vmov 4   ;;  %v7296_v48 = vmov 5  }
 0x2bc   : > { %851 = vmatprep.subr.bf16.mxu0 %v836_v23 }
 0x2bd   : > { %852 = vmatpush1.bf16.msra.mxu0 %v835_v29 }
 0x2be   : > { %v829_v20 = vpop.permute.xlu1 %828  ;;  %v831_v24 = vpop.permute.xlu0 %830 }
 0x2bf   : > { %v838_v51 = vsel %vm832_vm10, %v829_v20, %v831_v24 }
 0x2c0   : > { %853 = vmatprep.subr.bf16.mxu0 %v838_v51 }
 0x2c2   : > { %v827_v8 = vpop.permute.xlu1 %826 }
 0x2c3   : > { %v837_v42 = vsel %vm832_vm10, %v827_v8, %v829_v20 }
 0x2c4   : > { %854 = vmatpush1.bf16.msra.mxu0 %v837_v42 }
 0x2c7   : > { %4138 = vmatmul.mubr.msk.bf16.vlgmr.msra.gmra.mrb[0].mxu0 %vm845_vm11, %v4443_v57 }
 0x2c8   : > { %2133 = vmatprep.mubr.bf16.mxu0 %v5236_v49 }
 0x2cf   : > { %v802_v9 = vpop.permute.xlu0 %801 }
 0x2d3   : > { %v806_v6 = vpop.permute.xlu1 %805 }
 0x39a   : > { %v883_v33 = vpop.f32.mrb[0].mxu0 }
 0x39b   : > { %v885_v46 = vpop.f32.mrb[1].mxu0  ;;  %v5241_v32 = vadd.f32 %v883_v33, %v802_v9 }
 0x39c   : > { %v5239_v12 = vadd.f32 %v885_v46, %v802_v9  ;;  %v887_v14 = vpop.f32.mrb[2].mxu0 }
 0x39d   : > { %v889_v45 = vpop.f32.mrb[3].mxu0  ;;  %v5249_v31 = vadd.f32 %v887_v14, %v806_v6  ;;  %v900_v43 = vmul.f32 %v5241_v32, %v5241_v32 }
 0x39e   : > { %v5243_v63 = vadd.f32 %v889_v45, %v806_v6  ;;  %v892_v17 = vsel %vm262_vm0, %v5239_v12, 0.0  ;;  %v901_v7 = vmul.f32 %v5239_v12, %v5239_v12 }
 0x39f   : > { %v893_v22 = vadd.f32 %v892_v17, %v5241_v32  ;;  %v902_v18 = vmul.f32 %v5249_v31, %v5249_v31 }
 0x3a0   : > { %v896_v52 = vsel %vm262_vm0, %v5243_v63, 0.0  ;;  %v904_v1 = vsel %vm262_vm0, %v901_v7, 0.0  ;;  %v903_v21 = vmul.f32 %v5243_v63, %v5243_v63 }
 0x3a1   : > { %894 = vadd.xlane.f32.xlu0 %v893_v22  ;;  %v897_v27 = vadd.f32 %v896_v52, %v5249_v31  ;;  %v905_v3 = vadd.f32 %v904_v1, %v900_v43 }
 0x3a2   : > { %v908_v16 = vsel %vm262_vm0, %v903_v21, 0.0 }
 0x3a3   : > { %898 = vadd.xlane.f32.xlu1 %v897_v27  ;;  %v909_v11 = vadd.f32 %v908_v16, %v902_v18 }
 0x3a5   : > { %906 = vadd.xlane.f32.xlu0 %v905_v3 }
 0x3a9   : > { %910 = vadd.xlane.f32.xlu0 %v909_v11 }
 0x42e   : > { %v895_v50 = vpop.xlane.xlu0 %894 }
 0x42f   : > { %v912_v5 = vmul.f32 0.005, %v895_v50 }
 0x430   : > { %v899_v56 = vpop.xlane.xlu1 %898 }
 0x431   : > { %v913_v15 = vmul.f32 0.005, %v899_v56  ;;  %v916_v39 = vmul.f32 %v912_v5, %v912_v5  ;;  %v926_v20 = vsub.f32 %v5241_v32, %v912_v5  ;;  %v927_v24 = vsub.f32 %v5239_v12, %v912_v5 }
 0x432   : > { %v907_v62 = vpop.xlane.xlu0 %906 }
 0x433   : > { %v914_v44 = vmul.f32 0.005, %v907_v62  ;;  %v917_v4 = vmul.f32 %v913_v15, %v913_v15  ;;  %v928_v9 = vsub.f32 %v5249_v31, %v913_v15  ;;  %v929_v6 = vsub.f32 %v5243_v63, %v913_v15 }
 0x435   : > { %v918_v35 = vsub.f32 %v914_v44, %v916_v39 }
 0x436   : > { %v911_v2 = vpop.xlane.xlu0 %910 }
 0x437   : > { %v920_v28 = vadd.f32 1e-05, %v918_v35  ;;  %v915_v58 = vmul.f32 0.005, %v911_v2 }
 0x439   : > { %4469 = vrsqrt.f32 %v920_v28  ;;  %v919_v34 = vsub.f32 %v915_v58, %v917_v4 }
 0x43b   : > { %v921_v53 = vadd.f32 1e-05, %v919_v34 }
 0x43d   : > { %4471 = vrsqrt.f32 %v921_v53 }
 0x443   : > { %v4470_v0 = vpop.eup %4469 }
 0x444   : > { %v924_v59 = vmul.f32 %v4470_v0, %v4813_v36  ;;  %v5273_v36 = vld [vmem:[%s7286_s4] sm:$0xff] }
 0x446   : > { %932 = vperm.xlu1 %4410, %v924_v59  }
 0x447   : > { %v4472_v25 = vpop.eup %4471 }
 0x448   : > { %v925_v37 = vmul.f32 %v4472_v25, %v4815_v38  ;;  %v5279_v38 = vld [vmem:[%s7286_s4 + $0x8] sm:$0xff] }
 0x44a   : > { %4412 = vset.pattern.permute.xlu1 %v7332_v60  ;;  %937 = vperm.xlu0 %4411, %v925_v37  }
 0x44b   : > { %945 = vperm.xlu1 %4412, %v4570_v10  }
 0x44e   : > { %4416 = vset.pattern.permute.xlu0 %v7333_v55 }
 0x44f   : > { %949 = vperm.xlu1 %4412, %v4571_v19  }
 0x453   : > { %4413 = vset.pattern.permute.xlu1 %v7298_v30 }
 0x454   : > { %957 = vperm.xlu1 %4413, %v5273_v36  }
 0x458   : > { %961 = vperm.xlu1 %4413, %v5279_v38  }
 0x45c   : > { %4414 = vset.pattern.permute.xlu1 %v7296_v48 }
 0x45d   : > { %1385 = vperm.xlu1 %4414, %v5273_v36  }
 0x461   : > { %1389 = vperm.xlu1 %4414, %v5279_v38  }
 0x465   : > { %4415 = vset.pattern.permute.xlu1 %v7333_v55 }
 0x4c5   : > { %v933_v23 = vpop.permute.xlu1 %932 }
 0x4c6   : > { %v940_v8 = vmul.f32 %v933_v23, %v926_v20  ;;  %v941_v42 = vmul.f32 %v933_v23, %v927_v24 }
 0x4c9   : > { %v938_v57 = vpop.permute.xlu0 %937 }
 0x4ca   : > { %v946_v29 = vpop.permute.xlu1 %945  ;;  %v942_v45 = vmul.f32 %v938_v57, %v928_v9  ;;  %v943_v12 = vmul.f32 %v938_v57, %v929_v6 }
 0x4cb   : > { %v5289_v33 = vadd.f32 %v946_v29, %v940_v8  ;;  %v5291_v46 = vadd.f32 %v946_v29, %v941_v42 }
 0x4ce   : > { %v950_v51 = vpop.permute.xlu1 %949 }
 0x4cf   : > { %v5300_v7 = vadd.f32 %v950_v51, %v942_v45  ;;  %v5305_v1 = vadd.f32 %v950_v51, %v943_v12 }
 0x4d3   : > { %v958_v14 = vpop.permute.xlu1 %957 }
 0x4d4   : > { %v5295_v17 = vmul.f32 %v958_v14, %v5289_v33  ;;  %v5298_v32 = vmul.f32 %v958_v14, %v5291_v46 }
 0x4d6   : > { %v968_v22 = vand.u32 2147483647, %v5295_v17  ;;  %v971_v31 = vand.u32 2139095040, %v5295_v17  ;;  %v1071_v52 = vand.u32 2147483647, %v5298_v32  ;;  %v1074_v63 = vand.u32 2139095040, %v5298_v32 }
 0x4d7   : > { %v962_v21 = vpop.permute.xlu1 %961 }
 0x4d8   : > { %v972_v27 = vshrl.u32 %v971_v31, 23  ;;  %v975_v43 = vand.u32 8388607, %v968_v22  ;;  %v1078_v3 = vand.u32 8388607, %v1071_v52  ;;  %v5313_v16 = vmul.f32 %v962_v21, %v5300_v7 }
 0x4d9   : > { %v1075_v18 = vshrl.u32 %v1074_v63, 23  ;;  %v5316_v11 = vmul.f32 %v962_v21, %v5305_v1 }
 0x4da   : > { %v4139_v50 = vadd.s32 4294967169, %v972_v27  ;;  %v1174_v5 = vand.u32 2147483647, %v5313_v16  ;;  %v976_v56 = vor.u32 8388608, %v975_v43  ;;  %v1177_v15 = vand.u32 2139095040, %v5313_v16 }
 0x4db   : > { %v4143_v62 = vadd.s32 4294967169, %v1075_v18  ;;  %v1079_v44 = vor.u32 8388608, %v1078_v3  ;;  %v1280_v58 = vand.u32 2139095040, %v5316_v11 }
 0x4dc   : > { %v978_v39 = vadd.s32 1, %v4139_v50  ;;  %v1178_v2 = vshrl.u32 %v1177_v15, 23  ;;  %v5322_v28 = vand.u32 8388607, %v1174_v5  ;;  %v5325_v34 = vshll.u32 %v976_v56, 8 }
 0x4dd   : > { %v1081_v35 = vadd.s32 1, %v4143_v62  ;;  %v5327_v37 = vshll.u32 %v1079_v44, 8  ;;  %v5332_v29 = vshrl.u32 %v1280_v58, 23 }
 0x4de   : > { %vm979_vm12 = vcmp.gt.s32.totalorder %v978_v39, 0  ;;  %v4147_v53 = vadd.s32 4294967169, %v1178_v2  ;;  %v1182_v23 = vor.u32 8388608, %v5322_v28 }
 0x4df   : > { %v980_v4 = vsel %vm979_vm12, %v978_v39, 0  ;;  %vm1082_vm13 = vcmp.gt.s32.totalorder %v1081_v35, 0 }
 0x4e0   : > { %v981_v0 = vshrl.u32 %v980_v4, 5  ;;  %v982_v59 = vand.u32 31, %v980_v4  ;;  %v1083_v25 = vsel %vm1082_vm13, %v1081_v35, 0  ;;  %v5336_v8 = vadd.s32 1, %v4147_v53 }
 0x4e1   : > { %v5329_v10 = vshrl.u32 %v1083_v25, 5  ;;  %v1085_v19 = vand.u32 31, %v1083_v25 }
 0x4e2   : > { %v983_v20 = vsub.s32 32, %v982_v59  ;;  %v985_v24 = vshll.u32 %v7314_v41, %v982_v59  ;;  %v988_v51 = vshll.u32 %v7311_v47, %v982_v59  ;;  %v991_v42 = vshll.u32 %v7305_v54, %v982_v59 }
 0x4e3   : > { %v994_v57 = vshll.u32 %v7303_v61, %v982_v59  ;;  %v997_v9 = vshll.u32 %v7307_v13, %v982_v59  ;;  %vm1000_vm14 = vcmp.lt.s32.totalorder %v981_v0, 1  ;;  %vm1001_vm15 = vcmp.lt.s32.totalorder %v981_v0, 2 }
 0x4e4   : > { %v986_v6 = vshrl.u32 %v7311_v47, %v983_v20  ;;  %v989_v14 = vshrl.u32 %v7305_v54, %v983_v20  ;;  %v992_v45 = vshrl.u32 %v7303_v61, %v983_v20  ;;  %v984_v12 = vshrl.u32 %v7314_v41, %v983_v20 }
 0x4e5   : > { %v995_v31 = vshrl.u32 %v7307_v13, %v983_v20  ;;  %v998_v63 = vshrl.u32 %v7309_v26, %v983_v20  ;;  %vm1002_vm1 = vcmp.lt.s32.totalorder %v981_v0, 3  ;;  %v1086_v3 = vsub.s32 32, %v1085_v19 }
 0x4e6   : > { %v987_v21 = vor.u32 %v986_v6, %v985_v24  ;;  %v990_v27 = vor.u32 %v989_v14, %v988_v51  ;;  %v993_v43 = vor.u32 %v992_v45, %v991_v42  ;;  %vm1003_vm2 = vcmp.lt.s32.totalorder %v981_v0, 4 }
 0x4e7   : > { %v996_v18 = vor.u32 %v995_v31, %v994_v57  ;;  %v999_v50 = vor.u32 %v998_v63, %v997_v9  ;;  %v1088_v56 = vshll.u32 %v7314_v41, %v1085_v19  ;;  %v1091_v4 = vshll.u32 %v7311_v47, %v1085_v19 }
 0x4e8   : > { %v1004_v62 = vsel %vm1000_vm14, %v984_v12, %v987_v21  ;;  %v1005_v15 = vsel %vm1003_vm2, %v993_v43, 2102212464  ;;  %v1008_v39 = vsel %vm1000_vm14, %v987_v21, %v990_v27  ;;  %v1012_v44 = vsel %vm1000_vm14, %v990_v27, %v993_v43 }
 0x4e9   : > { %v1006_v35 = vsel %vm1002_vm1, %v990_v27, %v1005_v15  ;;  %v1009_v2 = vsel %vm1003_vm2, %v996_v18, 920167782  ;;  %v1013_v58 = vsel %vm1003_vm2, %v999_v50, 1326507024  ;;  %v1087_v25 = vshrl.u32 %v7314_v41, %v1086_v3 }
 0x4ea   : > { %v1010_v53 = vsel %vm1002_vm1, %v993_v43, %v1009_v2  ;;  %v1014_v59 = vsel %vm1002_vm1, %v996_v18, %v1013_v58  ;;  %v1089_v20 = vshrl.u32 %v7311_v47, %v1086_v3  ;;  %v1007_v24 = vsel %vm1001_vm15, %v1004_v62, %v1006_v35 }
 0x4eb   : > { %v1011_v51 = vsel %vm1001_vm15, %v1008_v39, %v1010_v53  ;;  %v1015_v42 = vsel %vm1001_vm15, %v1012_v44, %v1014_v59  ;;  %v1092_v57 = vshrl.u32 %v7305_v54, %v1086_v3  ;;  %v1094_v63 = vshll.u32 %v7305_v54, %v1085_v19 }
 0x4ec   : > { %v5362_v9 = vmul.u32.u64.low %v5325_v34, %v1015_v42  ;;  %v5363_v6 = vmul.u32.u64.high %v5325_v34, %v1015_v42, %v5362_v9  ;;  %v5366_v14 = vmul.u32.u64.low %v5325_v34, %v1011_v51  ;;  %v5367_v45 = vmul.u32.u64.high %v5325_v34, %v1011_v51, %v5366_v14 }
 0x4ed   : > { %v1090_v12 = vor.u32 %v1089_v20, %v1088_v56  ;;  %v1093_v31 = vor.u32 %v1092_v57, %v1091_v4  ;;  %v1095_v21 = vshrl.u32 %v7303_v61, %v1086_v3  ;;  %v1023_v0 = vmul.u32 %v5325_v34, %v1007_v24 }
 0x4ee   : > { %v1097_v27 = vshll.u32 %v7303_v61, %v1085_v19  ;;  %v1098_v43 = vshrl.u32 %v7307_v13, %v1086_v3  ;;  %v1101_v18 = vshrl.u32 %v7309_v26, %v1086_v3  ;;  %v1100_v62 = vshll.u32 %v7307_v13, %v1085_v19 }
 0x4ef   : > { %v1096_v50 = vor.u32 %v1095_v21, %v1094_v63  ;;  %vm1103_vm3 = vcmp.lt.s32.totalorder %v5329_v10, 1  ;;  %vm1104_vm4 = vcmp.lt.s32.totalorder %v5329_v10, 2  ;;  %vm1025_vm5 = vc.u32 %v5363_v6, %v5366_v14 }
 0x4f0   : > { %v1026_v56 = vadd.s32 1, %v5367_v45  ;;  %v1099_v15 = vor.u32 %v1098_v43, %v1097_v27  ;;  %vm1105_vm6 = vcmp.lt.s32.totalorder %v5329_v10, 3  ;;  %v1102_v34 = vor.u32 %v1101_v18, %v1100_v62 }
 0x4f1   : > { %vm1106_vm7 = vcmp.lt.s32.totalorder %v5329_v10, 4  ;;  %v1107_v39 = vsel %vm1103_vm3, %v1087_v25, %v1090_v12  ;;  %v1111_v3 = vsel %vm1103_vm3, %v1090_v12, %v1093_v31  ;;  %v1115_v2 = vsel %vm1103_vm3, %v1093_v31, %v1096_v50 }
 0x4f2   : > { %v1027_v44 = vsel %vm1025_vm5, %v1026_v56, %v5367_v45  ;;  %v1108_v19 = vsel %vm1106_vm7, %v1096_v50, 2102212464  ;;  %v1112_v35 = vsel %vm1106_vm7, %v1099_v15, 920167782  ;;  %v1116_v59 = vsel %vm1106_vm7, %v1102_v34, 1326507024 }
 0x4f3   : > { %v1028_v58 = vadd.s32 %v1027_v44, %v1023_v0  ;;  %v1109_v4 = vsel %vm1105_vm6, %v1093_v31, %v1108_v19  ;;  %v1113_v53 = vsel %vm1105_vm6, %v1096_v50, %v1112_v35  ;;  %v1117_v51 = vsel %vm1105_vm6, %v1099_v15, %v1116_v59 }
 0x4f4   : > { %v1110_v20 = vsel %vm1104_vm4, %v1107_v39, %v1109_v4  ;;  %v1114_v24 = vsel %vm1104_vm4, %v1111_v3, %v1113_v53  ;;  %vm1185_vm12 = vcmp.gt.s32.totalorder %v5336_v8, 0  ;;  %v1118_v42 = vsel %vm1104_vm4, %v1115_v2, %v1117_v51 }
 0x4f5   : > { %v1029_v25 = vadd.s32 536870912, %v1028_v58  ;;  %v5393_v57 = vmul.u32.u64.low %v5327_v37, %v1114_v24  ;;  %v5394_v9 = vmul.u32.u64.high %v5327_v37, %v1114_v24, %v5393_v57  ;;  %v1186_v31 = vsel %vm1185_vm12, %v5336_v8, 0 }
 0x4f6   : > { %v5398_v45 = vmul.u32.u64.low %v5327_v37, %v1118_v42  ;;  %v5399_v12 = vmul.u32.u64.high %v5327_v37, %v1118_v42, %v5398_v45  ;;  %v4151_v63 = vadd.s32 4294967169, %v5332_v29  ;;  %v1188_v0 = vand.u32 31, %v1186_v31 }
 0x4f7   : > { %v5403_v21 = vshrl.u32 %v1029_v25, 30  ;;  %v1126_v27 = vmul.u32 %v5327_v37, %v1110_v20  ;;  %v5408_v10 = vshll.u32 %v1182_v23, 8  ;;  %v1129_v18 = vadd.s32 1, %v5394_v9 }
 0x4f8   : > { %v1187_v50 = vshrl.u32 %v1186_v31, 5  ;;  %v1189_v62 = vsub.s32 32, %v1188_v0  ;;  %vm1128_vm13 = vc.u32 %v5399_v12, %v5393_v57  ;;  %v1191_v29 = vshll.u32 %v7314_v41, %v1188_v0 }
 0x4f9   : > { %v1031_v43 = vshll.u32 %v5403_v21, 30  ;;  %v1194_v8 = vshll.u32 %v7311_v47, %v1188_v0  ;;  %v1287_v56 = vadd.s32 1, %v4151_v63  ;;  %v1130_v28 = vsel %vm1128_vm13, %v1129_v18, %v5394_v9 }
 0x4fa   : > { %v1192_v37 = vshrl.u32 %v7311_v47, %v1189_v62  ;;  %v1197_v23 = vshll.u32 %v7305_v54, %v1188_v0  ;;  %v1131_v34 = vadd.s32 %v1130_v28, %v1126_v27  ;;  %v1195_v39 = vshrl.u32 %v7305_v54, %v1189_v62 }
 0x4fb   : > { %v5416_v15 = vsub.s32 %v1028_v58, %v1031_v43  ;;  %v1198_v3 = vshrl.u32 %v7303_v61, %v1189_v62  ;;  %v1200_v44 = vshll.u32 %v7303_v61, %v1188_v0  ;;  %v1201_v2 = vshrl.u32 %v7307_v13, %v1189_v62 }
 0x4fc   : > { %v1193_v35 = vor.u32 %v1192_v37, %v1191_v29  ;;  %v1203_v58 = vshll.u32 %v7307_v13, %v1188_v0  ;;  %v1132_v4 = vadd.s32 536870912, %v1131_v34  ;;  %v1196_v53 = vor.u32 %v1195_v39, %v1194_v8 }
 0x4fd   : > { %v1034_v19 = vsub.s32 0, %v5416_v15  ;;  %v1199_v59 = vor.u32 %v1198_v3, %v1197_v23  ;;  %v1204_v20 = vshrl.u32 %v7309_v26, %v1189_v62  ;;  %v1190_v51 = vshrl.u32 %v7314_v41, %v1189_v62 }
 0x4fe   : > { %v1202_v25 = vor.u32 %v1201_v2, %v1200_v44  ;;  %vm1206_vm14 = vcmp.lt.s32.totalorder %v1187_v50, 1  ;;  %v5430_v42 = vshrl.u32 %v1132_v4, 30  ;;  %vm1208_vm15 = vcmp.lt.s32.totalorder %v1187_v50, 3 }
 0x4ff   : > { %v4140_v24 = vmin.u32 %v1034_v19, %v5416_v15  ;;  %v1205_v9 = vor.u32 %v1204_v20, %v1203_v58  ;;  %vm1209_vm1 = vcmp.lt.s32.totalorder %v1187_v50, 4  ;;  %v1210_v31 = vsel %vm1206_vm14, %v1190_v51, %v1193_v35 }
 0x500   : > { %v1211_v63 = vsel %vm1209_vm1, %v1199_v59, 2102212464  ;;  %v1214_v0 = vsel %vm1206_vm14, %v1193_v35, %v1196_v53  ;;  %v1134_v27 = vshll.u32 %v5430_v42, 30  ;;  %v1215_v18 = vsel %vm1209_vm1, %v1202_v25, 920167782 }
 0x501   : > { %v1036_v45 = vclz %v4140_v24  ;;  %v1212_v43 = vsel %vm1208_vm15, %v1196_v53, %v1211_v63  ;;  %v1218_v29 = vsel %vm1206_vm14, %v1196_v53, %v1199_v59  ;;  %vm1207_vm2 = vcmp.lt.s32.totalorder %v1187_v50, 2 }
 0x502   : > { %v1216_v62 = vsel %vm1208_vm15, %v1199_v59, %v1215_v18  ;;  %v1219_v28 = vsel %vm1209_vm1, %v1205_v9, 1326507024  ;;  %v5435_v37 = vsub.s32 %v1131_v34, %v1134_v27  ;;  %v1213_v23 = vsel %vm1207_vm2, %v1210_v31, %v1212_v43 }
 0x503   : > { %v4141_v8 = vadd.s32 4294967294, %v1036_v45  ;;  %v1217_v39 = vsel %vm1207_vm2, %v1214_v0, %v1216_v62  ;;  %v1220_v3 = vsel %vm1208_vm15, %v1202_v25, %v1219_v28  ;;  %v1024_v34 = vadd.s32 %v5366_v14, %v5363_v6 }
 0x504   : > { %v1221_v44 = vsel %vm1207_vm2, %v1218_v29, %v1220_v3  ;;  %v5439_v19 = vmul.u32.u64.low %v5408_v10, %v1217_v39  ;;  %v5440_v35 = vmul.u32.u64.high %v5408_v10, %v1217_v39, %v5439_v19  ;;  %v1137_v58 = vsub.s32 0, %v5435_v37 }
 0x505   : > { %vm4142_vm3 = vcmp.lt.s32.totalorder %v4141_v8, 0  ;;  %v5445_v4 = vmul.u32.u64.low %v5408_v10, %v1221_v44  ;;  %v5446_v53 = vmul.u32.u64.high %v5408_v10, %v1221_v44, %v5445_v4  ;;  %vm1288_vm4 = vcmp.gt.s32.totalorder %v1287_v56, 0 }
 0x506   : > { %v1039_v2 = vsel %vm4142_vm3, 0, %v4141_v8  ;;  %v4144_v20 = vmin.u32 %v1137_v58, %v5435_v37  ;;  %v1277_v24 = vand.u32 2147483647, %v5316_v11  ;;  %v1289_v51 = vsel %vm1288_vm4, %v1287_v56, 0 }
 0x507   : > { %v1040_v59 = vsub.s32 32, %v1039_v2  ;;  %v1044_v50 = vsub.s32 4294967266, %v1039_v2  ;;  %v1229_v45 = vmul.u32 %v5408_v10, %v1213_v23  ;;  %v1232_v31 = vadd.s32 1, %v5440_v35 }
 0x508   : > { %v1041_v63 = vshll.u32 %v5416_v15, %v1039_v2  ;;  %v1139_v0 = vclz %v4144_v20  ;;  %vm1231_vm5 = vc.u32 %v5446_v53, %v5439_v19  ;;  %v1291_v6 = vand.u32 31, %v1289_v51 }
 0x509   : > { %v1042_v25 = vshrl.u32 %v1024_v34, %v1040_v59  ;;  %v1045_v9 = vadd.s32 127, %v1044_v50  ;;  %v1233_v27 = vsel %vm1231_vm5, %v1232_v31, %v5440_v35  ;;  %v1284_v10 = vand.u32 8388607, %v1277_v24 }
 0x50a   : > { %v4145_v18 = vadd.s32 4294967294, %v1139_v0  ;;  %v1234_v29 = vadd.s32 %v1233_v27, %v1229_v45  ;;  %v1292_v56 = vsub.s32 32, %v1291_v6  ;;  %v1294_v23 = vshll.u32 %v7314_v41, %v1291_v6 }
 0x50b   : > { %v1046_v14 = vshll.u32 %v1045_v9, 23  ;;  %v1043_v43 = vor.u32 %v1042_v25, %v1041_v63  ;;  %v1297_v35 = vshll.u32 %v7311_v47, %v1291_v6  ;;  %v1285_v4 = vor.u32 8388608, %v1284_v10 }
 0x50c   : > { %vm4146_vm6 = vcmp.lt.s32.totalorder %v4145_v18, 0  ;;  %v1235_v62 = vadd.s32 536870912, %v1234_v29  ;;  %v1295_v15 = vshrl.u32 %v7311_v47, %v1292_v56  ;;  %v1298_v39 = vshrl.u32 %v7305_v54, %v1292_v56 }
 0x50d   : > { %v1047_v8 = vor.u32 4788187, %v1046_v14  ;;  %v1050_v3 = vcvt.s32.f32 %v1043_v43  ;;  %v1301_v2 = vshrl.u32 %v7303_v61, %v1292_v56  ;;  %v5467_v58 = vsel %vm4146_vm6, 0, %v4145_v18 }
 0x50e   : > { %v5463_v44 = vshrl.u32 %v1235_v62, 30  ;;  %v1290_v34 = vshrl.u32 %v1289_v51, 5  ;;  %v1300_v59 = vshll.u32 %v7305_v54, %v1291_v6  ;;  %v1296_v25 = vor.u32 %v1295_v15, %v1294_v23 }
 0x50f   : > { %v1048_v28 = vand.u32 2147483647, %v1047_v8  ;;  %v1299_v9 = vor.u32 %v1298_v39, %v1297_v35  ;;  %v1303_v45 = vshll.u32 %v7303_v61, %v1291_v6  ;;  %v1304_v31 = vshrl.u32 %v7307_v13, %v1292_v56 }
 0x510   : > { %v1237_v20 = vshll.u32 %v5463_v44, 30  ;;  %v1306_v63 = vshll.u32 %v7307_v13, %v1291_v6  ;;  %v1307_v0 = vshrl.u32 %v7309_v26, %v1292_v56  ;;  %vm970_vm7 = vcmp.lt.s32.totalorder %v5295_v17, 0 }
 0x511   : > { %v1051_v50 = vmul.f32 %v1050_v3, %v1048_v28  ;;  %v1302_v27 = vor.u32 %v1301_v2, %v1300_v59  ;;  %v1147_v51 = vsub.s32 4294967266, %v5467_v58  ;;  %v1305_v43 = vor.u32 %v1304_v31, %v1303_v45 }
 0x512   : > { %v1238_v14 = vsub.s32 %v1234_v29, %v1237_v20  ;;  %v1308_v18 = vor.u32 %v1307_v0, %v1306_v63  ;;  %v1325_v8 = vshll.u32 %v1285_v4, 8  ;;  %vm1309_vm12 = vcmp.lt.s32.totalorder %v1290_v34, 1 }
 0x513   : > { %v1052_v10 = vxor.u32 2147483648, %v1051_v50  ;;  %vm1312_vm13 = vcmp.lt.s32.totalorder %v1290_v34, 4  ;;  %v1293_v15 = vshrl.u32 %v7314_v41, %v1292_v56  ;;  %vm1311_vm14 = vcmp.lt.s32.totalorder %v1290_v34, 3 }
 0x514   : > { %v1240_v62 = vsub.s32 0, %v1238_v14  ;;  %v1317_v6 = vsel %vm1309_vm12, %v1296_v25, %v1299_v9  ;;  %v1318_v28 = vsel %vm1312_vm13, %v1305_v43, 920167782  ;;  %vm1310_vm15 = vcmp.lt.s32.totalorder %v1290_v34, 2 }
 0x515   : > { %v1314_v39 = vsel %vm1312_vm13, %v1302_v27, 2102212464  ;;  %v1319_v29 = vsel %vm1311_vm14, %v1302_v27, %v1318_v28  ;;  %v1148_v3 = vadd.s32 127, %v1147_v51  ;;  %v1321_v2 = vsel %vm1309_vm12, %v1299_v9, %v1302_v27 }
 0x516   : > { %v4148_v23 = vmin.u32 %v1240_v62, %v1238_v14  ;;  %v1320_v35 = vsel %vm1310_vm15, %v1317_v6, %v1319_v29  ;;  %v1322_v4 = vsel %vm1312_vm13, %v1308_v18, 1326507024  ;;  %v1053_v59 = vsel %vm970_vm7, %v1052_v10, %v1051_v50 }
 0x517   : > { %v1313_v56 = vsel %vm1309_vm12, %v1293_v15, %v1296_v25  ;;  %v1323_v45 = vsel %vm1311_vm14, %v1305_v43, %v1322_v4  ;;  %v1315_v31 = vsel %vm1311_vm14, %v1299_v9, %v1314_v39  ;;  %v1143_v27 = vsub.s32 32, %v5467_v58 }
 0x518   : > { %v1242_v20 = vclz %v4148_v23  ;;  %v1324_v63 = vsel %vm1310_vm15, %v1321_v2, %v1323_v45  ;;  %v5485_v0 = vmul.u32.u64.low %v1325_v8, %v1320_v35  ;;  %v5486_v62 = vmul.u32.u64.high %v1325_v8, %v1320_v35, %v5485_v0 }
 0x519   : > { %v5489_v28 = vmul.u32.u64.low %v1325_v8, %v1324_v63  ;;  %v5490_v6 = vmul.u32.u64.high %v1325_v8, %v1324_v63, %v5489_v28  ;;  %vm5495_vm1 = vcmp.le.f32.partialorder %v968_v22, 0.7853982  ;;  %v1316_v25 = vsel %vm1310_vm15, %v1313_v56, %v1315_v31 }
 0x51a   : > { %v4149_v51 = vadd.s32 4294967294, %v1242_v20  ;;  %v1056_v9 = vsel %vm5495_vm1, %v5295_v17, %v1053_v59  ;;  %v1127_v43 = vadd.s32 %v5393_v57, %v5399_v12  ;;  %v1149_v18 = vshll.u32 %v1148_v3, 23 }
 0x51b   : > { %v1335_v15 = vadd.s32 1, %v5486_v62  ;;  %v1230_v22 = vadd.s32 %v5439_v19, %v5446_v53  ;;  %v1332_v35 = vmul.u32 %v1325_v8, %v1316_v25  ;;  %vm1334_vm3 = vc.u32 %v5490_v6, %v5485_v0 }
 0x51c   : > { %vm4150_vm2 = vcmp.lt.s32.totalorder %v4149_v51, 0  ;;  %v1145_v29 = vshrl.u32 %v1127_v43, %v1143_v27  ;;  %4473 = vcosq.f32 %v1056_v9  ;;  %v1144_v12 = vshll.u32 %v5435_v37, %v5467_v58 }
 0x51d   : > { %v1245_v10 = vsel %vm4150_vm2, 0, %v4149_v51  ;;  %v1336_v57 = vsel %vm1334_vm3, %v1335_v15, %v5486_v62  ;;  %v1150_v3 = vor.u32 4788187, %v1149_v18  ;;  %4475 = vsinq.f32 %v1056_v9 }
 0x51e   : > { %v1246_v23 = vsub.s32 32, %v1245_v10  ;;  %v1250_v39 = vsub.s32 4294967266, %v1245_v10  ;;  %v1247_v34 = vshll.u32 %v1238_v14, %v1245_v10  ;;  %v1337_v59 = vadd.s32 %v1336_v57, %v1332_v35 }
 0x51f   : > { %v1146_v20 = vor.u32 %v1145_v29, %v1144_v12  ;;  %v1054_v8 = vsub.s32 4, %v5403_v21  ;;  %v1151_v31 = vand.u32 2147483647, %v1150_v3  ;;  %vm1176_vm4 = vcmp.lt.s32.totalorder %v5313_v16, 0 }
 0x520   : > { %v1248_v2 = vshrl.u32 %v1230_v22, %v1246_v23  ;;  %v1251_v4 = vadd.s32 127, %v1250_v39  ;;  %v1338_v56 = vadd.s32 536870912, %v1337_v59  ;;  %vm5525_vm5 = vcmp.le.f32.partialorder %v1174_v5, 0.7853982 }
 0x521   : > { %v1153_v28 = vcvt.s32.f32 %v1146_v20  ;;  %v1055_v37 = vsel %vm970_vm7, %v1054_v8, %v5403_v21  ;;  %v1260_v21 = vsub.s32 4, %v5463_v44  ;;  %vm1073_vm6 = vcmp.lt.s32.totalorder %v5298_v32, 0 }
 0x522   : > { %v1249_v19 = vor.u32 %v1248_v2, %v1247_v34  ;;  %v1252_v53 = vshll.u32 %v1251_v4, 23  ;;  %v5514_v63 = vshrl.u32 %v1338_v56, 30  ;;  %v1057_v18 = vsel %vm5495_vm1, 0, %v1055_v37 }
 0x523   : > { %v1154_v25 = vmul.f32 %v1153_v28, %v1151_v31  ;;  %v1061_v35 = vand.u32 3, %v1057_v18  ;;  %v1261_v5 = vsel %vm1176_vm4, %v1260_v21, %v5463_v44  ;;  %vm5539_vm14 = vcmp.le.f32.partialorder %v1071_v52, 0.7853982 }
 0x524   : > { %v1253_v45 = vor.u32 4788187, %v1252_v53  ;;  %v1256_v51 = vcvt.s32.f32 %v1249_v19  ;;  %v1340_v62 = vshll.u32 %v5514_v63, 30  ;;  %v1263_v53 = vsel %vm5525_vm5, 0, %v1261_v5 }
 0x525   : > { %v1155_v39 = vxor.u32 2147483648, %v1154_v25  ;;  %vm1063_vm7 = vcmp.eq.s32.totalorder %v1061_v35, 0  ;;  %vm1066_vm12 = vcmp.eq.s32.totalorder %v1061_v35, 2  ;;  %vm1062_vm15 = vcmp.lt.s32.totalorder %v1061_v35, 2 }
 0x526   : > { %v1254_v14 = vand.u32 2147483647, %v1253_v45  ;;  %v4474_v27 = vpop.eup %4473  ;;  %v1341_v9 = vsub.s32 %v1337_v59, %v1340_v62  ;;  %v1333_v56 = vadd.s32 %v5485_v0, %v5490_v6  ;;  %vm1060_vm1 = vweird.f32 %v5295_v17  ;;  %v5552_v0 = vpop.permute.xlu1 %1385 }
 0x527   : > { %v4476_v10 = vpop.eup %4475  ;;  %v1067_v2 = vxor.u32 2147483648, %v4474_v27  ;;  %v1156_v57 = vsel %vm1073_vm6, %v1155_v39, %v1154_v25  ;;  %v1267_v52 = vand.u32 3, %v1263_v53  ;;  %v1157_v18 = vsub.s32 4, %v5430_v42 }
 0x528   : > { %v1257_v58 = vmul.f32 %v1256_v51, %v1254_v14  ;;  %v1343_v15 = vsub.s32 0, %v1341_v9  ;;  %v1064_v34 = vxor.u32 2147483648, %v4476_v10  ;;  %v1159_v44 = vsel %vm5539_vm14, %v5298_v32, %v1156_v57 }
 0x529   : > { %v1068_v59 = vsel %vm1066_vm12, %v1067_v2, %v4476_v10  ;;  %vm1272_vm2 = vcmp.eq.s32.totalorder %v1267_v52, 2  ;;  %vm1269_vm3 = vcmp.eq.s32.totalorder %v1267_v52, 0  ;;  %v1158_v39 = vsel %vm1073_vm6, %v1157_v18, %v5430_v42 }
 0x52a   : > { %v1258_v43 = vxor.u32 2147483648, %v1257_v58  ;;  %v4152_v29 = vmin.u32 %v1343_v15, %v1341_v9  ;;  %v1065_v3 = vsel %vm1063_vm7, %v4474_v27, %v1064_v34  ;;  %v1390_v2 = vpop.permute.xlu1 %1389  ;;  %v1160_v57 = vsel %vm5539_vm14, 0, %v1158_v39 }
 0x52b   : > { %v1069_v31 = vsel %vm1062_vm15, %v1065_v3, %v1068_v59  ;;  %vm1279_vm7 = vcmp.lt.s32.totalorder %v5316_v11, 0  ;;  %vm5564_vm12 = vcmp.le.f32.partialorder %v1277_v24, 0.7853982  ;;  %v1363_v53 = vsub.s32 4, %v5514_v63 }
 0x52c   : > { %v1259_v22 = vsel %vm1176_vm4, %v1258_v43, %v1257_v58  ;;  %v1345_v4 = vclz %v4152_v29  ;;  %v1070_v37 = vsel %vm1060_vm1, nan, %v1069_v31  ;;  %vm1268_vm4 = vcmp.lt.s32.totalorder %v1267_v52, 2 }
 0x52d   : > { %v1262_v50 = vsel %vm5525_vm5, %v5313_v16, %v1259_v22  ;;  %v1380_v17 = vsub.f32 1.0, %v1070_v37  ;;  %vm1266_vm5 = vweird.f32 %v5313_v16  ;;  %v1364_v24 = vsel %vm1279_vm7, %v1363_v53, %v5514_v63 }
 0x52e   : > { %4477 = vcosq.f32 %v1262_v50  ;;  %v4153_v12 = vadd.s32 4294967294, %v1345_v4  ;;  %v1366_v31 = vsel %vm5564_vm12, 0, %v1364_v24  ;;  %vm1163_vm15 = vweird.f32 %v5298_v32 }
 0x52f   : > { %4479 = vsinq.f32 %v1262_v50  ;;  %v1392_v50 = vmul.f32 %v5552_v0, %v1380_v17 }
 0x530   : > { %vm4154_vm13 = vcmp.lt.s32.totalorder %v4153_v12, 0  ;;  %4481 = vcosq.f32 %v1159_v44 }
 0x531   : > { %v1348_v20 = vsel %vm4154_vm13, 0, %v4153_v12  ;;  %4483 = vsinq.f32 %v1159_v44  ;;  %v1396_v59 = vadd.f32 %v1392_v50, %v5289_v33  ;;  %v1164_v44 = vand.u32 3, %v1160_v57 }
 0x532   : > { %v1349_v8 = vsub.s32 32, %v1348_v20  ;;  %v1353_v45 = vsub.s32 4294967266, %v1348_v20  ;;  %v1350_v14 = vshll.u32 %v1341_v9, %v1348_v20 }
 0x533   : > { %vm1166_vm6 = vcmp.eq.s32.totalorder %v1164_v44, 0  ;;  %vm1169_vm13 = vcmp.eq.s32.totalorder %v1164_v44, 2  ;;  %vm1165_vm14 = vcmp.lt.s32.totalorder %v1164_v44, 2 }
 0x534   : > { %v1351_v51 = vshrl.u32 %v1333_v56, %v1349_v8  ;;  %v1354_v28 = vadd.s32 127, %v1353_v45 }
 0x536   : > { %v1352_v27 = vor.u32 %v1351_v51, %v1350_v14  ;;  %v1355_v25 = vshll.u32 %v1354_v28, 23  ;;  %v1370_v14 = vand.u32 3, %v1366_v31 }
 0x538   : > { %v4478_v62 = vpop.eup %4477  ;;  %v1356_v10 = vor.u32 4788187, %v1355_v25  ;;  %v1359_v23 = vcvt.s32.f32 %v1352_v27  ;;  %vm1375_vm1 = vcmp.eq.s32.totalorder %v1370_v14, 2 }
 0x539   : > { %v4480_v58 = vpop.eup %4479  ;;  %v1273_v43 = vxor.u32 2147483648, %v4478_v62 }
 0x53a   : > { %v1270_v6 = vxor.u32 2147483648, %v4480_v58  ;;  %v1357_v22 = vand.u32 2147483647, %v1356_v10  ;;  %v4482_v4 = vpop.eup %4481 }
 0x53b   : > { %v1274_v9 = vsel %vm1272_vm2, %v1273_v43, %v4480_v58  ;;  %v4484_v3 = vpop.eup %4483  ;;  %v1170_v8 = vxor.u32 2147483648, %v4482_v4  ;;  %vm1372_vm2 = vcmp.eq.s32.totalorder %v1370_v14, 0 }
 0x53c   : > { %v1271_v15 = vsel %vm1269_vm3, %v4478_v62, %v1270_v6  ;;  %v1360_v35 = vmul.f32 %v1359_v23, %v1357_v22  ;;  %v1167_v56 = vxor.u32 2147483648, %v4484_v3  ;;  %vm1371_vm3 = vcmp.lt.s32.totalorder %v1370_v14, 2  ;;  %v4576_v14 = vld [vmem:[%s4762_s9] sm:$0xff] }
 0x53d   : > { %v1275_v21 = vsel %vm1268_vm4, %v1271_v15, %v1274_v9  ;;  %vm1369_vm4 = vweird.f32 %v5316_v11 }
 0x53e   : > { %v1276_v29 = vsel %vm1266_vm5, nan, %v1275_v21  ;;  %v1361_v5 = vxor.u32 2147483648, %v1360_v35  ;;  %v1168_v33 = vsel %vm1166_vm6, %v4482_v4, %v1167_v56 }
 0x53f   : > { %v1382_v34 = vsub.f32 1.0, %v1276_v29 }
 0x540   : > { %v1362_v42 = vsel %vm1279_vm7, %v1361_v5, %v1360_v35 }
 0x541   : > { %v1394_v12 = vmul.f32 %v1390_v2, %v1382_v34  ;;  %v1365_v19 = vsel %vm5564_vm12, %v5316_v11, %v1362_v42  ;;  %v5603_v34 = vld [vmem:[#allocation2] sm:$0xff] }
 0x542   : > { %4485 = vcosq.f32 %v1365_v19 }
 0x543   : > { %v1398_v20 = vadd.f32 %v1394_v12, %v5300_v7  ;;  %4487 = vsinq.f32 %v1365_v19  ;;  %v1171_v7 = vsel %vm1169_vm13, %v1170_v8, %v4484_v3 }
 0x544   : > { %v1172_v52 = vsel %vm1165_vm14, %v1168_v33, %v1171_v7  ;;  %v4575_v7 = vld [vmem:[%s4762_s9 + $0x8] sm:$0xff] }
 0x545   : > { %v1400_v45 = vpack.c.bf16 %v1398_v20, %v1396_v59  ;;  %v1173_v51 = vsel %vm1163_vm15, nan, %v1172_v52  ;;  %v4444_v59 = vld [vmem:[%s7285_s3] sm:$0xff]  }
 0x546   : > { %v1381_v58 = vsub.f32 1.0, %v1173_v51  ;;  %v4577_v51 = vld [vmem:[%s4762_s9 + $0x10] sm:$0xff] }
 0x547   : > { %1414 = vrot.lane.b32.xlu0 %v1400_v45, %s4666_s25  ;;  %1409 = vrot.lane.b32.xlu1 %v1400_v45, %s4665_s23 }
 0x548   : > { %v1393_v18 = vmul.f32 %v5552_v0, %v1381_v58 }
 0x54a   : > { %v1397_v10 = vadd.f32 %v1393_v18, %v5291_v46 }
 0x54b   : > { %1435 = vrot.lane.b32.xlu0 %v5236_v49, %s4667_s26 }
 0x54c   : > { %v4486_v63 = vpop.eup %4485 }
 0x54d   : > { %v4488_v28 = vpop.eup %4487  ;;  %v1376_v62 = vxor.u32 2147483648, %v4486_v63 }
 0x54e   : > { %v1373_v37 = vxor.u32 2147483648, %v4488_v28 }
 0x54f   : > { %1437 = vrot.lane.b32.xlu0 %v1400_v45, %s4667_s26  ;;  %v1377_v27 = vsel %vm1375_vm1, %v1376_v62, %v4488_v28  ;;  %v4578_v62 = vld [vmem:[%s4762_s9 + $0x18] sm:$0xff]  ;;  %s4595_s9 = sshll.u32 %s4676_s14, 4  ;;  %s4596_s9 = int_to_ptr.vmem [resolvable:$false] %s4595_s9 }
 0x550   : > { %v1374_v25 = vsel %vm1372_vm2, %v4486_v63, %v1373_v37  ;;  %s4597_s15 = scalar_lea.vmem %s4596_s9, 1024 }
 0x551   : > { %v1378_v49 = vsel %vm1371_vm3, %v1374_v25, %v1377_v27 }
 0x552   : > { %v1379_v43 = vsel %vm1369_vm4, nan, %v1378_v49 }
 0x553   : > { %v1383_v32 = vsub.f32 1.0, %v1379_v43 }
 0x555   : > { %v1395_v6 = vmul.f32 %v1390_v2, %v1383_v32 }
 0x557   : > { %v1399_v17 = vadd.f32 %v1395_v6, %v5305_v1 }
 0x559   : > { %v1401_v9 = vpack.c.bf16 %v1399_v17, %v1397_v10 }
 0x55b   : > { %1403 = vst.msk [vmem:[#allocation2 + $0x10] sm:$0xff] %vm262_vm0, %v1401_v9 }
 0x562   : > { %v1406_v15 = vld [vmem:[#allocation2 + $0x10] sm:$0xff] }
 0x563   : > { %1411 = vrot.lane.b32.xlu1 %v1406_v15, %s4665_s23 }
 0x567   : > { %1416 = vrot.lane.b32.xlu1 %v1406_v15, %s4666_s25 }
 0x56b   : > { %1439 = vrot.lane.b32.xlu1 %v1406_v15, %s4667_s26 }
 0x5b9   : > { %v1410_v11 = vpop.permute.xlu1 %1409  ;;  %v1415_v0 = vpop.permute.xlu0 %1414 }
 0x5ba   : > { %1441 = vrot.lane.b32.xlu1 %v1410_v11, %s4667_s26 }
 0x5bd   : > { %v1436_v23 = vpop.permute.xlu0 %1435 }
 0x5c1   : > { %v1438_v39 = vpop.permute.xlu0 %1437 }
 0x5c2   : > { %v1453_v50 = vsel %vm832_vm10, %v1436_v23, %v1438_v39 }
 0x5d5   : > { %v1412_v22 = vpop.permute.xlu1 %1411 }
 0x5d6   : > { %1445 = vrot.lane.b32.xlu0 %v1412_v22, %s4667_s26  ;;  %v1413_v46 = vsel %vm790_vm8, %v1410_v11, %v1412_v22  ;;  %v248_v11 = vld [vmem:[%s4795_s13 + $0x10] sm:$0xff] }
 0x5d7   : > { %1443 = vrot.lane.b32.xlu1 %v1413_v46, %s4667_s26  ;;  %v5648_v22 = vld [vmem:[%s7286_s4 + $0x10] sm:$0xff] }
 0x5d9   : > { %v1417_v1 = vpop.permute.xlu1 %1416 }
 0x5da   : > { %v1418_v21 = vsel %vm796_vm9, %v1415_v0, %v1417_v1 }
 0x5db   : > { %1449 = vrot.lane.b32.xlu0 %v1418_v21, %s4667_s26  ;;  %1451 = vrot.lane.b32.xlu1 %v1417_v1, %s4667_s26 }
 0x5dd   : > { %v1440_v29 = vpop.permute.xlu1 %1439 }
 0x5de   : > { %v1454_v35 = vsel %vm832_vm10, %v1438_v39, %v1440_v29 }
 0x5df   : > { %1447 = vrot.lane.b32.xlu0 %v1415_v0, %s4667_s26  ;;  %1468 = vmatprep.subr.bf16.mxu1 %v1454_v35  ;;  %v249_v0 = vld [vmem:[%s4795_s13 + $0x18] sm:$0xff] }
 0x5e0   : > { %1469 = vmatpush1.bf16.msra.mxu1 %v1453_v50  ;;  %1422 = vperm.xlu1 %4415, %v5273_v36  }
 0x5e3   : > { %1426 = vperm.xlu0 %4416, %v5279_v38  }
 0x5e7   : > { %4417 = vset.pattern.permute.xlu0 %v5603_v34 }
 0x62c   : > { %v1442_v2 = vpop.permute.xlu1 %1441 }
 0x648   : > { %v1446_v4 = vpop.permute.xlu0 %1445 }
 0x649   : > { %v1444_v5 = vpop.permute.xlu1 %1443 }
 0x64a   : > { %v1456_v57 = vsel %vm832_vm10, %v1444_v5, %v1446_v4  ;;  %v1455_v12 = vsel %vm832_vm10, %v1442_v2, %v1444_v5 }
 0x64b   : > { %1470 = vmatprep.subr.bf16.mxu1 %v1456_v57 }
 0x64c   : > { %1471 = vmatpush1.bf16.msra.mxu1 %v1455_v12 }
 0x64d   : > { %v1450_v3 = vpop.permute.xlu0 %1449  ;;  %v1452_v16 = vpop.permute.xlu1 %1451 }
 0x64e   : > { %v1458_v42 = vsel %vm832_vm10, %v1450_v3, %v1452_v16  ;;  %v5653_v16 = vadd.f32 1.0, %v249_v0 }
 0x64f   : > { %1472 = vmatprep.subr.bf16.mxu1 %v1458_v42  ;;  %v5655_v42 = vadd.f32 1.0, %v248_v11 }
 0x651   : > { %v1448_v36 = vpop.permute.xlu0 %1447 }
 0x652   : > { %v1457_v38 = vsel %vm832_vm10, %v1448_v36, %v1450_v3 }
 0x653   : > { %1473 = vmatpush1.bf16.msra.mxu1 %v1457_v38 }
 0x656   : > { %4156 = vmatmul.mubr.msk.bf16.vlgmr.msra.gmra.mrb[0].mxu1 %vm845_vm11, %v4444_v59 }
 0x657   : > { %2753 = vmatprep.mubr.bf16.mxu1 %v5603_v34 }
 0x65f   : > { %v1423_v53 = vpop.permute.xlu1 %1422 }
 0x662   : > { %v1427_v44 = vpop.permute.xlu0 %1426 }
 0x729   : > { %v1502_v20 = vpop.f32.mrb[0].mxu1 }
 0x72a   : > { %v1503_v19 = vadd.f32 %v1502_v20, %v1423_v53  ;;  %v1504_v56 = vpop.f32.mrb[1].mxu1  ;;  %v5662_v20 = vld [vmem:[%s7286_s4 + $0x18] sm:$0xff] }
 0x72b   : > { %v1505_v8 = vadd.f32 %v1504_v56, %v1423_v53  ;;  %v1506_v45 = vpop.f32.mrb[2].mxu1 }
 0x72c   : > { %v1507_v24 = vadd.f32 %v1506_v45, %v1427_v44  ;;  %v1508_v33 = vpop.f32.mrb[3].mxu1  ;;  %v5619_v63 = vadd.f32 %v4576_v14, %v1503_v19 }
 0x72d   : > { %v5616_v31 = vadd.f32 %v4575_v7, %v1505_v8  ;;  %v1509_v52 = vadd.f32 %v1508_v33, %v1427_v44 }
 0x72e   : > { %v5622_v28 = vadd.f32 %v4577_v51, %v1507_v24  ;;  %v1523_v9 = vmul.f32 %v5619_v63, %v5619_v63 }
 0x72f   : > { %v5625_v37 = vadd.f32 %v4578_v62, %v1509_v52  ;;  %v1515_v58 = vsel %vm262_vm0, %v5616_v31, 0.0  ;;  %v1524_v27 = vmul.f32 %v5616_v31, %v5616_v31 }
 0x730   : > { %v1516_v25 = vadd.f32 %v1515_v58, %v5619_v63  ;;  %v1525_v32 = vmul.f32 %v5622_v28, %v5622_v28 }
 0x731   : > { %v1519_v49 = vsel %vm262_vm0, %v5625_v37, 0.0  ;;  %v1526_v43 = vmul.f32 %v5625_v37, %v5625_v37  ;;  %v1527_v10 = vsel %vm262_vm0, %v1524_v27, 0.0 }
 0x732   : > { %1517 = vadd.xlane.f32.xlu1 %v1516_v25  ;;  %v1520_v18 = vadd.f32 %v1519_v49, %v5622_v28  ;;  %v1528_v15 = vadd.f32 %v1527_v10, %v1523_v9 }
 0x733   : > { %v1531_v6 = vsel %vm262_vm0, %v1526_v43, 0.0 }
 0x734   : > { %1521 = vadd.xlane.f32.xlu0 %v1520_v18  ;;  %v1532_v17 = vadd.f32 %v1531_v6, %v1525_v32 }
 0x736   : > { %1533 = vadd.xlane.f32.xlu1 %v1532_v17 }
 0x738   : > { %1529 = vadd.xlane.f32.xlu0 %v1528_v15 }
 0x747   : > { %1571 = vperm.xlu1 %4415, %v248_v11  }
 0x74b   : > { %1576 = vperm.xlu1 %4415, %v249_v0  }
 0x74f   : > { %4418 = vset.pattern.permute.xlu1 %v7331_v40 }
 0x750   : > { %1585 = vperm.xlu1 %4418, %v5648_v22  }
 0x754   : > { %4419 = vset.pattern.permute.xlu1 %v5603_v34 }
 0x7bf   : > { %v1518_v23 = vpop.xlane.xlu1 %1517 }
 0x7c0   : > { %v1535_v1 = vmul.f32 0.005, %v1518_v23 }
 0x7c1   : > { %v1522_v46 = vpop.xlane.xlu0 %1521 }
 0x7c2   : > { %v1536_v21 = vmul.f32 0.005, %v1522_v46  ;;  %v1539_v5 = vmul.f32 %v1535_v1, %v1535_v1  ;;  %v1551_v52 = vsub.f32 %v5619_v63, %v1535_v1  ;;  %v1552_v14 = vsub.f32 %v5616_v31, %v1535_v1 }
 0x7c3   : > { %v1534_v39 = vpop.xlane.xlu1 %1533 }
 0x7c4   : > { %v1540_v29 = vmul.f32 %v1536_v21, %v1536_v21  ;;  %v1538_v35 = vmul.f32 0.005, %v1534_v39  ;;  %v1553_v8 = vsub.f32 %v5622_v28, %v1536_v21  ;;  %v1554_v45 = vsub.f32 %v5625_v37, %v1536_v21 }
 0x7c5   : > { %v1530_v50 = vpop.xlane.xlu0 %1529 }
 0x7c6   : > { %v1542_v2 = vsub.f32 %v1538_v35, %v1540_v29  ;;  %v1537_v4 = vmul.f32 0.005, %v1530_v50 }
 0x7c7   : > { %v1572_v44 = vpop.permute.xlu1 %1571 }
 0x7c8   : > { %v1546_v57 = vadd.f32 1e-05, %v1542_v2  ;;  %v1541_v12 = vsub.f32 %v1537_v4, %v1539_v5 }
 0x7ca   : > { %4489 = vrsqrt.f32 %v1546_v57  ;;  %v1545_v3 = vadd.f32 1e-05, %v1541_v12 }
 0x7cb   : > { %v1577_v19 = vpop.permute.xlu1 %1576 }
 0x7cc   : > { %4491 = vrsqrt.f32 %v1545_v3 }
 0x7cf   : > { %v1586_v56 = vpop.permute.xlu1 %1585 }
 0x7d4   : > { %v4490_v36 = vpop.eup %4489 }
 0x7d5   : > { %v1550_v38 = vmul.f32 %v4490_v36, %v5653_v16 }
 0x7d6   : > { %v4492_v59 = vpop.eup %4491 }
 0x7d7   : > { %1562 = vperm.xlu1 %4419, %v1550_v38   ;;  %v1549_v53 = vmul.f32 %v4492_v59, %v5655_v42 }
 0x7d9   : > { %1557 = vperm.xlu0 %4417, %v1549_v53  }
 0x7db   : > { %4420 = vset.pattern.permute.xlu1 %v7331_v40 }
 0x7dc   : > { %1590 = vperm.xlu1 %4420, %v5662_v20  }
 0x7e0   : > { %4421 = vset.pattern.permute.xlu1 %v7332_v60 }
 0x7e1   : > { %2014 = vperm.xlu1 %4421, %v5648_v22  }
 0x7e5   : > { %2018 = vperm.xlu1 %4421, %v5662_v20  }
 0x7e9   : > { %4422 = vset.pattern.permute.xlu1 %v5603_v34 }
 0x856   : > { %v1563_v24 = vpop.permute.xlu1 %1562 }
 0x857   : > { %v1567_v33 = vmul.f32 %v1563_v24, %v1553_v8  ;;  %v1568_v7 = vmul.f32 %v1563_v24, %v1554_v45 }
 0x858   : > { %v1558_v51 = vpop.permute.xlu0 %1557 }
 0x859   : > { %v1565_v62 = vmul.f32 %v1558_v51, %v1551_v52  ;;  %v1566_v58 = vmul.f32 %v1558_v51, %v1552_v14  ;;  %v5674_v27 = vadd.f32 %v1577_v19, %v1567_v33  ;;  %v5676_v34 = vadd.f32 %v1577_v19, %v1568_v7 }
 0x85b   : > { %v5678_v25 = vadd.f32 %v1572_v44, %v1565_v62  ;;  %v5680_v49 = vadd.f32 %v1572_v44, %v1566_v58  ;;  %v1591_v43 = vpop.permute.xlu1 %1590 }
 0x85c   : > { %v5683_v18 = vmul.f32 %v1591_v43, %v5674_v27  ;;  %v5686_v32 = vmul.f32 %v1591_v43, %v5676_v34 }
 0x85d   : > { %v5689_v6 = vmul.f32 %v1586_v56, %v5678_v25  ;;  %v5692_v10 = vmul.f32 %v1586_v56, %v5680_v49 }
 0x85e   : > { %v7302_v17 = vand.u32 2147483647, %v5683_v18  ;;  %v1806_v9 = vand.u32 2139095040, %v5683_v18  ;;  %v7301_v15 = vand.u32 2147483647, %v5686_v32  ;;  %v1909_v23 = vand.u32 2139095040, %v5686_v32 }
 0x85f   : > { %v1600_v11 = vand.u32 2139095040, %v5689_v6  ;;  %v1703_v0 = vand.u32 2139095040, %v5692_v10  ;;  %v7300_v2 = vand.u32 2147483647, %v5689_v6 }
 0x860   : > { %v1807_v46 = vshrl.u32 %v1806_v9, 23  ;;  %v1810_v39 = vand.u32 8388607, %v7302_v17  ;;  %v1910_v29 = vshrl.u32 %v1909_v23, 23  ;;  %v1913_v50 = vand.u32 8388607, %v7301_v15 }
 0x861   : > { %v1601_v1 = vshrl.u32 %v1600_v11, 23  ;;  %v1704_v21 = vshrl.u32 %v1703_v0, 23  ;;  %v5707_v53 = vand.u32 8388607, %v7300_v2 }
 0x862   : > { %v4165_v35 = vadd.s32 4294967169, %v1807_v46  ;;  %v4169_v57 = vadd.s32 4294967169, %v1910_v29  ;;  %v1811_v38 = vor.u32 8388608, %v1810_v39  ;;  %v1914_v59 = vor.u32 8388608, %v1913_v50 }
 0x863   : > { %v4157_v4 = vadd.s32 4294967169, %v1601_v1  ;;  %v4161_v5 = vadd.s32 4294967169, %v1704_v21 }
 0x864   : > { %v1813_v12 = vadd.s32 1, %v4165_v35  ;;  %v1916_v19 = vadd.s32 1, %v4169_v57  ;;  %v5713_v52 = vshll.u32 %v1811_v38, 8  ;;  %v5715_v14 = vshll.u32 %v1914_v59, 8 }
 0x865   : > { %v1607_v3 = vadd.s32 1, %v4157_v4  ;;  %v1710_v36 = vadd.s32 1, %v4161_v5 }
 0x866   : > { %vm1814_vm5 = vcmp.gt.s32.totalorder %v1813_v12, 0  ;;  %vm1917_vm6 = vcmp.gt.s32.totalorder %v1916_v19, 0 }
 0x867   : > { %vm1608_vm7 = vcmp.gt.s32.totalorder %v1607_v3, 0  ;;  %vm1711_vm12 = vcmp.gt.s32.totalorder %v1710_v36, 0  ;;  %v1815_v44 = vsel %vm1814_vm5, %v1813_v12, 0  ;;  %v1918_v51 = vsel %vm1917_vm6, %v1916_v19, 0 }
 0x868   : > { %v1609_v56 = vsel %vm1608_vm7, %v1607_v3, 0  ;;  %v1712_v8 = vsel %vm1711_vm12, %v1710_v36, 0  ;;  %v1817_v45 = vand.u32 31, %v1815_v44  ;;  %v1816_v58 = vshrl.u32 %v1815_v44, 5 }
 0x869   : > { %v5709_v24 = vand.u32 31, %v1609_v56  ;;  %v5711_v33 = vand.u32 31, %v1712_v8  ;;  %v5722_v9 = vshrl.u32 %v1609_v56, 5  ;;  %v5724_v11 = vshrl.u32 %v1712_v8, 5 }
 0x86a   : > { %v1818_v7 = vsub.s32 32, %v1817_v45  ;;  %v1820_v23 = vshll.u32 %v7314_v41, %v1817_v45  ;;  %v1823_v21 = vshll.u32 %v7311_v47, %v1817_v45  ;;  %v1826_v39 = vshll.u32 %v7305_v54, %v1817_v45 }
 0x86b   : > { %v5719_v62 = vsub.s32 32, %v5709_v24  ;;  %v5727_v0 = vsub.s32 32, %v5711_v33  ;;  %v1623_v29 = vshll.u32 %v7303_v61, %v5709_v24  ;;  %v5745_v5 = vshll.u32 %v7307_v13, %v5709_v24 }
 0x86c   : > { %v1821_v1 = vshrl.u32 %v7311_v47, %v1818_v7  ;;  %v1824_v50 = vshrl.u32 %v7305_v54, %v1818_v7  ;;  %v1827_v4 = vshrl.u32 %v7303_v61, %v1818_v7  ;;  %v1726_v57 = vshll.u32 %v7303_v61, %v5711_v33 }
 0x86d   : > { %v1624_v46 = vshrl.u32 %v7307_v13, %v5719_v62  ;;  %v5739_v35 = vshrl.u32 %v7309_v26, %v5719_v62  ;;  %v5751_v12 = vshll.u32 %v7307_v13, %v5711_v33  ;;  %v1819_v3 = vshrl.u32 %v7314_v41, %v1818_v7 }
 0x86e   : > { %v1727_v36 = vshrl.u32 %v7307_v13, %v5727_v0  ;;  %v1822_v38 = vor.u32 %v1821_v1, %v1820_v23  ;;  %v1825_v59 = vor.u32 %v1824_v50, %v1823_v21  ;;  %v1828_v44 = vor.u32 %v1827_v4, %v1826_v39 }
 0x86f   : > { %v5756_v56 = vor.u32 %v1624_v46, %v1623_v29  ;;  %v5760_v8 = vshrl.u32 %v7309_v26, %v5727_v0  ;;  %v1829_v48 = vshll.u32 %v7303_v61, %v1817_v45  ;;  %v1830_v30 = vshrl.u32 %v7307_v13, %v1818_v7 }
 0x870   : > { %v1832_v15 = vshll.u32 %v7307_v13, %v1817_v45  ;;  %v1833_v17 = vshrl.u32 %v7309_v26, %v1818_v7  ;;  %vm1835_vm13 = vcmp.lt.s32.totalorder %v1816_v58, 1  ;;  %vm1836_vm14 = vcmp.lt.s32.totalorder %v1816_v58, 2 }
 0x871   : > { %v1831_v23 = vor.u32 %v1830_v30, %v1829_v48  ;;  %vm1837_vm15 = vcmp.lt.s32.totalorder %v1816_v58, 3  ;;  %vm1838_vm1 = vcmp.lt.s32.totalorder %v1816_v58, 4  ;;  %v1839_v1 = vsel %vm1835_vm13, %v1819_v3, %v1822_v38 }
 0x872   : > { %v1834_v46 = vor.u32 %v1833_v17, %v1832_v15  ;;  %v1840_v21 = vsel %vm1838_vm1, %v1828_v44, 2102212464  ;;  %v1843_v39 = vsel %vm1835_vm13, %v1822_v38, %v1825_v59  ;;  %v1847_v4 = vsel %vm1835_vm13, %v1825_v59, %v1828_v44 }
 0x873   : > { %v1841_v29 = vsel %vm1837_vm15, %v1825_v59, %v1840_v21  ;;  %v1844_v50 = vsel %vm1838_vm1, %v1831_v23, 920167782  ;;  %v1919_v2 = vshrl.u32 %v1918_v51, 5  ;;  %v5772_v30 = vor.u32 %v1727_v36, %v1726_v57 }
 0x874   : > { %v1842_v43 = vsel %vm1836_vm14, %v1839_v1, %v1841_v29  ;;  %v1845_v45 = vsel %vm1837_vm15, %v1828_v44, %v1844_v50  ;;  %v1848_v7 = vsel %vm1838_vm1, %v1834_v46, 1326507024  ;;  %v1920_v15 = vand.u32 31, %v1918_v51 }
 0x875   : > { %v1846_v48 = vsel %vm1836_vm14, %v1843_v39, %v1845_v45  ;;  %v1849_v17 = vsel %vm1837_vm15, %v1831_v23, %v1848_v7  ;;  %v1858_v19 = vmul.u32 %v5713_v52, %v1842_v43  ;;  %vm1632_vm2 = vcmp.lt.s32.totalorder %v5722_v9, 4 }
 0x876   : > { %v1850_v3 = vsel %vm1836_vm14, %v1847_v4, %v1849_v17  ;;  %v5778_v38 = vmul.u32.u64.low %v5713_v52, %v1846_v48  ;;  %v5779_v59 = vmul.u32.u64.high %v5713_v52, %v1846_v48, %v5778_v38  ;;  %v1921_v36 = vsub.s32 32, %v1920_v15 }
 0x877   : > { %v5785_v44 = vmul.u32.u64.low %v5713_v52, %v1850_v3  ;;  %v5786_v57 = vmul.u32.u64.high %v5713_v52, %v1850_v3, %v5785_v44  ;;  %vm1938_vm3 = vcmp.lt.s32.totalorder %v1919_v2, 1  ;;  %v1923_v23 = vshll.u32 %v7314_v41, %v1920_v15 }
 0x878   : > { %v1926_v51 = vshll.u32 %v7311_v47, %v1920_v15  ;;  %v1929_v58 = vshll.u32 %v7305_v54, %v1920_v15  ;;  %v1932_v46 = vshll.u32 %v7303_v61, %v1920_v15  ;;  %v1924_v1 = vshrl.u32 %v7311_v47, %v1921_v36 }
 0x879   : > { %v1927_v43 = vshrl.u32 %v7305_v54, %v1921_v36  ;;  %v1930_v21 = vshrl.u32 %v7303_v61, %v1921_v36  ;;  %v1935_v39 = vshll.u32 %v7307_v13, %v1920_v15  ;;  %v1861_v52 = vadd.s32 1, %v5779_v59 }
 0x87a   : > { %v1922_v29 = vshrl.u32 %v7314_v41, %v1921_v36  ;;  %v1933_v50 = vshrl.u32 %v7307_v13, %v1921_v36  ;;  %v1936_v4 = vshrl.u32 %v7309_v26, %v1921_v36  ;;  %vm1860_vm4 = vc.u32 %v5786_v57, %v5778_v38 }
 0x87b   : > { %v1925_v45 = vor.u32 %v1924_v1, %v1923_v23  ;;  %v1928_v7 = vor.u32 %v1927_v43, %v1926_v51  ;;  %vm1939_vm5 = vcmp.lt.s32.totalorder %v1919_v2, 2  ;;  %v1862_v48 = vsel %vm1860_vm4, %v1861_v52, %v5779_v59 }
 0x87c   : > { %v1931_v17 = vor.u32 %v1930_v21, %v1929_v58  ;;  %v1934_v3 = vor.u32 %v1933_v50, %v1932_v46  ;;  %v1937_v44 = vor.u32 %v1936_v4, %v1935_v39  ;;  %v1863_v15 = vadd.s32 %v1862_v48, %v1858_v19 }
 0x87d   : > { %vm1940_vm7 = vcmp.lt.s32.totalorder %v1919_v2, 3  ;;  %vm1941_vm12 = vcmp.lt.s32.totalorder %v1919_v2, 4  ;;  %v1942_v61 = vsel %vm1938_vm3, %v1922_v29, %v1925_v45  ;;  %v1946_v13 = vsel %vm1938_vm3, %v1925_v45, %v1928_v7 }
 0x87e   : > { %v1943_v54 = vsel %vm1941_vm12, %v1931_v17, 2102212464  ;;  %v1947_v36 = vsel %vm1941_vm12, %v1934_v3, 920167782  ;;  %v1950_v26 = vsel %vm1938_vm3, %v1928_v7, %v1931_v17  ;;  %v1864_v47 = vadd.s32 536870912, %v1863_v15 }
 0x87f   : > { %v1944_v23 = vsel %vm1940_vm7, %v1928_v7, %v1943_v54  ;;  %v1948_v51 = vsel %vm1940_vm7, %v1931_v17, %v1947_v36  ;;  %v1951_v1 = vsel %vm1941_vm12, %v1937_v44, 1326507024  ;;  %v1638_v59 = vsel %vm1632_vm2, %v5756_v56, 920167782 }
 0x880   : > { %v1945_v19 = vsel %vm1939_vm5, %v1942_v61, %v1944_v23  ;;  %v1949_v58 = vsel %vm1939_vm5, %v1946_v13, %v1948_v51  ;;  %v1952_v46 = vsel %vm1940_vm7, %v1934_v3, %v1951_v1  ;;  %v5811_v43 = vshrl.u32 %v1864_v47, 30 }
 0x881   : > { %v1953_v21 = vsel %vm1939_vm5, %v1950_v26, %v1952_v46  ;;  %v5815_v39 = vmul.u32.u64.low %v5715_v14, %v1949_v58  ;;  %v5816_v52 = vmul.u32.u64.high %v5715_v14, %v1949_v58, %v5815_v39  ;;  %v7342_v54 = vor.u32 %v5739_v35, %v5745_v5 }
 0x882   : > { %v5825_v61 = vmul.u32.u64.low %v5715_v14, %v1953_v21  ;;  %v5826_v50 = vmul.u32.u64.high %v5715_v14, %v1953_v21, %v5825_v61  ;;  %v1614_v47 = vshll.u32 %v7314_v41, %v5709_v24  ;;  %v1866_v13 = vshll.u32 %v5811_v43, 30 }
 0x883   : > { %v1642_v29 = vsel %vm1632_vm2, %v7342_v54, 1326507024  ;;  %v7343_v26 = vmov 2475754826   ;;  %v7344_v35 = vmov 2131351028   ;;  %v1961_v45 = vmul.u32 %v5715_v14, %v1945_v19 }
 0x884   : > { %v1615_v2 = vshrl.u32 %v7343_v26, %v5719_v62  ;;  %v1617_v4 = vshll.u32 %v7343_v26, %v5709_v24  ;;  %v1618_v5 = vshrl.u32 %v7344_v35, %v5719_v62  ;;  %v1613_v7 = vshrl.u32 %v7314_v41, %v5719_v62 }
 0x885   : > { %v1620_v48 = vshll.u32 %v7344_v35, %v5709_v24  ;;  %v7345_v17 = vmov 2102212464   ;;  %v5844_v44 = vsub.s32 %v1863_v15, %v1866_v13  ;;  %v1964_v36 = vadd.s32 1, %v5816_v52 }
 0x886   : > { %v1621_v3 = vshrl.u32 %v7345_v17, %v5719_v62  ;;  %v1616_v23 = vor.u32 %v1615_v2, %v1614_v47  ;;  %v1619_v51 = vor.u32 %v1618_v5, %v1617_v4  ;;  %vm1963_vm6 = vc.u32 %v5826_v50, %v5815_v39 }
 0x887   : > { %vm1629_vm13 = vcmp.lt.s32.totalorder %v5722_v9, 1  ;;  %vm1631_vm14 = vcmp.lt.s32.totalorder %v5722_v9, 3  ;;  %v1869_v14 = vsub.s32 0, %v5844_v44  ;;  %v1965_v24 = vsel %vm1963_vm6, %v1964_v36, %v5816_v52 }
 0x888   : > { %v1622_v1 = vor.u32 %v1621_v3, %v1620_v48  ;;  %v1633_v19 = vsel %vm1629_vm13, %v1613_v7, %v1616_v23  ;;  %v1637_v62 = vsel %vm1629_vm13, %v1616_v23, %v1619_v51  ;;  %v1966_v15 = vadd.s32 %v1965_v24, %v1961_v45 }
 0x889   : > { %v4166_v54 = vmin.u32 %v1869_v14, %v5844_v44  ;;  %vm1630_vm15 = vcmp.lt.s32.totalorder %v5722_v9, 2  ;;  %v1643_v47 = vsel %vm1631_vm14, %v5756_v56, %v1642_v29  ;;  %v7346_v52 = vor.u32 8388608, %v5707_v53 }
 0x88a   : > { %v1634_v58 = vsel %vm1632_vm2, %v1622_v1, 2102212464  ;;  %v1639_v46 = vsel %vm1631_vm14, %v1622_v1, %v1638_v59  ;;  %v1641_v21 = vsel %vm1629_vm13, %v1619_v51, %v1622_v1  ;;  %v1967_v13 = vadd.s32 536870912, %v1966_v15 }
 0x88b   : > { %v1635_v61 = vsel %vm1631_vm14, %v1619_v51, %v1634_v58  ;;  %v1640_v2 = vsel %vm1630_vm15, %v1637_v62, %v1639_v46  ;;  %v1644_v4 = vsel %vm1630_vm15, %v1641_v21, %v1643_v47  ;;  %v1645_v5 = vshll.u32 %v7346_v52, 8 }
 0x88c   : > { %v1731_v45 = vor.u32 %v5760_v8, %v5751_v12  ;;  %vm1735_vm1 = vcmp.lt.s32.totalorder %v5724_v11, 4  ;;  %v1871_v59 = vclz %v4166_v54  ;;  %v1636_v7 = vsel %vm1630_vm15, %v1633_v19, %v1635_v61 }
 0x88d   : > { %v1741_v9 = vsel %vm1735_vm1, %v5772_v30, 920167782  ;;  %v5866_v48 = vshrl.u32 %v1967_v13, 30  ;;  %v5868_v56 = vmul.u32.u64.low %v1645_v5, %v1644_v4  ;;  %v5869_v29 = vmul.u32.u64.high %v1645_v5, %v1644_v4, %v5868_v56 }
 0x88e   : > { %v1859_v53 = vadd.s32 %v5778_v38, %v5786_v57  ;;  %v4167_v3 = vadd.s32 4294967294, %v1871_v59  ;;  %v5873_v36 = vmul.u32.u64.low %v1645_v5, %v1640_v2  ;;  %v5874_v23 = vmul.u32.u64.high %v1645_v5, %v1640_v2, %v5873_v36 }
 0x88f   : > { %v1969_v12 = vshll.u32 %v5866_v48, 30  ;;  %v1652_v8 = vmul.u32 %v1645_v5, %v1636_v7  ;;  %v7347_v51 = vand.u32 2147483647, %v5692_v10  ;;  %v1718_v14 = vshrl.u32 %v7343_v26, %v5727_v0 }
 0x890   : > { %vm4168_vm2 = vcmp.lt.s32.totalorder %v4167_v3, 0  ;;  %v1717_v24 = vshll.u32 %v7314_v41, %v5711_v33  ;;  %v1721_v38 = vshrl.u32 %v7344_v35, %v5727_v0  ;;  %v1724_v57 = vshrl.u32 %v7345_v17, %v5727_v0 }
 0x891   : > { %v1707_v1 = vand.u32 8388607, %v7347_v51  ;;  %v1874_v19 = vsel %vm4168_vm2, 0, %v4167_v3  ;;  %v5888_v62 = vsub.s32 %v1966_v15, %v1969_v12  ;;  %vm1654_vm3 = vc.u32 %v5869_v29, %v5873_v36 }
 0x892   : > { %v1720_v58 = vshll.u32 %v7343_v26, %v5711_v33  ;;  %v1875_v46 = vsub.s32 32, %v1874_v19  ;;  %v1879_v21 = vsub.s32 4294967266, %v1874_v19  ;;  %v1655_v54 = vadd.s32 1, %v5874_v23 }
 0x893   : > { %v1723_v61 = vshll.u32 %v7344_v35, %v5711_v33  ;;  %v1876_v47 = vshll.u32 %v5844_v44, %v1874_v19  ;;  %v1972_v13 = vsub.s32 0, %v5888_v62  ;;  %v1719_v2 = vor.u32 %v1718_v14, %v1717_v24 }
 0x894   : > { %v1722_v15 = vor.u32 %v1721_v38, %v1720_v58  ;;  %v1877_v4 = vshrl.u32 %v1859_v53, %v1875_v46  ;;  %v1880_v52 = vadd.s32 127, %v1879_v21  ;;  %v1656_v5 = vsel %vm1654_vm3, %v1655_v54, %v5874_v23 }
 0x895   : > { %v1725_v59 = vor.u32 %v1724_v57, %v1723_v61  ;;  %v1745_v7 = vsel %vm1735_vm1, %v1731_v45, 1326507024  ;;  %v4170_v56 = vmin.u32 %v1972_v13, %v5888_v62  ;;  %v1657_v3 = vadd.s32 %v1656_v5, %v1652_v8 }
 0x896   : > { %v1716_v33 = vshrl.u32 %v7314_v41, %v5727_v0  ;;  %v1878_v12 = vor.u32 %v1877_v4, %v1876_v47  ;;  %v1881_v44 = vshll.u32 %v1880_v52, 23  ;;  %v1708_v51 = vor.u32 8388608, %v1707_v1 }
 0x897   : > { %vm1732_vm4 = vcmp.lt.s32.totalorder %v5724_v11, 1  ;;  %v1974_v14 = vclz %v4170_v56  ;;  %v1658_v53 = vadd.s32 536870912, %v1657_v3  ;;  %vm1733_vm5 = vcmp.lt.s32.totalorder %v5724_v11, 2 }
 0x898   : > { %vm1734_vm7 = vcmp.lt.s32.totalorder %v5724_v11, 3  ;;  %v1882_v23 = vor.u32 4788187, %v1881_v44  ;;  %v1736_v24 = vsel %vm1732_vm4, %v1716_v33, %v1719_v2  ;;  %v1740_v45 = vsel %vm1732_vm4, %v1719_v2, %v1722_v15 }
 0x899   : > { %v1742_v8 = vsel %vm1734_vm7, %v1725_v59, %v1741_v9  ;;  %v4171_v38 = vadd.s32 4294967294, %v1974_v14  ;;  %v5910_v57 = vshrl.u32 %v1658_v53, 30  ;;  %v1737_v0 = vsel %vm1735_vm1, %v1725_v59, 2102212464 }
 0x89a   : > { %v1744_v1 = vsel %vm1732_vm4, %v1722_v15, %v1725_v59  ;;  %v1883_v19 = vand.u32 2147483647, %v1882_v23  ;;  %v1885_v58 = vcvt.s32.f32 %v1878_v12  ;;  %v1746_v46 = vsel %vm1734_vm7, %v5772_v30, %v1745_v7 }
 0x89b   : > { %v1748_v21 = vshll.u32 %v1708_v51, 8  ;;  %vm4172_vm12 = vcmp.lt.s32.totalorder %v4171_v38, 0  ;;  %v1660_v54 = vshll.u32 %v5910_v57, 30  ;;  %v1743_v9 = vsel %vm1733_vm5, %v1740_v45, %v1742_v8 }
 0x89c   : > { %v1747_v61 = vsel %vm1733_vm5, %v1744_v1, %v1746_v46  ;;  %v1886_v47 = vmul.f32 %v1885_v58, %v1883_v19  ;;  %v1977_v13 = vsel %vm4172_vm12, 0, %v4171_v38  ;;  %v1738_v30 = vsel %vm1734_vm7, %v1722_v15, %v1737_v0 }
 0x89d   : > { %v5922_v2 = vmul.u32.u64.low %v1748_v21, %v1747_v61  ;;  %v5923_v4 = vmul.u32.u64.high %v1748_v21, %v1747_v61, %v5922_v2  ;;  %v1978_v52 = vsub.s32 32, %v1977_v13  ;;  %v1982_v5 = vsub.s32 4294967266, %v1977_v13 }
 0x89e   : > { %v1661_v59 = vsub.s32 %v1657_v3, %v1660_v54  ;;  %v1962_v7 = vadd.s32 %v5815_v39, %v5826_v50  ;;  %v5929_v56 = vmul.u32.u64.low %v1748_v21, %v1743_v9  ;;  %v5930_v33 = vmul.u32.u64.high %v1748_v21, %v1743_v9, %v5929_v56 }
 0x89f   : > { %v1887_v12 = vxor.u32 2147483648, %v1886_v47  ;;  %v1983_v44 = vadd.s32 127, %v1982_v5  ;;  %v1739_v53 = vsel %vm1733_vm5, %v1736_v24, %v1738_v30  ;;  %vm1805_vm13 = vcmp.lt.s32.totalorder %v5683_v18, 0 }
 0x8a0   : > { %v1663_v51 = vsub.s32 0, %v1661_v59  ;;  %v1980_v14 = vshrl.u32 %v1962_v7, %v1978_v52  ;;  %vm1757_vm6 = vc.u32 %v5923_v4, %v5929_v56  ;;  %v1979_v39 = vshll.u32 %v5888_v62, %v1977_v13 }
 0x8a1   : > { %v1984_v23 = vshll.u32 %v1983_v44, 23  ;;  %v1758_v50 = vadd.s32 1, %v5930_v33  ;;  %v1888_v15 = vsel %vm1805_vm13, %v1887_v12, %v1886_v47  ;;  %v1755_v38 = vmul.u32 %v1748_v21, %v1739_v53 }
 0x8a2   : > { %v4158_v45 = vmin.u32 %v1663_v51, %v1661_v59  ;;  %v1981_v0 = vor.u32 %v1980_v14, %v1979_v39  ;;  %v7348_v19 = vand.u32 2147483647, %v5683_v18  ;;  %v1653_v61 = vadd.s32 %v5873_v36, %v5869_v29 }
 0x8a3   : > { %v1985_v3 = vor.u32 4788187, %v1984_v23  ;;  %v1759_v11 = vsel %vm1757_vm6, %v1758_v50, %v5930_v33  ;;  %v1889_v33 = vsub.s32 4, %v5811_v43  ;;  %vm1908_vm1 = vcmp.lt.s32.totalorder %v5686_v32, 0 }
 0x8a4   : > { %v1665_v8 = vclz %v4158_v45  ;;  %v1760_v1 = vadd.s32 %v1759_v11, %v1755_v38  ;;  %vm5945_vm14 = vcmp.le.f32.partialorder %v7348_v19, 0.7853982  ;;  %v1988_v9 = vcvt.s32.f32 %v1981_v0 }
 0x8a5   : > { %v1986_v62 = vand.u32 2147483647, %v1985_v3  ;;  %v1891_v46 = vsel %vm5945_vm14, %v5683_v18, %v1888_v15  ;;  %v1890_v29 = vsel %vm1805_vm13, %v1889_v33, %v5811_v43  ;;  %v7351_v11 = vand.u32 2147483647, %v5686_v32 }
 0x8a6   : > { %v4159_v24 = vadd.s32 4294967294, %v1665_v8  ;;  %v1761_v54 = vadd.s32 536870912, %v1760_v1  ;;  %4493 = vcosq.f32 %v1891_v46  ;;  %v1892_v15 = vsel %vm5945_vm14, 0, %v1890_v29 }
 0x8a7   : > { %v1989_v2 = vmul.f32 %v1988_v9, %v1986_v62  ;;  %4495 = vsinq.f32 %v1891_v46  ;;  %vm5968_vm2 = vcmp.le.f32.partialorder %v7351_v11, 0.7853982  ;;  %v7354_v62 = vand.u32 2147483647, %v5689_v6 }
 0x8a8   : > { %vm4160_vm15 = vcmp.lt.s32.totalorder %v4159_v24, 0  ;;  %v5954_v52 = vshrl.u32 %v1761_v54, 30  ;;  %vm1599_vm4 = vcmp.lt.s32.totalorder %v5689_v6, 0  ;;  %v1683_v9 = vsub.s32 4, %v5910_v57 }
 0x8a9   : > { %v1668_v21 = vsel %vm4160_vm15, 0, %v4159_v24  ;;  %v1990_v14 = vxor.u32 2147483648, %v1989_v2  ;;  %vm5977_vm3 = vcmp.le.f32.partialorder %v7354_v62, 0.7853982  ;;  %vm1895_vm13 = vweird.f32 %v5683_v18 }
 0x8aa   : > { %v1669_v47 = vsub.s32 32, %v1668_v21  ;;  %v1673_v13 = vsub.s32 4294967266, %v1668_v21  ;;  %v1670_v5 = vshll.u32 %v1661_v59, %v1668_v21  ;;  %v1763_v12 = vshll.u32 %v5954_v52, 30 }
 0x8ab   : > { %v1991_v39 = vsel %vm1908_vm1, %v1990_v14, %v1989_v2  ;;  %vm1689_vm14 = vweird.f32 %v5689_v6  ;;  %v7357_v62 = vand.u32 2147483647, %v5692_v10  ;;  %v1786_v43 = vsub.s32 4, %v5954_v52 }
 0x8ac   : > { %v1671_v30 = vshrl.u32 %v1653_v61, %v1669_v47  ;;  %v1674_v7 = vadd.s32 127, %v1673_v13  ;;  %v1764_v53 = vsub.s32 %v1760_v1, %v1763_v12  ;;  %v1896_v1 = vand.u32 3, %v1892_v15 }
 0x8ad   : > { %v1994_v19 = vsel %vm5968_vm2, %v5686_v32, %v1991_v39  ;;  %v1756_v13 = vadd.s32 %v5929_v56, %v5923_v4 }
 0x8ae   : > { %v1672_v44 = vor.u32 %v1671_v30, %v1670_v5  ;;  %v1675_v51 = vshll.u32 %v1674_v7, 23  ;;  %v1766_v36 = vsub.s32 0, %v1764_v53  ;;  %4497 = vcosq.f32 %v1994_v19 }
 0x8af   : > { %vm1898_vm7 = vcmp.eq.s32.totalorder %v1896_v1, 0  ;;  %vm1901_vm12 = vcmp.eq.s32.totalorder %v1896_v1, 2  ;;  %v1684_v7 = vsel %vm1599_vm4, %v1683_v9, %v5910_v57  ;;  %vm1897_vm6 = vcmp.lt.s32.totalorder %v1896_v1, 2  ;;  %v5997_v57 = vpop.permute.xlu1 %2014 }
 0x8b0   : > { %v1676_v23 = vor.u32 4788187, %v1675_v51  ;;  %v1679_v59 = vcvt.s32.f32 %v1672_v44  ;;  %v4162_v50 = vmin.u32 %v1766_v36, %v1764_v53  ;;  %v4494_v3 = vpop.eup %4493  ;;  %v1686_v4 = vsel %vm5977_vm3, 0, %v1684_v7 }
 0x8b1   : > { %v4496_v38 = vpop.eup %4495  ;;  %v1902_v61 = vxor.u32 2147483648, %v4494_v3 }
 0x8b2   : > { %v1677_v45 = vand.u32 2147483647, %v1676_v23  ;;  %v1768_v0 = vclz %v4162_v50  ;;  %v1899_v21 = vxor.u32 2147483648, %v4496_v38  ;;  %v1992_v23 = vsub.s32 4, %v5866_v48 }
 0x8b3   : > { %v1903_v12 = vsel %vm1901_vm12, %v1902_v61, %v4496_v38  ;;  %v2019_v61 = vpop.permute.xlu1 %2018 }
 0x8b4   : > { %v1680_v8 = vmul.f32 %v1679_v59, %v1677_v45  ;;  %v4163_v46 = vadd.s32 4294967294, %v1768_v0  ;;  %v1900_v33 = vsel %vm1898_vm7, %v4494_v3, %v1899_v21  ;;  %v1690_v59 = vand.u32 3, %v1686_v4 }
 0x8b5   : > { %v1904_v36 = vsel %vm1897_vm6, %v1900_v33, %v1903_v12  ;;  %vm1998_vm6 = vweird.f32 %v5686_v32 }
 0x8b6   : > { %v1681_v24 = vxor.u32 2147483648, %v1680_v8  ;;  %vm4164_vm5 = vcmp.lt.s32.totalorder %v4163_v46, 0  ;;  %v1905_v39 = vsel %vm1895_vm13, nan, %v1904_v36  ;;  %vm1695_vm15 = vcmp.eq.s32.totalorder %v1690_v59, 2 }
 0x8b7   : > { %v1771_v2 = vsel %vm4164_vm5, 0, %v4163_v46  ;;  %vm1692_vm5 = vcmp.eq.s32.totalorder %v1690_v59, 0 }
 0x8b8   : > { %v1682_v54 = vsel %vm1599_vm4, %v1681_v24, %v1680_v8  ;;  %v1772_v5 = vsub.s32 32, %v1771_v2  ;;  %v1776_v30 = vsub.s32 4294967266, %v1771_v2  ;;  %v1773_v44 = vshll.u32 %v1764_v53, %v1771_v2  ;;  %v4498_v50 = vpop.eup %4497 }
 0x8b9   : > { %v1685_v47 = vsel %vm5977_vm3, %v5689_v6, %v1682_v54  ;;  %v1993_v53 = vsel %vm1908_vm1, %v1992_v23, %v5866_v48  ;;  %v2011_v24 = vsub.f32 1.0, %v1905_v39  ;;  %vm6007_vm3 = vcmp.le.f32.partialorder %v7357_v62, 0.7853982 }
 0x8ba   : > { %4499 = vcosq.f32 %v1685_v47  ;;  %v1774_v51 = vshrl.u32 %v1756_v13, %v1772_v5  ;;  %v1777_v14 = vadd.s32 127, %v1776_v30  ;;  %v1995_v18 = vsel %vm5968_vm2, 0, %v1993_v53 }
 0x8bb   : > { %4501 = vsinq.f32 %v1685_v47  ;;  %vm1702_vm1 = vcmp.lt.s32.totalorder %v5692_v10, 0  ;;  %vm1691_vm4 = vcmp.lt.s32.totalorder %v1690_v59, 2  ;;  %v1999_v9 = vand.u32 3, %v1995_v18 }
 0x8bc   : > { %4503 = vsinq.f32 %v1994_v19  ;;  %v1775_v56 = vor.u32 %v1774_v51, %v1773_v44  ;;  %v1778_v29 = vshll.u32 %v1777_v14, 23  ;;  %v2005_v21 = vxor.u32 2147483648, %v4498_v50 }
 0x8bd   : > { %v2023_v5 = vmul.f32 %v2019_v61, %v2011_v24  ;;  %v1787_v12 = vsel %vm1702_vm1, %v1786_v43, %v5954_v52  ;;  %vm2001_vm2 = vcmp.eq.s32.totalorder %v1999_v9, 0  ;;  %vm2004_vm7 = vcmp.eq.s32.totalorder %v1999_v9, 2 }
 0x8be   : > { %v1779_v45 = vor.u32 4788187, %v1778_v29  ;;  %v1782_v3 = vcvt.s32.f32 %v1775_v56  ;;  %vm2000_vm12 = vcmp.lt.s32.totalorder %v1999_v9, 2  ;;  %v1789_v4 = vsel %vm6007_vm3, 0, %v1787_v12 }
 0x8bf   : > { %v2027_v6 = vadd.f32 %v2023_v5, %v5674_v27  ;;  %v1793_v52 = vand.u32 3, %v1789_v4 }
 0x8c0   : > { %v1780_v15 = vand.u32 2147483647, %v1779_v45 }
 0x8c1   : > { %vm1798_vm13 = vcmp.eq.s32.totalorder %v1793_v52, 2 }
 0x8c2   : > { %v1783_v11 = vmul.f32 %v1782_v3, %v1780_v15 }
 0x8c4   : > { %v4500_v8 = vpop.eup %4499  ;;  %v1784_v46 = vxor.u32 2147483648, %v1783_v11 }
 0x8c5   : > { %v4502_v38 = vpop.eup %4501  ;;  %v1696_v0 = vxor.u32 2147483648, %v4500_v8 }
 0x8c6   : > { %v4504_v1 = vpop.eup %4503  ;;  %v1693_v19 = vxor.u32 2147483648, %v4502_v38  ;;  %v1785_v13 = vsel %vm1702_vm1, %v1784_v46, %v1783_v11  ;;  %vm2042_vm1 = vcmask 1022976  }
 0x8c7   : > { %v1697_v58 = vsel %vm1695_vm15, %v1696_v0, %v4502_v38  ;;  %v2002_v2 = vxor.u32 2147483648, %v4504_v1  ;;  %v1788_v7 = vsel %vm6007_vm3, %v5692_v10, %v1785_v13  ;;  %v2006_v14 = vsel %vm2004_vm7, %v2005_v21, %v4504_v1 }
 0x8c8   : > { %v1694_v54 = vsel %vm1692_vm5, %v4500_v8, %v1693_v19  ;;  %4505 = vcosq.f32 %v1788_v7  ;;  %vm1794_vm15 = vcmp.lt.s32.totalorder %v1793_v52, 2  ;;  %vm1792_vm3 = vweird.f32 %v5692_v10  ;;  %v4579_v8 = vld [vmem:[#allocation2] sm:$0xff] }
 0x8c9   : > { %v1698_v47 = vsel %vm1691_vm4, %v1694_v54, %v1697_v58  ;;  %4507 = vsinq.f32 %v1788_v7  ;;  %v2003_v51 = vsel %vm2001_vm2, %v4498_v50, %v2002_v2  ;;  %vm2048_vm4 = vcmask 998400   ;;  %v4445_v7 = vld [vmem:[%s7284_s2 + $0x8] sm:$0xff]  }
 0x8ca   : > { %v1699_v30 = vsel %vm1689_vm14, nan, %v1698_v47  ;;  %v2007_v56 = vsel %vm2000_vm12, %v2003_v51, %v2006_v14  ;;  %vm1795_vm14 = vcmp.eq.s32.totalorder %v1793_v52, 0  ;;  %vm2085_vm5 = vcmask 23552  }
 0x8cb   : > { %v2009_v33 = vsub.f32 1.0, %v1699_v30  ;;  %v2008_v36 = vsel %vm1998_vm6, nan, %v2007_v56 }
 0x8cc   : > { %v2012_v53 = vsub.f32 1.0, %v2008_v36 }
 0x8cd   : > { %v2021_v44 = vmul.f32 %v5997_v57, %v2009_v33 }
 0x8ce   : > { %v2024_v32 = vmul.f32 %v2019_v61, %v2012_v53 }
 0x8cf   : > { %v2025_v23 = vadd.f32 %v2021_v44, %v5678_v25 }
 0x8d0   : > { %v2028_v11 = vadd.f32 %v2024_v32, %v5676_v34 }
 0x8d1   : > { %v2029_v29 = vpack.c.bf16 %v2027_v6, %v2025_v23 }
 0x8d2   : > { %v4506_v45 = vpop.eup %4505 }
 0x8d3   : > { %2038 = vrot.lane.b32.xlu1 %v2029_v29, %s4670_s30  ;;  %v4508_v59 = vpop.eup %4507  ;;  %v1799_v39 = vxor.u32 2147483648, %v4506_v45 }
 0x8d4   : > { %v1796_v50 = vxor.u32 2147483648, %v4508_v59 }
 0x8d5   : > { %v1800_v27 = vsel %vm1798_vm13, %v1799_v39, %v4508_v59 }
 0x8d6   : > { %v1797_v25 = vsel %vm1795_vm14, %v4506_v45, %v1796_v50 }
 0x8d7   : > { %2044 = vrot.lane.b32.xlu1 %v2029_v29, %s4671_s6  ;;  %v1801_v15 = vsel %vm1794_vm15, %v1797_v25, %v1800_v27 }
 0x8d8   : > { %v1802_v3 = vsel %vm1792_vm3, nan, %v1801_v15 }
 0x8d9   : > { %v2010_v38 = vsub.f32 1.0, %v1802_v3 }
 0x8db   : > { %2067 = vrot.lane.b32.xlu1 %v4579_v8, %s4672_s7  ;;  %v2022_v0 = vmul.f32 %v5997_v57, %v2010_v38 }
 0x8dd   : > { %v2026_v18 = vadd.f32 %v2022_v0, %v5680_v49 }
 0x8df   : > { %2069 = vrot.lane.b32.xlu1 %v2029_v29, %s4672_s7  ;;  %v2030_v24 = vpack.c.bf16 %v2028_v11, %v2026_v18 }
 0x8e1   : > { %2032 = vst.msk [vmem:[#allocation2 + $0x10] sm:$0xff] %vm262_vm0, %v2030_v24 }
 0x8e8   : > { %v2035_v10 = vld [vmem:[#allocation2 + $0x10] sm:$0xff] }
 0x8e9   : > { %2040 = vrot.lane.b32.xlu0 %v2035_v10, %s4670_s30 }
 0x8ed   : > { %2046 = vrot.lane.b32.xlu0 %v2035_v10, %s4671_s6 }
 0x8f1   : > { %2071 = vrot.lane.b32.xlu0 %v2035_v10, %s4672_s7 }
 0x945   : > { %v2039_v1 = vpop.permute.xlu1 %2038 }
 0x946   : > { %2073 = vrot.lane.b32.xlu0 %v2039_v1, %s4672_s7 }
 0x949   : > { %v2045_v19 = vpop.permute.xlu1 %2044 }
 0x94d   : > { %v2068_v49 = vpop.permute.xlu1 %2067 }
 0x951   : > { %v2070_v46 = vpop.permute.xlu1 %2069 }
 0x952   : > { %v2086_v43 = vsel %vm2085_vm5, %v2068_v49, %v2070_v46 }
 0x95b   : > { %v2041_v57 = vpop.permute.xlu0 %2040 }
 0x95c   : > { %2077 = vrot.lane.b32.xlu1 %v2041_v57, %s4672_s7  ;;  %v2043_v34 = vsel %vm2042_vm1, %v2039_v1, %v2041_v57 }
 0x95d   : > { %2075 = vrot.lane.b32.xlu0 %v2043_v34, %s4672_s7 }
 0x95f   : > { %v2047_v62 = vpop.permute.xlu0 %2046 }
 0x960   : > { %v2049_v48 = vsel %vm2048_vm4, %v2045_v19, %v2047_v62 }
 0x961   : > { %2081 = vrot.lane.b32.xlu1 %v2049_v48, %s4672_s7  ;;  %2083 = vrot.lane.b32.xlu0 %v2047_v62, %s4672_s7 }
 0x963   : > { %v2072_v58 = vpop.permute.xlu0 %2071 }
 0x964   : > { %v2087_v54 = vsel %vm2085_vm5, %v2070_v46, %v2072_v58 }
 0x965   : > { %2079 = vrot.lane.b32.xlu1 %v2045_v19, %s4672_s7  ;;  %2054 = vperm.xlu0 %4417, %v5648_v22   ;;  %s4243_s7 = sshll.u32 %s4730_s22, 9 }
 0x966   : > { %2101 = vmatprep.subr.bf16.mxu0 %v2087_v54 }
 0x967   : > { %2102 = vmatpush1.bf16.msra.mxu0 %v2086_v43 }
 0x969   : > { %2058 = vperm.xlu1 %4422, %v5662_v20   ;;  %4424 = vset.pattern.permute.xlu0 %v7331_v40 }
 0x96d   : > { %4423 = vset.pattern.permute.xlu1 %v7331_v40 }
 0x9b8   : > { %v2074_v9 = vpop.permute.xlu0 %2073 }
 0x9ce   : > { %v2078_v21 = vpop.permute.xlu1 %2077 }
 0x9cf   : > { %v2076_v61 = vpop.permute.xlu0 %2075 }
 0x9d0   : > { %v2088_v47 = vsel %vm2085_vm5, %v2074_v9, %v2076_v61  ;;  %v2089_v13 = vsel %vm2085_vm5, %v2076_v61, %v2078_v21  ;;  %v4580_v9 = vld [vmem:[%s4795_s13 + $0x10] sm:$0xff]  ;;  %v4581_v21 = vld [vmem:[%s4795_s13 + $0x18] sm:$0xff]  ;;  %v7360_v61 = vmov 4  }
 0x9d1   : > { %2103 = vmatprep.subr.bf16.mxu0 %v2089_v13 }
 0x9d2   : > { %2104 = vmatpush1.bf16.msra.mxu0 %v2088_v47  ;;  %v6091_v47 = vld [vmem:[%s7286_s4 + $0x10] sm:$0xff] }
 0x9d3   : > { %v2082_v22 = vpop.permute.xlu1 %2081  ;;  %v2084_v2 = vpop.permute.xlu0 %2083 }
 0x9d4   : > { %v2091_v5 = vsel %vm2085_vm5, %v2082_v22, %v2084_v2 }
 0x9d5   : > { %2105 = vmatprep.subr.bf16.mxu0 %v2091_v5 }
 0x9d7   : > { %v2080_v30 = vpop.permute.xlu1 %2079 }
 0x9d8   : > { %v2090_v20 = vsel %vm2085_vm5, %v2080_v30, %v2082_v22 }
 0x9d9   : > { %2106 = vmatpush1.bf16.msra.mxu0 %v2090_v20 }
 0x9dc   : > { %4176 = vmatmul.mubr.msk.bf16.vlgmr.msra.gmra.mrb[4].mxu0 %vm845_vm11, %v4445_v7 }
 0x9dd   : > { %3386 = vmatprep.mubr.bf16.mxu0 %v4579_v8 }
 0x9e4   : > { %v2055_v33 = vpop.permute.xlu0 %2054 }
 0x9e8   : > { %v2059_v51 = vpop.permute.xlu1 %2058 }
 0xaaf   : > { %v2135_v12 = vpop.f32.mrb[4].mxu0 }
 0xab0   : > { %v2137_v44 = vpop.f32.mrb[5].mxu0  ;;  %v6059_v23 = vadd.f32 %v2135_v12, %v2055_v33 }
 0xab1   : > { %v6057_v14 = vadd.f32 %v2137_v44, %v2055_v33  ;;  %v2139_v6 = vpop.f32.mrb[6].mxu0 }
 0xab2   : > { %v2141_v4 = vpop.f32.mrb[7].mxu0  ;;  %v6067_v36 = vadd.f32 %v2139_v6, %v2059_v51  ;;  %v2152_v27 = vmul.f32 %v6059_v23, %v6059_v23 }
 0xab3   : > { %v6061_v56 = vadd.f32 %v2141_v4, %v2059_v51  ;;  %v2144_v29 = vsel %vm262_vm0, %v6057_v14, 0.0  ;;  %v2153_v52 = vmul.f32 %v6057_v14, %v6057_v14 }
 0xab4   : > { %v2145_v45 = vadd.f32 %v2144_v29, %v6059_v23  ;;  %v2154_v32 = vmul.f32 %v6067_v36, %v6067_v36 }
 0xab5   : > { %v2148_v59 = vsel %vm262_vm0, %v6061_v56, 0.0  ;;  %v2156_v39 = vsel %vm262_vm0, %v2153_v52, 0.0  ;;  %v2155_v53 = vmul.f32 %v6061_v56, %v6061_v56 }
 0xab6   : > { %2146 = vadd.xlane.f32.xlu0 %v2145_v45  ;;  %v2149_v50 = vadd.f32 %v2148_v59, %v6067_v36  ;;  %v2157_v25 = vadd.f32 %v2156_v39, %v2152_v27 }
 0xab7   : > { %v2160_v15 = vsel %vm262_vm0, %v2155_v53, 0.0 }
 0xab8   : > { %2150 = vadd.xlane.f32.xlu1 %v2149_v50  ;;  %v2161_v3 = vadd.f32 %v2160_v15, %v2154_v32 }
 0xaba   : > { %2158 = vadd.xlane.f32.xlu0 %v2157_v25 }
 0xabe   : > { %2162 = vadd.xlane.f32.xlu0 %v2161_v3 }
 0xb43   : > { %v2147_v8 = vpop.xlane.xlu0 %2146 }
 0xb44   : > { %v2164_v38 = vmul.f32 0.005, %v2147_v8 }
 0xb45   : > { %v2151_v0 = vpop.xlane.xlu1 %2150 }
 0xb46   : > { %v2165_v18 = vmul.f32 0.005, %v2151_v0  ;;  %v2168_v24 = vmul.f32 %v2164_v38, %v2164_v38  ;;  %v2178_v2 = vsub.f32 %v6059_v23, %v2164_v38  ;;  %v2179_v5 = vsub.f32 %v6057_v14, %v2164_v38 }
 0xb47   : > { %v2159_v11 = vpop.xlane.xlu0 %2158 }
 0xb48   : > { %v2166_v10 = vmul.f32 0.005, %v2159_v11  ;;  %v2169_v49 = vmul.f32 %v2165_v18, %v2165_v18  ;;  %v2180_v12 = vsub.f32 %v6067_v36, %v2165_v18  ;;  %v2181_v6 = vsub.f32 %v6061_v56, %v2165_v18 }
 0xb4a   : > { %v2170_v1 = vsub.f32 %v2166_v10, %v2168_v24 }
 0xb4b   : > { %v2163_v19 = vpop.xlane.xlu0 %2162 }
 0xb4c   : > { %v2172_v57 = vadd.f32 1e-05, %v2170_v1  ;;  %v2167_v34 = vmul.f32 0.005, %v2163_v19 }
 0xb4e   : > { %4509 = vrsqrt.f32 %v2172_v57  ;;  %v2171_v62 = vsub.f32 %v2167_v34, %v2169_v49 }
 0xb50   : > { %v2173_v48 = vadd.f32 1e-05, %v2171_v62 }
 0xb52   : > { %4511 = vrsqrt.f32 %v2173_v48 }
 0xb58   : > { %v4510_v58 = vpop.eup %4509 }
 0xb59   : > { %v2176_v46 = vmul.f32 %v4510_v58, %v5655_v42  ;;  %v7361_v42 = vmov 5  }
 0xb5b   : > { %2184 = vperm.xlu1 %4423, %v2176_v46  }
 0xb5c   : > { %v4512_v54 = vpop.eup %4511 }
 0xb5d   : > { %v2177_v43 = vmul.f32 %v4512_v54, %v5653_v16  ;;  %v6097_v16 = vld [vmem:[%s7286_s4 + $0x18] sm:$0xff] }
 0xb5f   : > { %4425 = vset.pattern.permute.xlu1 %v7332_v60  ;;  %2189 = vperm.xlu0 %4424, %v2177_v43  }
 0xb60   : > { %2197 = vperm.xlu1 %4425, %v4580_v9  }
 0xb63   : > { %4429 = vset.pattern.permute.xlu0 %v7333_v55 }
 0xb64   : > { %2201 = vperm.xlu1 %4425, %v4581_v21  }
 0xb68   : > { %4426 = vset.pattern.permute.xlu1 %v7360_v61 }
 0xb69   : > { %2209 = vperm.xlu1 %4426, %v6091_v47  }
 0xb6d   : > { %2213 = vperm.xlu1 %4426, %v6097_v16  }
 0xb71   : > { %4427 = vset.pattern.permute.xlu1 %v7361_v42 }
 0xb72   : > { %2637 = vperm.xlu1 %4427, %v6091_v47  }
 0xb76   : > { %2641 = vperm.xlu1 %4427, %v6097_v16  }
 0xb7a   : > { %4428 = vset.pattern.permute.xlu1 %v7333_v55 }
 0xbda   : > { %v2185_v13 = vpop.permute.xlu1 %2184 }
 0xbdb   : > { %v2192_v20 = vmul.f32 %v2185_v13, %v2178_v2  ;;  %v2193_v7 = vmul.f32 %v2185_v13, %v2179_v5 }
 0xbde   : > { %v2190_v33 = vpop.permute.xlu0 %2189 }
 0xbdf   : > { %v2198_v22 = vpop.permute.xlu1 %2197  ;;  %v2194_v29 = vmul.f32 %v2190_v33, %v2180_v12  ;;  %v2195_v14 = vmul.f32 %v2190_v33, %v2181_v6  ;;  %v7362_v6 = vmov 920167782  }
 0xbe0   : > { %v6107_v44 = vadd.f32 %v2198_v22, %v2192_v20  ;;  %v6109_v51 = vadd.f32 %v2198_v22, %v2193_v7 }
 0xbe3   : > { %v2202_v30 = vpop.permute.xlu1 %2201 }
 0xbe4   : > { %v6118_v45 = vadd.f32 %v2202_v30, %v2194_v29  ;;  %v6123_v53 = vadd.f32 %v2202_v30, %v2195_v14 }
 0xbe8   : > { %v2210_v4 = vpop.permute.xlu1 %2209 }
 0xbe9   : > { %v6113_v52 = vmul.f32 %v2210_v4, %v6107_v44  ;;  %v6116_v23 = vmul.f32 %v2210_v4, %v6109_v51 }
 0xbeb   : > { %v2220_v59 = vand.u32 2147483647, %v6113_v52  ;;  %v2223_v36 = vand.u32 2139095040, %v6113_v52  ;;  %v7316_v39 = vand.u32 2147483647, %v6116_v23  ;;  %v2326_v56 = vand.u32 2139095040, %v6116_v23 }
 0xbec   : > { %v2214_v50 = vpop.permute.xlu1 %2213 }
 0xbed   : > { %v2224_v27 = vshrl.u32 %v2223_v36, 23  ;;  %v2227_v25 = vand.u32 8388607, %v2220_v59  ;;  %v2330_v15 = vand.u32 8388607, %v7316_v39  ;;  %v6131_v32 = vmul.f32 %v2214_v50, %v6118_v45 }
 0xbee   : > { %v2327_v3 = vshrl.u32 %v2326_v56, 23  ;;  %v6134_v8 = vmul.f32 %v2214_v50, %v6123_v53 }
 0xbef   : > { %v4177_v38 = vadd.s32 4294967169, %v2224_v27  ;;  %v2426_v0 = vand.u32 2147483647, %v6131_v32  ;;  %v2228_v11 = vor.u32 8388608, %v2227_v25  ;;  %v2429_v24 = vand.u32 2139095040, %v6131_v32 }
 0xbf0   : > { %v4181_v18 = vadd.s32 4294967169, %v2327_v3  ;;  %v2331_v1 = vor.u32 8388608, %v2330_v15  ;;  %v2532_v49 = vand.u32 2139095040, %v6134_v8  ;;  %v7363_v27 = vmov 1326507024  }
 0xbf1   : > { %v2230_v10 = vadd.s32 1, %v4177_v38  ;;  %v2430_v57 = vshrl.u32 %v2429_v24, 23  ;;  %v6140_v34 = vand.u32 8388607, %v2426_v0  ;;  %v6143_v48 = vshll.u32 %v2228_v11, 8 }
 0xbf2   : > { %v2333_v19 = vadd.s32 1, %v4181_v18  ;;  %v6145_v9 = vshll.u32 %v2331_v1, 8  ;;  %v6150_v2 = vshrl.u32 %v2532_v49, 23 }
 0xbf3   : > { %vm2231_vm2 = vcmp.gt.s32.totalorder %v2230_v10, 0  ;;  %v4185_v58 = vadd.s32 4294967169, %v2430_v57  ;;  %v2434_v22 = vor.u32 8388608, %v6140_v34 }
 0xbf4   : > { %v2232_v62 = vsel %vm2231_vm2, %v2230_v10, 0  ;;  %vm2334_vm7 = vcmp.gt.s32.totalorder %v2333_v19, 0 }
 0xbf5   : > { %v2233_v46 = vshrl.u32 %v2232_v62, 5  ;;  %v2234_v54 = vand.u32 31, %v2232_v62  ;;  %v2335_v43 = vsel %vm2334_vm7, %v2333_v19, 0  ;;  %v6154_v7 = vadd.s32 1, %v4185_v58 }
 0xbf6   : > { %v6147_v21 = vshrl.u32 %v2335_v43, 5  ;;  %v2337_v13 = vand.u32 31, %v2335_v43 }
 0xbf7   : > { %v2235_v5 = vsub.s32 32, %v2234_v54  ;;  %v2237_v30 = vshll.u32 %v7314_v41, %v2234_v54  ;;  %v2240_v20 = vshll.u32 %v7343_v26, %v2234_v54  ;;  %v2243_v33 = vshll.u32 %v7344_v35, %v2234_v54 }
 0xbf8   : > { %v2246_v12 = vshll.u32 %v7345_v17, %v2234_v54  ;;  %v2249_v4 = vshll.u32 %v7362_v6, %v2234_v54  ;;  %vm2252_vm12 = vcmp.lt.s32.totalorder %v2233_v46, 1  ;;  %vm2253_vm6 = vcmp.lt.s32.totalorder %v2233_v46, 2 }
 0xbf9   : > { %v2238_v29 = vshrl.u32 %v7343_v26, %v2235_v5  ;;  %v2241_v14 = vshrl.u32 %v7344_v35, %v2235_v5  ;;  %v2244_v36 = vshrl.u32 %v7345_v17, %v2235_v5  ;;  %v2236_v56 = vshrl.u32 %v7314_v41, %v2235_v5 }
 0xbfa   : > { %v2247_v50 = vshrl.u32 %v7362_v6, %v2235_v5  ;;  %v2250_v25 = vshrl.u32 %v7363_v27, %v2235_v5  ;;  %vm2254_vm13 = vcmp.lt.s32.totalorder %v2233_v46, 3  ;;  %v2338_v11 = vsub.s32 32, %v2337_v13 }
 0xbfb   : > { %v2239_v15 = vor.u32 %v2238_v29, %v2237_v30  ;;  %v2242_v3 = vor.u32 %v2241_v14, %v2240_v20  ;;  %v2245_v38 = vor.u32 %v2244_v36, %v2243_v33  ;;  %vm2255_vm14 = vcmp.lt.s32.totalorder %v2233_v46, 4 }
 0xbfc   : > { %v2248_v18 = vor.u32 %v2247_v50, %v2246_v12  ;;  %v2251_v24 = vor.u32 %v2250_v25, %v2249_v4  ;;  %v2340_v10 = vshll.u32 %v7314_v41, %v2337_v13  ;;  %v2343_v43 = vshll.u32 %v7343_v26, %v2337_v13 }
 0xbfd   : > { %v2256_v1 = vsel %vm2252_vm12, %v2236_v56, %v2239_v15  ;;  %v2257_v19 = vsel %vm2255_vm14, %v2245_v38, 2102212464  ;;  %v2260_v57 = vsel %vm2252_vm12, %v2239_v15, %v2242_v3  ;;  %v2264_v49 = vsel %vm2252_vm12, %v2242_v3, %v2245_v38 }
 0xbfe   : > { %v2258_v62 = vsel %vm2254_vm13, %v2242_v3, %v2257_v19  ;;  %v2261_v58 = vsel %vm2255_vm14, %v2248_v18, 920167782  ;;  %v2265_v54 = vsel %vm2255_vm14, %v2251_v24, 1326507024  ;;  %v2339_v20 = vshrl.u32 %v7314_v41, %v2338_v11 }
 0xbff   : > { %v2262_v5 = vsel %vm2254_vm13, %v2245_v38, %v2261_v58  ;;  %v2266_v30 = vsel %vm2254_vm13, %v2248_v18, %v2265_v54  ;;  %v2341_v33 = vshrl.u32 %v7343_v26, %v2338_v11  ;;  %v2259_v12 = vsel %vm2253_vm6, %v2256_v1, %v2258_v62 }
 0xc00   : > { %v2263_v4 = vsel %vm2253_vm6, %v2260_v57, %v2262_v5  ;;  %v2267_v29 = vsel %vm2253_vm6, %v2264_v49, %v2266_v30  ;;  %v2344_v14 = vshrl.u32 %v7344_v35, %v2338_v11  ;;  %v2346_v38 = vshll.u32 %v7344_v35, %v2337_v13 }
 0xc01   : > { %v6180_v36 = vmul.u32.u64.low %v6143_v48, %v2267_v29  ;;  %v6181_v56 = vmul.u32.u64.high %v6143_v48, %v2267_v29, %v6180_v36  ;;  %v6184_v50 = vmul.u32.u64.low %v6143_v48, %v2263_v4  ;;  %v6185_v25 = vmul.u32.u64.high %v6143_v48, %v2263_v4, %v6184_v50 }
 0xc02   : > { %v2342_v15 = vor.u32 %v2341_v33, %v2340_v10  ;;  %v2345_v3 = vor.u32 %v2344_v14, %v2343_v43  ;;  %v2347_v18 = vshrl.u32 %v7345_v17, %v2338_v11  ;;  %v2275_v46 = vmul.u32 %v6143_v48, %v2259_v12 }
 0xc03   : > { %v2349_v24 = vshll.u32 %v7345_v17, %v2337_v13  ;;  %v2350_v1 = vshrl.u32 %v7362_v6, %v2338_v11  ;;  %v2353_v19 = vshrl.u32 %v7363_v27, %v2338_v11  ;;  %v2352_v49 = vshll.u32 %v7362_v6, %v2337_v13 }
 0xc04   : > { %v2348_v57 = vor.u32 %v2347_v18, %v2346_v38  ;;  %vm2355_vm15 = vcmp.lt.s32.totalorder %v6147_v21, 1  ;;  %vm2356_vm3 = vcmp.lt.s32.totalorder %v6147_v21, 2  ;;  %vm2277_vm1 = vc.u32 %v6181_v56, %v6184_v50 }
 0xc05   : > { %v2278_v10 = vadd.s32 1, %v6185_v25  ;;  %v2351_v62 = vor.u32 %v2350_v1, %v2349_v24  ;;  %vm2357_vm4 = vcmp.lt.s32.totalorder %v6147_v21, 3  ;;  %v2354_v48 = vor.u32 %v2353_v19, %v2352_v49 }
 0xc06   : > { %vm2358_vm5 = vcmp.lt.s32.totalorder %v6147_v21, 4  ;;  %v2359_v58 = vsel %vm2355_vm15, %v2339_v20, %v2342_v15  ;;  %v2363_v11 = vsel %vm2355_vm15, %v2342_v15, %v2345_v3  ;;  %v2367_v5 = vsel %vm2355_vm15, %v2345_v3, %v2348_v57 }
 0xc07   : > { %v2279_v54 = vsel %vm2277_vm1, %v2278_v10, %v6185_v25  ;;  %v2360_v13 = vsel %vm2358_vm5, %v2348_v57, 2102212464  ;;  %v2364_v43 = vsel %vm2358_vm5, %v2351_v62, 920167782  ;;  %v2368_v4 = vsel %vm2358_vm5, %v2354_v48, 1326507024 }
 0xc08   : > { %v2280_v30 = vadd.s32 %v2279_v54, %v2275_v46  ;;  %v2361_v33 = vsel %vm2357_vm4, %v2345_v3, %v2360_v13  ;;  %v2365_v12 = vsel %vm2357_vm4, %v2348_v57, %v2364_v43  ;;  %v2369_v36 = vsel %vm2357_vm4, %v2351_v62, %v2368_v4 }
 0xc09   : > { %v2362_v29 = vsel %vm2356_vm3, %v2359_v58, %v2361_v33  ;;  %v2366_v14 = vsel %vm2356_vm3, %v2363_v11, %v2365_v12  ;;  %vm2437_vm2 = vcmp.gt.s32.totalorder %v6154_v7, 0  ;;  %v2370_v25 = vsel %vm2356_vm3, %v2367_v5, %v2369_v36 }
 0xc0a   : > { %v2281_v20 = vadd.s32 536870912, %v2280_v30  ;;  %v6211_v15 = vmul.u32.u64.low %v6145_v9, %v2366_v14  ;;  %v6212_v38 = vmul.u32.u64.high %v6145_v9, %v2366_v14, %v6211_v15  ;;  %v2438_v46 = vsel %vm2437_vm2, %v6154_v7, 0 }
 0xc0b   : > { %v6216_v3 = vmul.u32.u64.low %v6145_v9, %v2370_v25  ;;  %v6217_v18 = vmul.u32.u64.high %v6145_v9, %v2370_v25, %v6216_v3  ;;  %v4189_v24 = vadd.s32 4294967169, %v6150_v2  ;;  %v2440_v19 = vand.u32 31, %v2438_v46 }
 0xc0c   : > { %v6221_v1 = vshrl.u32 %v2281_v20, 30  ;;  %v2378_v57 = vmul.u32 %v6145_v9, %v2362_v29  ;;  %v6226_v21 = vshll.u32 %v2434_v22, 8  ;;  %v2381_v10 = vadd.s32 1, %v6212_v38 }
 0xc0d   : > { %v2439_v62 = vshrl.u32 %v2438_v46, 5  ;;  %v2441_v48 = vsub.s32 32, %v2440_v19  ;;  %vm2380_vm7 = vc.u32 %v6217_v18, %v6211_v15  ;;  %v2443_v2 = vshll.u32 %v7314_v41, %v2440_v19 }
 0xc0e   : > { %v2283_v49 = vshll.u32 %v6221_v1, 30  ;;  %v2446_v7 = vshll.u32 %v7343_v26, %v2440_v19  ;;  %v2539_v58 = vadd.s32 1, %v4189_v24  ;;  %v2382_v34 = vsel %vm2380_vm7, %v2381_v10, %v6212_v38 }
 0xc0f   : > { %v2444_v9 = vshrl.u32 %v7343_v26, %v2441_v48  ;;  %v2449_v22 = vshll.u32 %v7344_v35, %v2440_v19  ;;  %v2383_v54 = vadd.s32 %v2382_v34, %v2378_v57  ;;  %v2447_v13 = vshrl.u32 %v7344_v35, %v2441_v48 }
 0xc10   : > { %v6234_v11 = vsub.s32 %v2280_v30, %v2283_v49  ;;  %v2450_v43 = vshrl.u32 %v7345_v17, %v2441_v48  ;;  %v2452_v5 = vshll.u32 %v7345_v17, %v2440_v19  ;;  %v2453_v4 = vshrl.u32 %v7362_v6, %v2441_v48 }
 0xc11   : > { %v2445_v12 = vor.u32 %v2444_v9, %v2443_v2  ;;  %v2455_v30 = vshll.u32 %v7362_v6, %v2440_v19  ;;  %v2384_v29 = vadd.s32 536870912, %v2383_v54  ;;  %v2448_v14 = vor.u32 %v2447_v13, %v2446_v7 }
 0xc12   : > { %v2286_v33 = vsub.s32 0, %v6234_v11  ;;  %v2451_v36 = vor.u32 %v2450_v43, %v2449_v22  ;;  %v2456_v20 = vshrl.u32 %v7363_v27, %v2441_v48  ;;  %v2442_v38 = vshrl.u32 %v7314_v41, %v2441_v48 }
 0xc13   : > { %v2454_v3 = vor.u32 %v2453_v4, %v2452_v5  ;;  %vm2458_vm12 = vcmp.lt.s32.totalorder %v2439_v62, 1  ;;  %v6248_v46 = vshrl.u32 %v2384_v29, 30  ;;  %vm2460_vm6 = vcmp.lt.s32.totalorder %v2439_v62, 3 }
 0xc14   : > { %v4178_v25 = vmin.u32 %v2286_v33, %v6234_v11  ;;  %v2457_v24 = vor.u32 %v2456_v20, %v2455_v30  ;;  %vm2461_vm13 = vcmp.lt.s32.totalorder %v2439_v62, 4  ;;  %v2462_v49 = vsel %vm2458_vm12, %v2442_v38, %v2445_v12 }
 0xc15   : > { %v2463_v10 = vsel %vm2461_vm13, %v2451_v36, 2102212464  ;;  %v2466_v19 = vsel %vm2458_vm12, %v2445_v12, %v2448_v14  ;;  %v2386_v2 = vshll.u32 %v6248_v46, 30  ;;  %v2467_v34 = vsel %vm2461_vm13, %v2454_v3, 920167782 }
 0xc16   : > { %v2288_v57 = vclz %v4178_v25  ;;  %v2464_v7 = vsel %vm2460_vm6, %v2448_v14, %v2463_v10  ;;  %v2470_v9 = vsel %vm2458_vm12, %v2448_v14, %v2451_v36  ;;  %vm2459_vm14 = vcmp.lt.s32.totalorder %v2439_v62, 2 }
 0xc17   : > { %v2468_v48 = vsel %vm2460_vm6, %v2451_v36, %v2467_v34  ;;  %v2471_v13 = vsel %vm2461_vm13, %v2457_v24, 1326507024  ;;  %v6253_v43 = vsub.s32 %v2383_v54, %v2386_v2  ;;  %v2465_v5 = vsel %vm2459_vm14, %v2462_v49, %v2464_v7 }
 0xc18   : > { %v4179_v22 = vadd.s32 4294967294, %v2288_v57  ;;  %v2469_v33 = vsel %vm2459_vm14, %v2466_v19, %v2468_v48  ;;  %v2472_v4 = vsel %vm2460_vm6, %v2454_v3, %v2471_v13  ;;  %v2276_v54 = vadd.s32 %v6184_v50, %v6181_v56 }
 0xc19   : > { %v2473_v30 = vsel %vm2459_vm14, %v2470_v9, %v2472_v4  ;;  %v6257_v12 = vmul.u32.u64.low %v6226_v21, %v2469_v33  ;;  %v6258_v29 = vmul.u32.u64.high %v6226_v21, %v2469_v33, %v6257_v12  ;;  %v2389_v14 = vsub.s32 0, %v6253_v43 }
 0xc1a   : > { %vm4180_vm15 = vcmp.lt.s32.totalorder %v4179_v22, 0  ;;  %v6263_v25 = vmul.u32.u64.low %v6226_v21, %v2473_v30  ;;  %v6264_v36 = vmul.u32.u64.high %v6226_v21, %v2473_v30, %v6263_v25  ;;  %vm2540_vm3 = vcmp.gt.s32.totalorder %v2539_v58, 0 }
 0xc1b   : > { %v2291_v20 = vsel %vm4180_vm15, 0, %v4179_v22  ;;  %v4182_v3 = vmin.u32 %v2389_v14, %v6253_v43  ;;  %v7313_v24 = vand.u32 2147483647, %v6134_v8  ;;  %v2541_v57 = vsel %vm2540_vm3, %v2539_v58, 0 }
 0xc1c   : > { %v2292_v38 = vsub.s32 32, %v2291_v20  ;;  %v2296_v62 = vsub.s32 4294967266, %v2291_v20  ;;  %v2481_v19 = vmul.u32 %v6226_v21, %v2465_v5  ;;  %v2484_v2 = vadd.s32 1, %v6258_v29 }
 0xc1d   : > { %v2293_v7 = vshll.u32 %v6234_v11, %v2291_v20  ;;  %v2391_v34 = vclz %v4182_v3  ;;  %vm2483_vm1 = vc.u32 %v6264_v36, %v6257_v12  ;;  %v2543_v56 = vand.u32 31, %v2541_v57 }
 0xc1e   : > { %v2294_v49 = vshrl.u32 %v2276_v54, %v2292_v38  ;;  %v2297_v10 = vadd.s32 127, %v2296_v62  ;;  %v2485_v9 = vsel %vm2483_vm1, %v2484_v2, %v6258_v29  ;;  %v2536_v21 = vand.u32 8388607, %v7313_v24 }
 0xc1f   : > { %v4183_v48 = vadd.s32 4294967294, %v2391_v34  ;;  %v2486_v13 = vadd.s32 %v2485_v9, %v2481_v19  ;;  %v2544_v58 = vsub.s32 32, %v2543_v56  ;;  %v2546_v30 = vshll.u32 %v7314_v41, %v2543_v56 }
 0xc20   : > { %v2298_v50 = vshll.u32 %v2297_v10, 23  ;;  %v2295_v22 = vor.u32 %v2294_v49, %v2293_v7  ;;  %v2549_v29 = vshll.u32 %v7343_v26, %v2543_v56  ;;  %v2537_v62 = vor.u32 8388608, %v2536_v21 }
 0xc21   : > { %vm4184_vm4 = vcmp.lt.s32.totalorder %v4183_v48, 0  ;;  %v2487_v5 = vadd.s32 536870912, %v2486_v13  ;;  %v2547_v11 = vshrl.u32 %v7343_v26, %v2544_v58  ;;  %v2550_v20 = vshrl.u32 %v7344_v35, %v2544_v58 }
 0xc22   : > { %v2299_v33 = vor.u32 4788187, %v2298_v50  ;;  %v2302_v14 = vcvt.s32.f32 %v2295_v22  ;;  %v2553_v54 = vshrl.u32 %v7345_v17, %v2544_v58  ;;  %v6285_v38 = vsel %vm4184_vm4, 0, %v4183_v48 }
 0xc23   : > { %v6281_v25 = vshrl.u32 %v2487_v5, 30  ;;  %v2542_v3 = vshrl.u32 %v2541_v57, 5  ;;  %v2552_v49 = vshll.u32 %v7344_v35, %v2543_v56  ;;  %v2548_v2 = vor.u32 %v2547_v11, %v2546_v30 }
 0xc24   : > { %v2300_v4 = vand.u32 2147483647, %v2299_v33  ;;  %v2551_v7 = vor.u32 %v2550_v20, %v2549_v29  ;;  %v2555_v34 = vshll.u32 %v7345_v17, %v2543_v56  ;;  %v2556_v50 = vshrl.u32 %v7362_v6, %v2544_v58 }
 0xc25   : > { %v2489_v19 = vshll.u32 %v6281_v25, 30  ;;  %v2558_v9 = vshll.u32 %v7362_v6, %v2543_v56  ;;  %v2559_v22 = vshrl.u32 %v7363_v27, %v2544_v58  ;;  %vm2222_vm5 = vcmp.lt.s32.totalorder %v6113_v52, 0 }
 0xc26   : > { %v2303_v10 = vmul.f32 %v2302_v14, %v2300_v4  ;;  %v2554_v33 = vor.u32 %v2553_v54, %v2552_v49  ;;  %v2399_v57 = vsub.s32 4294967266, %v6285_v38  ;;  %v2557_v21 = vor.u32 %v2556_v50, %v2555_v34 }
 0xc27   : > { %v2490_v48 = vsub.s32 %v2486_v13, %v2489_v19  ;;  %v2560_v5 = vor.u32 %v2559_v22, %v2558_v9  ;;  %v2577_v4 = vshll.u32 %v2537_v62, 8  ;;  %vm2561_vm2 = vcmp.lt.s32.totalorder %v2542_v3, 1 }
 0xc28   : > { %v2304_v14 = vxor.u32 2147483648, %v2303_v10  ;;  %vm2564_vm7 = vcmp.lt.s32.totalorder %v2542_v3, 4  ;;  %v2545_v30 = vshrl.u32 %v7314_v41, %v2544_v58  ;;  %vm2563_vm12 = vcmp.lt.s32.totalorder %v2542_v3, 3 }
 0xc29   : > { %v2492_v11 = vsub.s32 0, %v2490_v48  ;;  %v2569_v56 = vsel %vm2561_vm2, %v2548_v2, %v2551_v7  ;;  %v2570_v20 = vsel %vm2564_vm7, %v2557_v21, 920167782  ;;  %vm2562_vm6 = vcmp.lt.s32.totalorder %v2542_v3, 2 }
 0xc2a   : > { %v2566_v24 = vsel %vm2564_vm7, %v2554_v33, 2102212464  ;;  %v2571_v13 = vsel %vm2563_vm12, %v2554_v33, %v2570_v20  ;;  %v2400_v54 = vadd.s32 127, %v2399_v57  ;;  %v2573_v19 = vsel %vm2561_vm2, %v2551_v7, %v2554_v33 }
 0xc2b   : > { %v4186_v29 = vmin.u32 %v2492_v11, %v2490_v48  ;;  %v2572_v49 = vsel %vm2562_vm6, %v2569_v56, %v2571_v13  ;;  %v2574_v62 = vsel %vm2564_vm7, %v2560_v5, 1326507024  ;;  %v2305_v34 = vsel %vm2222_vm5, %v2304_v14, %v2303_v10 }
 0xc2c   : > { %v2565_v58 = vsel %vm2561_vm2, %v2545_v30, %v2548_v2  ;;  %v2575_v9 = vsel %vm2563_vm12, %v2557_v21, %v2574_v62  ;;  %v2567_v22 = vsel %vm2563_vm12, %v2551_v7, %v2566_v24  ;;  %v2395_v33 = vsub.s32 32, %v6285_v38 }
 0xc2d   : > { %v2494_v50 = vclz %v4186_v29  ;;  %v2576_v41 = vsel %vm2562_vm6, %v2573_v19, %v2575_v9  ;;  %v6303_v11 = vmul.u32.u64.low %v2577_v4, %v2572_v49  ;;  %v6304_v39 = vmul.u32.u64.high %v2577_v4, %v2572_v49, %v6303_v11 }
 0xc2e   : > { %v6307_v20 = vmul.u32.u64.low %v2577_v4, %v2576_v41  ;;  %v6308_v56 = vmul.u32.u64.high %v2577_v4, %v2576_v41, %v6307_v20  ;;  %vm6313_vm13 = vcmp.le.f32.partialorder %v2220_v59, 0.7853982  ;;  %v2568_v24 = vsel %vm2562_vm6, %v2565_v58, %v2567_v22 }
 0xc2f   : > { %v4187_v57 = vadd.s32 4294967294, %v2494_v50  ;;  %v2308_v2 = vsel %vm6313_vm13, %v6113_v52, %v2305_v34  ;;  %v2379_v7 = vadd.s32 %v6211_v15, %v6217_v18  ;;  %v2401_v41 = vshll.u32 %v2400_v54, 23 }
 0xc30   : > { %v2587_v5 = vadd.s32 1, %v6304_v39  ;;  %v2482_v59 = vadd.s32 %v6257_v12, %v6264_v36  ;;  %v2584_v13 = vmul.u32 %v2577_v4, %v2568_v24  ;;  %vm2586_vm15 = vc.u32 %v6308_v56, %v6303_v11 }
 0xc31   : > { %vm4188_vm14 = vcmp.lt.s32.totalorder %v4187_v57, 0  ;;  %v2397_v29 = vshrl.u32 %v2379_v7, %v2395_v33  ;;  %4513 = vcosq.f32 %v2308_v2  ;;  %v2396_v18 = vshll.u32 %v6253_v43, %v6285_v38 }
 0xc32   : > { %v2497_v21 = vsel %vm4188_vm14, 0, %v4187_v57  ;;  %v2588_v15 = vsel %vm2586_vm15, %v2587_v5, %v6304_v39  ;;  %v2402_v54 = vor.u32 4788187, %v2401_v41  ;;  %4515 = vsinq.f32 %v2308_v2 }
 0xc33   : > { %v2498_v14 = vsub.s32 32, %v2497_v21  ;;  %v2502_v30 = vsub.s32 4294967266, %v2497_v21  ;;  %v2499_v3 = vshll.u32 %v2490_v48, %v2497_v21  ;;  %v2589_v62 = vadd.s32 %v2588_v15, %v2584_v13 }
 0xc34   : > { %v2398_v34 = vor.u32 %v2397_v29, %v2396_v18  ;;  %v2306_v4 = vsub.s32 4, %v6221_v1  ;;  %v2403_v9 = vand.u32 2147483647, %v2402_v54  ;;  %vm2428_vm3 = vcmp.lt.s32.totalorder %v6131_v32, 0 }
 0xc35   : > { %v2500_v49 = vshrl.u32 %v2482_v59, %v2498_v14  ;;  %v2503_v19 = vadd.s32 127, %v2502_v30  ;;  %v2590_v50 = vadd.s32 536870912, %v2589_v62  ;;  %vm6343_vm1 = vcmp.le.f32.partialorder %v2426_v0, 0.7853982 }
 0xc36   : > { %v2405_v20 = vcvt.s32.f32 %v2398_v34  ;;  %v2307_v43 = vsel %vm2222_vm5, %v2306_v4, %v6221_v1  ;;  %v2512_v1 = vsub.s32 4, %v6281_v25  ;;  %vm2325_vm4 = vcmp.lt.s32.totalorder %v6116_v23, 0 }
 0xc37   : > { %v2501_v12 = vor.u32 %v2500_v49, %v2499_v3  ;;  %v2504_v36 = vshll.u32 %v2503_v19, 23  ;;  %v6332_v22 = vshrl.u32 %v2590_v50, 30  ;;  %v2309_v41 = vsel %vm6313_vm13, 0, %v2307_v43 }
 0xc38   : > { %v2406_v24 = vmul.f32 %v2405_v20, %v2403_v9  ;;  %v2313_v13 = vand.u32 3, %v2309_v41  ;;  %v2513_v0 = vsel %vm2428_vm3, %v2512_v1, %v6281_v25  ;;  %v2585_v4 = vadd.s32 %v6303_v11, %v6308_v56  ;;  %v6370_v11 = vpop.permute.xlu1 %2637 }
 0xc39   : > { %v2505_v58 = vor.u32 4788187, %v2504_v36  ;;  %v2508_v57 = vcvt.s32.f32 %v2501_v12  ;;  %v2592_v39 = vshll.u32 %v6332_v22, 30  ;;  %v7368_v12 = vand.u32 2147483647, %v6116_v23 }
 0xc3a   : > { %v2407_v30 = vxor.u32 2147483648, %v2406_v24  ;;  %vm2315_vm5 = vcmp.eq.s32.totalorder %v2313_v13, 0  ;;  %vm2318_vm2 = vcmp.eq.s32.totalorder %v2313_v13, 2  ;;  %v2515_v34 = vsel %vm6343_vm1, 0, %v2513_v0 }
 0xc3b   : > { %v2506_v48 = vand.u32 2147483647, %v2505_v58  ;;  %v4514_v33 = vpop.eup %4513  ;;  %v2593_v2 = vsub.s32 %v2589_v62, %v2592_v39  ;;  %vm6357_vm12 = vcmp.le.f32.partialorder %v7368_v12, 0.7853982  ;;  %vm2314_vm6 = vcmp.lt.s32.totalorder %v2313_v13, 2 }
 0xc3c   : > { %v4516_v21 = vpop.eup %4515  ;;  %v2319_v49 = vxor.u32 2147483648, %v4514_v33  ;;  %v2408_v15 = vsel %vm2325_vm4, %v2407_v30, %v2406_v24  ;;  %vm2312_vm13 = vweird.f32 %v6113_v52  ;;  %v2642_v0 = vpop.permute.xlu1 %2641 }
 0xc3d   : > { %v2509_v38 = vmul.f32 %v2508_v57, %v2506_v48  ;;  %v2595_v5 = vsub.s32 0, %v2593_v2  ;;  %v2316_v3 = vxor.u32 2147483648, %v4516_v21  ;;  %v2411_v25 = vsel %vm6357_vm12, %v6116_v23, %v2408_v15 }
 0xc3e   : > { %v2320_v62 = vsel %vm2318_vm2, %v2319_v49, %v4516_v21  ;;  %v2519_v57 = vand.u32 3, %v2515_v34 }
 0xc3f   : > { %v2510_v7 = vxor.u32 2147483648, %v2509_v38  ;;  %v4190_v29 = vmin.u32 %v2595_v5, %v2593_v2  ;;  %v2317_v54 = vsel %vm2315_vm5, %v4514_v33, %v2316_v3  ;;  %v2409_v5 = vsub.s32 4, %v6248_v46 }
 0xc40   : > { %v2321_v48 = vsel %vm2314_vm6, %v2317_v54, %v2320_v62  ;;  %vm2524_vm14 = vcmp.eq.s32.totalorder %v2519_v57, 2  ;;  %vm2521_vm15 = vcmp.eq.s32.totalorder %v2519_v57, 0  ;;  %vm2531_vm5 = vcmp.lt.s32.totalorder %v6134_v8, 0 }
 0xc41   : > { %v2511_v59 = vsel %vm2428_vm3, %v2510_v7, %v2509_v38  ;;  %v2597_v19 = vclz %v4190_v29  ;;  %v2322_v33 = vsel %vm2312_vm13, nan, %v2321_v48  ;;  %vm2520_vm3 = vcmp.lt.s32.totalorder %v2519_v57, 2 }
 0xc42   : > { %v2514_v10 = vsel %vm6343_vm1, %v6131_v32, %v2511_v59  ;;  %v2632_v52 = vsub.f32 1.0, %v2322_v33  ;;  %vm2518_vm1 = vweird.f32 %v6131_v32  ;;  %v2410_v13 = vsel %vm2325_vm4, %v2409_v5, %v6248_v46 }
 0xc43   : > { %4517 = vcosq.f32 %v2514_v10  ;;  %v4191_v18 = vadd.s32 4294967294, %v2597_v19  ;;  %v2412_v54 = vsel %vm6357_vm12, 0, %v2410_v13  ;;  %v7371_v32 = vand.u32 2147483647, %v6134_v8 }
 0xc44   : > { %4519 = vsinq.f32 %v2514_v10  ;;  %v2644_v49 = vmul.f32 %v6370_v11, %v2632_v52  ;;  %vm2415_vm6 = vweird.f32 %v6116_v23 }
 0xc45   : > { %vm4192_vm7 = vcmp.lt.s32.totalorder %v4191_v18, 0  ;;  %4521 = vcosq.f32 %v2411_v25  ;;  %vm6382_vm2 = vcmp.le.f32.partialorder %v7371_v32, 0.7853982 }
 0xc46   : > { %v2600_v50 = vsel %vm4192_vm7, 0, %v4191_v18  ;;  %4523 = vsinq.f32 %v2411_v25  ;;  %v2615_v25 = vsub.s32 4, %v6332_v22 }
 0xc47   : > { %v2601_v58 = vsub.s32 32, %v2600_v50  ;;  %v2605_v9 = vsub.s32 4294967266, %v2600_v50  ;;  %v2602_v20 = vshll.u32 %v2593_v2, %v2600_v50  ;;  %v2648_v50 = vadd.f32 %v2644_v49, %v6107_v44 }
 0xc49   : > { %v2603_v39 = vshrl.u32 %v2585_v4, %v2601_v58  ;;  %v2606_v43 = vadd.s32 127, %v2605_v9  ;;  %v2416_v58 = vand.u32 3, %v2412_v54 }
 0xc4b   : > { %v2604_v7 = vor.u32 %v2603_v39, %v2602_v20  ;;  %v2607_v41 = vshll.u32 %v2606_v43, 23  ;;  %v2616_v20 = vsel %vm2531_vm5, %v2615_v25, %v6332_v22  ;;  %vm2418_vm4 = vcmp.eq.s32.totalorder %v2416_v58, 0  ;;  %v6397_v43 = vld [vmem:[#allocation2] sm:$0xff] }
 0xc4c   : > { %vm2421_vm7 = vcmp.eq.s32.totalorder %v2416_v58, 2  ;;  %v2618_v39 = vsel %vm6382_vm2, 0, %v2616_v20  ;;  %vm2417_vm12 = vcmp.lt.s32.totalorder %v2416_v58, 2 }
 0xc4d   : > { %v4518_v38 = vpop.eup %4517  ;;  %v2608_v59 = vor.u32 4788187, %v2607_v41  ;;  %v2611_v30 = vcvt.s32.f32 %v2604_v7  ;;  %v2622_v33 = vand.u32 3, %v2618_v39 }
 0xc4e   : > { %v4520_v24 = vpop.eup %4519  ;;  %v2525_v21 = vxor.u32 2147483648, %v4518_v38 }
 0xc4f   : > { %v2522_v56 = vxor.u32 2147483648, %v4520_v24  ;;  %v2609_v1 = vand.u32 2147483647, %v2608_v59  ;;  %v4522_v15 = vpop.eup %4521  ;;  %vm2627_vm13 = vcmp.eq.s32.totalorder %v2622_v33, 2 }
 0xc50   : > { %v2526_v2 = vsel %vm2524_vm14, %v2525_v21, %v4520_v24  ;;  %v4524_v12 = vpop.eup %4523  ;;  %v2422_v48 = vxor.u32 2147483648, %v4522_v15  ;;  %vm2624_vm14 = vcmp.eq.s32.totalorder %v2622_v33, 0 }
 0xc51   : > { %v2523_v14 = vsel %vm2521_vm15, %v4518_v38, %v2522_v56  ;;  %v2612_v3 = vmul.f32 %v2611_v30, %v2609_v1  ;;  %v2419_v9 = vxor.u32 2147483648, %v4524_v12  ;;  %vm2623_vm15 = vcmp.lt.s32.totalorder %v2622_v33, 2 }
 0xc52   : > { %v2527_v29 = vsel %vm2520_vm3, %v2523_v14, %v2526_v2  ;;  %vm2621_vm3 = vweird.f32 %v6134_v8 }
 0xc53   : > { %v2528_v10 = vsel %vm2518_vm1, nan, %v2527_v29  ;;  %v2613_v18 = vxor.u32 2147483648, %v2612_v3  ;;  %v2420_v44 = vsel %vm2418_vm4, %v4522_v15, %v2419_v9 }
 0xc54   : > { %v2634_v19 = vsub.f32 1.0, %v2528_v10 }
 0xc55   : > { %v2614_v46 = vsel %vm2531_vm5, %v2613_v18, %v2612_v3 }
 0xc56   : > { %v2646_v62 = vmul.f32 %v2642_v0, %v2634_v19  ;;  %v2617_v36 = vsel %vm6382_vm2, %v6134_v8, %v2614_v46 }
 0xc57   : > { %4525 = vcosq.f32 %v2617_v36 }
 0xc58   : > { %v2650_v4 = vadd.f32 %v2646_v62, %v6118_v45  ;;  %4527 = vsinq.f32 %v2617_v36  ;;  %v2423_v45 = vsel %vm2421_vm7, %v2422_v48, %v4524_v12 }
 0xc59   : > { %v2424_v38 = vsel %vm2417_vm12, %v2420_v44, %v2423_v45 }
 0xc5a   : > { %v2652_v57 = vpack.c.bf16 %v2650_v4, %v2648_v50  ;;  %v2425_v24 = vsel %vm2415_vm6, nan, %v2424_v38 }
 0xc5b   : > { %v2633_v5 = vsub.f32 1.0, %v2425_v24 }
 0xc5c   : > { %2666 = vrot.lane.b32.xlu0 %v2652_v57, %s4666_s25  ;;  %2661 = vrot.lane.b32.xlu1 %v2652_v57, %s4665_s23 }
 0xc5d   : > { %v2645_v14 = vmul.f32 %v6370_v11, %v2633_v5 }
 0xc5f   : > { %v2649_v30 = vadd.f32 %v2645_v14, %v6109_v51 }
 0xc60   : > { %2688 = vrot.lane.b32.xlu0 %v6397_v43, %s4667_s26 }
 0xc61   : > { %v4526_v22 = vpop.eup %4525 }
 0xc62   : > { %v4528_v7 = vpop.eup %4527  ;;  %v2628_v41 = vxor.u32 2147483648, %v4526_v22 }
 0xc63   : > { %v2625_v21 = vxor.u32 2147483648, %v4528_v7 }
 0xc64   : > { %2690 = vrot.lane.b32.xlu0 %v2652_v57, %s4667_s26  ;;  %v2629_v56 = vsel %vm2627_vm13, %v2628_v41, %v4528_v7 }
 0xc65   : > { %v2626_v59 = vsel %vm2624_vm14, %v4526_v22, %v2625_v21 }
 0xc66   : > { %v2630_v52 = vsel %vm2623_vm15, %v2626_v59, %v2629_v56 }
 0xc67   : > { %v2631_v2 = vsel %vm2621_vm3, nan, %v2630_v52 }
 0xc68   : > { %v2635_v23 = vsub.f32 1.0, %v2631_v2 }
 0xc6a   : > { %v2647_v1 = vmul.f32 %v2642_v0, %v2635_v23 }
 0xc6c   : > { %v2651_v29 = vadd.f32 %v2647_v1, %v6123_v53  ;;  %v250_v1 = vld [vmem:[%s4795_s13 + $0x20] sm:$0xff] }
 0xc6e   : > { %v2653_v13 = vpack.c.bf16 %v2651_v29, %v2649_v30  ;;  %v251_v30 = vld [vmem:[%s4795_s13 + $0x28] sm:$0xff]  ;;  %v6466_v29 = vld [vmem:[%s7286_s4 + $0x20] sm:$0xff] }
 0xc70   : > { %2655 = vst.msk [vmem:[#allocation2 + $0x10] sm:$0xff] %vm262_vm0, %v2653_v13 }
 0xc77   : > { %v2658_v10 = vld [vmem:[#allocation2 + $0x10] sm:$0xff] }
 0xc78   : > { %2663 = vrot.lane.b32.xlu1 %v2658_v10, %s4665_s23 }
 0xc7c   : > { %2668 = vrot.lane.b32.xlu1 %v2658_v10, %s4666_s25 }
 0xc80   : > { %2692 = vrot.lane.b32.xlu1 %v2658_v10, %s4667_s26 }
 0xcce   : > { %v2662_v8 = vpop.permute.xlu1 %2661  ;;  %v2667_v11 = vpop.permute.xlu0 %2666 }
 0xccf   : > { %2694 = vrot.lane.b32.xlu1 %v2662_v8, %s4667_s26 }
 0xcd2   : > { %v2689_v49 = vpop.permute.xlu0 %2688 }
 0xcd6   : > { %v2691_v0 = vpop.permute.xlu0 %2690 }
 0xcd7   : > { %v2706_v54 = vsel %vm832_vm10, %v2689_v49, %v2691_v0 }
 0xcea   : > { %v2664_v3 = vpop.permute.xlu1 %2663 }
 0xceb   : > { %v2665_v51 = vsel %vm790_vm8, %v2662_v8, %v2664_v3  ;;  %2698 = vrot.lane.b32.xlu0 %v2664_v3, %s4667_s26 }
 0xcec   : > { %2696 = vrot.lane.b32.xlu1 %v2665_v51, %s4667_s26 }
 0xcee   : > { %v2669_v53 = vpop.permute.xlu1 %2668 }
 0xcef   : > { %v2670_v19 = vsel %vm796_vm9, %v2667_v11, %v2669_v53 }
 0xcf0   : > { %2702 = vrot.lane.b32.xlu0 %v2670_v19, %s4667_s26  ;;  %2704 = vrot.lane.b32.xlu1 %v2669_v53, %s4667_s26 }
 0xcf2   : > { %v2693_v15 = vpop.permute.xlu1 %2692 }
 0xcf3   : > { %v2707_v18 = vsel %vm832_vm10, %v2691_v0, %v2693_v15 }
 0xcf4   : > { %2700 = vrot.lane.b32.xlu0 %v2667_v11, %s4667_s26  ;;  %2721 = vmatprep.subr.bf16.mxu1 %v2707_v18 }
 0xcf5   : > { %2722 = vmatpush1.bf16.msra.mxu1 %v2706_v54  ;;  %2675 = vperm.xlu1 %4428, %v6091_v47  }
 0xcf8   : > { %2679 = vperm.xlu0 %4429, %v6097_v16   ;;  %v4446_v16 = vld [vmem:[%s7285_s3 + $0x8] sm:$0xff]  }
 0xcfc   : > { %4430 = vset.pattern.permute.xlu0 %v6397_v43 }
 0xd41   : > { %v2695_v62 = vpop.permute.xlu1 %2694 }
 0xd5d   : > { %v2699_v12 = vpop.permute.xlu0 %2698 }
 0xd5e   : > { %v2697_v32 = vpop.permute.xlu1 %2696 }
 0xd5f   : > { %v2708_v34 = vsel %vm832_vm10, %v2695_v62, %v2697_v32  ;;  %v2709_v46 = vsel %vm832_vm10, %v2697_v32, %v2699_v12  ;;  %v6471_v12 = vadd.f32 1.0, %v251_v30  ;;  %v6473_v32 = vadd.f32 1.0, %v250_v1 }
 0xd60   : > { %2723 = vmatprep.subr.bf16.mxu1 %v2709_v46 }
 0xd61   : > { %2724 = vmatpush1.bf16.msra.mxu1 %v2708_v34 }
 0xd62   : > { %v2703_v50 = vpop.permute.xlu0 %2702  ;;  %v2705_v25 = vpop.permute.xlu1 %2704 }
 0xd63   : > { %v2711_v4 = vsel %vm832_vm10, %v2703_v50, %v2705_v25 }
 0xd64   : > { %2725 = vmatprep.subr.bf16.mxu1 %v2711_v4  ;;  %v6480_v4 = vld [vmem:[%s7286_s4 + $0x28] sm:$0xff] }
 0xd66   : > { %v2701_v58 = vpop.permute.xlu0 %2700 }
 0xd67   : > { %v2710_v47 = vsel %vm832_vm10, %v2701_v58, %v2703_v50 }
 0xd68   : > { %2726 = vmatpush1.bf16.msra.mxu1 %v2710_v47 }
 0xd6b   : > { %4196 = vmatmul.mubr.msk.bf16.vlgmr.msra.gmra.mrb[4].mxu1 %vm845_vm11, %v4446_v16 }
 0xd6c   : > { %4006 = vmatprep.mubr.bf16.mxu1 %v6397_v43 }
 0xd74   : > { %v2676_v36 = vpop.permute.xlu1 %2675 }
 0xd77   : > { %v2680_v48 = vpop.permute.xlu0 %2679 }
 0xe3e   : > { %v2755_v9 = vpop.f32.mrb[4].mxu1 }
 0xe3f   : > { %v2756_v57 = vadd.f32 %v2755_v9, %v2676_v36  ;;  %v2757_v20 = vpop.f32.mrb[5].mxu1 }
 0xe40   : > { %v2758_v44 = vadd.f32 %v2757_v20, %v2676_v36  ;;  %v2759_v45 = vpop.f32.mrb[6].mxu1 }
 0xe41   : > { %v2760_v39 = vadd.f32 %v2759_v45, %v2680_v48  ;;  %v2761_v38 = vpop.f32.mrb[7].mxu1  ;;  %v6437_v24 = vadd.f32 %v2756_v57, %v5619_v63 }
 0xe42   : > { %v6434_v33 = vadd.f32 %v2758_v44, %v5616_v31  ;;  %v2762_v22 = vadd.f32 %v2761_v38, %v2680_v48 }
 0xe43   : > { %v6440_v7 = vadd.f32 %v2760_v39, %v5622_v28  ;;  %v2776_v14 = vmul.f32 %v6437_v24, %v6437_v24 }
 0xe44   : > { %v6443_v41 = vadd.f32 %v2762_v22, %v5625_v37  ;;  %v2768_v21 = vsel %vm262_vm0, %v6434_v33, 0.0  ;;  %v2777_v5 = vmul.f32 %v6434_v33, %v6434_v33 }
 0xe45   : > { %v2769_v31 = vadd.f32 %v2768_v21, %v6437_v24  ;;  %v2778_v56 = vmul.f32 %v6440_v7, %v6440_v7 }
 0xe46   : > { %v2772_v63 = vsel %vm262_vm0, %v6443_v41, 0.0  ;;  %v2779_v28 = vmul.f32 %v6443_v41, %v6443_v41  ;;  %v2780_v52 = vsel %vm262_vm0, %v2777_v5, 0.0 }
 0xe47   : > { %2770 = vadd.xlane.f32.xlu1 %v2769_v31  ;;  %v2773_v37 = vadd.f32 %v2772_v63, %v6440_v7  ;;  %v2781_v23 = vadd.f32 %v2780_v52, %v2776_v14 }
 0xe48   : > { %v2784_v59 = vsel %vm262_vm0, %v2779_v28, 0.0 }
 0xe49   : > { %2774 = vadd.xlane.f32.xlu0 %v2773_v37  ;;  %v2785_v2 = vadd.f32 %v2784_v59, %v2778_v56 }
 0xe4b   : > { %2786 = vadd.xlane.f32.xlu1 %v2785_v2 }
 0xe4d   : > { %2782 = vadd.xlane.f32.xlu0 %v2781_v23 }
 0xe5c   : > { %2824 = vperm.xlu1 %4428, %v250_v1  }
 0xe60   : > { %2829 = vperm.xlu1 %4428, %v251_v30  }
 0xe64   : > { %4431 = vset.pattern.permute.xlu1 %v7331_v40 }
 0xe65   : > { %2838 = vperm.xlu1 %4431, %v6466_v29  }
 0xe69   : > { %4432 = vset.pattern.permute.xlu1 %v6397_v43 }
 0xed4   : > { %v2771_v13 = vpop.xlane.xlu1 %2770 }
 0xed5   : > { %v2788_v8 = vmul.f32 0.005, %v2771_v13 }
 0xed6   : > { %v2775_v10 = vpop.xlane.xlu0 %2774 }
 0xed7   : > { %v2789_v11 = vmul.f32 0.005, %v2775_v10  ;;  %v2792_v15 = vmul.f32 %v2788_v8, %v2788_v8  ;;  %v2804_v44 = vsub.f32 %v6437_v24, %v2788_v8  ;;  %v2805_v45 = vsub.f32 %v6434_v33, %v2788_v8 }
 0xed8   : > { %v2787_v3 = vpop.xlane.xlu1 %2786 }
 0xed9   : > { %v2793_v49 = vmul.f32 %v2789_v11, %v2789_v11  ;;  %v2791_v51 = vmul.f32 0.005, %v2787_v3  ;;  %v2806_v36 = vsub.f32 %v6440_v7, %v2789_v11  ;;  %v2807_v9 = vsub.f32 %v6443_v41, %v2789_v11 }
 0xeda   : > { %v2783_v53 = vpop.xlane.xlu0 %2782 }
 0xedb   : > { %v2795_v19 = vsub.f32 %v2791_v51, %v2793_v49  ;;  %v2790_v0 = vmul.f32 0.005, %v2783_v53 }
 0xedc   : > { %v2825_v58 = vpop.permute.xlu1 %2824 }
 0xedd   : > { %v2799_v18 = vadd.f32 1e-05, %v2795_v19  ;;  %v2794_v54 = vsub.f32 %v2790_v0, %v2792_v15 }
 0xedf   : > { %4529 = vrsqrt.f32 %v2799_v18  ;;  %v2798_v62 = vadd.f32 1e-05, %v2794_v54 }
 0xee0   : > { %v2830_v47 = vpop.permute.xlu1 %2829 }
 0xee1   : > { %4531 = vrsqrt.f32 %v2798_v62 }
 0xee4   : > { %v2839_v16 = vpop.permute.xlu1 %2838 }
 0xee9   : > { %v4530_v34 = vpop.eup %4529 }
 0xeea   : > { %v2803_v46 = vmul.f32 %v4530_v34, %v6471_v12 }
 0xeeb   : > { %v4532_v50 = vpop.eup %4531 }
 0xeec   : > { %2815 = vperm.xlu1 %4432, %v2803_v46   ;;  %v2802_v25 = vmul.f32 %v4532_v50, %v6473_v32 }
 0xeee   : > { %2810 = vperm.xlu0 %4430, %v2802_v25  }
 0xef0   : > { %4433 = vset.pattern.permute.xlu1 %v7331_v40 }
 0xef1   : > { %2843 = vperm.xlu1 %4433, %v6480_v4  }
 0xef5   : > { %4434 = vset.pattern.permute.xlu1 %v7332_v60 }
 0xef6   : > { %3267 = vperm.xlu1 %4434, %v6466_v29  }
 0xefa   : > { %3271 = vperm.xlu1 %4434, %v6480_v4  }
 0xefe   : > { %4435 = vset.pattern.permute.xlu1 %v6397_v43 }
 0xf6b   : > { %v2816_v48 = vpop.permute.xlu1 %2815 }
 0xf6c   : > { %v2820_v57 = vmul.f32 %v2816_v48, %v2806_v36  ;;  %v2821_v20 = vmul.f32 %v2816_v48, %v2807_v9 }
 0xf6d   : > { %v2811_v39 = vpop.permute.xlu0 %2810 }
 0xf6e   : > { %v2818_v38 = vmul.f32 %v2811_v39, %v2804_v44  ;;  %v2819_v22 = vmul.f32 %v2811_v39, %v2805_v45  ;;  %v6492_v21 = vadd.f32 %v2830_v47, %v2820_v57  ;;  %v6494_v43 = vadd.f32 %v2830_v47, %v2821_v20 }
 0xf6f   : > { %v7374_v44 = vmov 683565275  }
 0xf70   : > { %v6496_v5 = vadd.f32 %v2825_v58, %v2818_v38  ;;  %v6498_v31 = vadd.f32 %v2825_v58, %v2819_v22  ;;  %v2844_v63 = vpop.permute.xlu1 %2843 }
 0xf71   : > { %v6501_v28 = vmul.f32 %v2844_v63, %v6492_v21  ;;  %v6504_v37 = vmul.f32 %v2844_v63, %v6494_v43 }
 0xf72   : > { %v6507_v56 = vmul.f32 %v2839_v16, %v6496_v5  ;;  %v6510_v59 = vmul.f32 %v2839_v16, %v6498_v31 }
 0xf73   : > { %v3056_v52 = vand.u32 2147483647, %v6501_v28  ;;  %v3059_v2 = vand.u32 2139095040, %v6501_v28  ;;  %v7317_v14 = vand.u32 2147483647, %v6504_v37  ;;  %v3162_v30 = vand.u32 2139095040, %v6504_v37 }
 0xf74   : > { %v2853_v23 = vand.u32 2139095040, %v6507_v56  ;;  %v2956_v1 = vand.u32 2139095040, %v6510_v59  ;;  %v7318_v46 = vand.u32 2147483647, %v6507_v56 }
 0xf75   : > { %v3060_v13 = vshrl.u32 %v3059_v2, 23  ;;  %v3063_v10 = vand.u32 8388607, %v3056_v52  ;;  %v3163_v3 = vshrl.u32 %v3162_v30, 23  ;;  %v3166_v49 = vand.u32 8388607, %v7317_v14 }
 0xf76   : > { %v2854_v8 = vshrl.u32 %v2853_v23, 23  ;;  %v2957_v11 = vshrl.u32 %v2956_v1, 23  ;;  %v6531_v48 = vand.u32 8388607, %v7318_v46 }
 0xf77   : > { %v4205_v51 = vadd.s32 4294967169, %v3060_v13  ;;  %v4209_v0 = vadd.s32 4294967169, %v3163_v3  ;;  %v3064_v15 = vor.u32 8388608, %v3063_v10  ;;  %v3167_v34 = vor.u32 8388608, %v3166_v49 }
 0xf78   : > { %v4197_v53 = vadd.s32 4294967169, %v2854_v8  ;;  %v4201_v19 = vadd.s32 4294967169, %v2957_v11 }
 0xf79   : > { %v3066_v18 = vadd.s32 1, %v4205_v51  ;;  %v3169_v50 = vadd.s32 1, %v4209_v0  ;;  %v6525_v16 = vshll.u32 %v3064_v15, 8  ;;  %v6527_v9 = vshll.u32 %v3167_v34, 8 }
 0xf7a   : > { %v2860_v54 = vadd.s32 1, %v4197_v53  ;;  %v2963_v62 = vadd.s32 1, %v4201_v19 }
 0xf7b   : > { %vm3067_vm1 = vcmp.gt.s32.totalorder %v3066_v18, 0  ;;  %vm3170_vm4 = vcmp.gt.s32.totalorder %v3169_v50, 0 }
 0xf7c   : > { %vm2861_vm5 = vcmp.gt.s32.totalorder %v2860_v54, 0  ;;  %v3068_v25 = vsel %vm3067_vm1, %v3066_v18, 0  ;;  %vm2964_vm2 = vcmp.gt.s32.totalorder %v2963_v62, 0  ;;  %v3171_v53 = vsel %vm3170_vm4, %v3169_v50, 0 }
 0xf7d   : > { %v6523_v58 = vsel %vm2861_vm5, %v2860_v54, 0  ;;  %v3070_v47 = vand.u32 31, %v3068_v25  ;;  %v3069_v36 = vshrl.u32 %v3068_v25, 5 }
 0xf7e   : > { %v6534_v57 = vand.u32 31, %v6523_v58 }
 0xf7f   : > { %v3071_v20 = vsub.s32 32, %v3070_v47  ;;  %v3073_v45 = vshll.u32 %v7374_v44, %v3070_v47  ;;  %v3076_v39 = vshll.u32 %v7343_v26, %v3070_v47  ;;  %v3079_v38 = vshll.u32 %v7344_v35, %v3070_v47 }
 0xf80   : > { %v3082_v22 = vshll.u32 %v7345_v17, %v3070_v47  ;;  %v3085_v63 = vshll.u32 %v7362_v6, %v3070_v47  ;;  %vm3088_vm7 = vcmp.lt.s32.totalorder %v3069_v36, 1  ;;  %vm3089_vm12 = vcmp.lt.s32.totalorder %v3069_v36, 2 }
 0xf81   : > { %v3072_v2 = vshrl.u32 %v7374_v44, %v3071_v20  ;;  %v3074_v23 = vshrl.u32 %v7343_v26, %v3071_v20  ;;  %v3077_v1 = vshrl.u32 %v7344_v35, %v3071_v20  ;;  %v3080_v30 = vshrl.u32 %v7345_v17, %v3071_v20 }
 0xf82   : > { %v3083_v13 = vshrl.u32 %v7362_v6, %v3071_v20  ;;  %v3086_v10 = vshrl.u32 %v7363_v27, %v3071_v20  ;;  %vm3090_vm6 = vcmp.lt.s32.totalorder %v3069_v36, 3  ;;  %vm3091_vm13 = vcmp.lt.s32.totalorder %v3069_v36, 4 }
 0xf83   : > { %v3075_v8 = vor.u32 %v3074_v23, %v3073_v45  ;;  %v3078_v11 = vor.u32 %v3077_v1, %v3076_v39  ;;  %v3081_v3 = vor.u32 %v3080_v30, %v3079_v38  ;;  %v3172_v47 = vshrl.u32 %v3171_v53, 5 }
 0xf84   : > { %v3084_v49 = vor.u32 %v3083_v13, %v3082_v22  ;;  %v3087_v51 = vor.u32 %v3086_v10, %v3085_v63  ;;  %v3173_v39 = vand.u32 31, %v3171_v53  ;;  %v6550_v38 = vsub.s32 32, %v6534_v57 }
 0xf85   : > { %v3092_v19 = vsel %vm3088_vm7, %v3072_v2, %v3075_v8  ;;  %v3093_v0 = vsel %vm3091_vm13, %v3081_v3, 2102212464  ;;  %v3096_v15 = vsel %vm3088_vm7, %v3075_v8, %v3078_v11  ;;  %v3100_v18 = vsel %vm3088_vm7, %v3078_v11, %v3081_v3 }
 0xf86   : > { %v3094_v54 = vsel %vm3090_vm6, %v3078_v11, %v3093_v0  ;;  %v3097_v34 = vsel %vm3091_vm13, %v3084_v49, 920167782  ;;  %v3101_v25 = vsel %vm3091_vm13, %v3087_v51, 1326507024  ;;  %v6553_v22 = vsel %vm2964_vm2, %v2963_v62, 0 }
 0xf87   : > { %v3095_v20 = vsel %vm3089_vm12, %v3092_v19, %v3094_v54  ;;  %v3098_v14 = vsel %vm3090_vm6, %v3081_v3, %v3097_v34  ;;  %v3102_v45 = vsel %vm3090_vm6, %v3084_v49, %v3101_v25  ;;  %v3174_v10 = vsub.s32 32, %v3173_v39 }
 0xf88   : > { %v3099_v50 = vsel %vm3089_vm12, %v3096_v15, %v3098_v14  ;;  %v3103_v63 = vsel %vm3089_vm12, %v3100_v18, %v3102_v45  ;;  %v3111_v13 = vmul.u32 %v6525_v16, %v3095_v20  ;;  %v3176_v8 = vshll.u32 %v7374_v44, %v3173_v39 }
 0xf89   : > { %v6558_v2 = vmul.u32.u64.low %v6525_v16, %v3103_v63  ;;  %v6559_v23 = vmul.u32.u64.high %v6525_v16, %v3103_v63, %v6558_v2  ;;  %v6562_v1 = vmul.u32.u64.low %v6525_v16, %v3099_v50  ;;  %v6563_v30 = vmul.u32.u64.high %v6525_v16, %v3099_v50, %v6562_v1 }
 0xf8a   : > { %vm3191_vm14 = vcmp.lt.s32.totalorder %v3172_v47, 1  ;;  %v3179_v62 = vshll.u32 %v7343_v26, %v3173_v39  ;;  %v3182_v14 = vshll.u32 %v7344_v35, %v3173_v39  ;;  %v3185_v36 = vshll.u32 %v7345_v17, %v3173_v39 }
 0xf8b   : > { %v3188_v11 = vshll.u32 %v7362_v6, %v3173_v39  ;;  %v3177_v3 = vshrl.u32 %v7343_v26, %v3174_v10  ;;  %v3180_v49 = vshrl.u32 %v7344_v35, %v3174_v10  ;;  %v3183_v51 = vshrl.u32 %v7345_v17, %v3174_v10 }
 0xf8c   : > { %vm3192_vm15 = vcmp.lt.s32.totalorder %v3172_v47, 2  ;;  %vm3113_vm3 = vc.u32 %v6559_v23, %v6562_v1  ;;  %v3114_v16 = vadd.s32 1, %v6563_v30  ;;  %v3175_v53 = vshrl.u32 %v7374_v44, %v3174_v10 }
 0xf8d   : > { %v3186_v19 = vshrl.u32 %v7362_v6, %v3174_v10  ;;  %v3178_v0 = vor.u32 %v3177_v3, %v3176_v8  ;;  %v3181_v15 = vor.u32 %v3180_v49, %v3179_v62  ;;  %v3184_v18 = vor.u32 %v3183_v51, %v3182_v14 }
 0xf8e   : > { %v3189_v54 = vshrl.u32 %v7363_v27, %v3174_v10  ;;  %v3115_v34 = vsel %vm3113_vm3, %v3114_v16, %v6563_v30  ;;  %vm3193_vm1 = vcmp.lt.s32.totalorder %v3172_v47, 3  ;;  %vm3194_vm5 = vcmp.lt.s32.totalorder %v3172_v47, 4 }
 0xf8f   : > { %v3187_v25 = vor.u32 %v3186_v19, %v3185_v36  ;;  %v3116_v20 = vadd.s32 %v3115_v34, %v3111_v13  ;;  %v3195_v39 = vsel %vm3191_vm14, %v3175_v53, %v3178_v0  ;;  %v3196_v50 = vsel %vm3194_vm5, %v3184_v18, 2102212464 }
 0xf90   : > { %v3190_v45 = vor.u32 %v3189_v54, %v3188_v11  ;;  %v3197_v63 = vsel %vm3193_vm1, %v3181_v15, %v3196_v50  ;;  %v3199_v2 = vsel %vm3191_vm14, %v3178_v0, %v3181_v15  ;;  %v3203_v8 = vsel %vm3191_vm14, %v3181_v15, %v3184_v18 }
 0xf91   : > { %v3200_v46 = vsel %vm3194_vm5, %v3187_v25, 920167782  ;;  %v3117_v62 = vadd.s32 536870912, %v3116_v20  ;;  %v3198_v10 = vsel %vm3192_vm15, %v3195_v39, %v3197_v63  ;;  %v6589_v36 = vshrl.u32 %v6523_v58, 5 }
 0xf92   : > { %v3201_v30 = vsel %vm3193_vm1, %v3184_v18, %v3200_v46  ;;  %v3204_v14 = vsel %vm3194_vm5, %v3190_v45, 1326507024  ;;  %v3214_v3 = vmul.u32 %v6527_v9, %v3198_v10  ;;  %v2867_v58 = vshll.u32 %v7374_v44, %v6534_v57 }
 0xf93   : > { %v3202_v13 = vsel %vm3192_vm15, %v3199_v2, %v3201_v30  ;;  %v3205_v11 = vsel %vm3193_vm1, %v3187_v25, %v3204_v14  ;;  %v6594_v49 = vshrl.u32 %v3117_v62, 30  ;;  %v2868_v0 = vshrl.u32 %v7343_v26, %v6550_v38 }
 0xf94   : > { %v3206_v51 = vsel %vm3192_vm15, %v3203_v8, %v3205_v11  ;;  %v6598_v16 = vmul.u32.u64.low %v6527_v9, %v3202_v13  ;;  %v6599_v53 = vmul.u32.u64.high %v6527_v9, %v3202_v13, %v6598_v16  ;;  %v2870_v47 = vshll.u32 %v7343_v26, %v6534_v57 }
 0xf95   : > { %v6603_v46 = vmul.u32.u64.low %v6527_v9, %v3206_v51  ;;  %v6604_v19 = vmul.u32.u64.high %v6527_v9, %v3206_v51, %v6603_v46  ;;  %v3119_v15 = vshll.u32 %v6594_v49, 30  ;;  %v2871_v18 = vshrl.u32 %v7344_v35, %v6550_v38 }
 0xf96   : > { %v2874_v54 = vshrl.u32 %v7345_v17, %v6550_v38  ;;  %v2869_v34 = vor.u32 %v2868_v0, %v2867_v58  ;;  %v2873_v9 = vshll.u32 %v7344_v35, %v6534_v57  ;;  %v2876_v25 = vshll.u32 %v7345_v17, %v6534_v57 }
 0xf97   : > { %v2877_v45 = vshrl.u32 %v7362_v6, %v6550_v38  ;;  %v6623_v39 = vsub.s32 %v3116_v20, %v3119_v15  ;;  %v3217_v50 = vadd.s32 1, %v6599_v53  ;;  %v2872_v63 = vor.u32 %v2871_v18, %v2870_v47 }
 0xf98   : > { %v2879_v2 = vshll.u32 %v7362_v6, %v6534_v57  ;;  %vm3216_vm2 = vc.u32 %v6604_v19, %v6598_v16  ;;  %v2875_v8 = vor.u32 %v2874_v54, %v2873_v9  ;;  %v2880_v10 = vshrl.u32 %v7363_v27, %v6550_v38 }
 0xf99   : > { %v2878_v62 = vor.u32 %v2877_v45, %v2876_v25  ;;  %v6633_v30 = vand.u32 31, %v6553_v22  ;;  %v3122_v20 = vsub.s32 0, %v6623_v39  ;;  %v3218_v14 = vsel %vm3216_vm2, %v3217_v50, %v6599_v53 }
 0xf9a   : > { %v2858_v13 = vor.u32 8388608, %v6531_v48  ;;  %v3219_v11 = vadd.s32 %v3218_v14, %v3214_v3  ;;  %v2866_v57 = vshrl.u32 %v7374_v44, %v6550_v38  ;;  %v2881_v51 = vor.u32 %v2880_v10, %v2879_v2 }
 0xf9b   : > { %vm2882_vm4 = vcmp.lt.s32.totalorder %v6589_v36, 1  ;;  %v4206_v46 = vmin.u32 %v3122_v20, %v6623_v39  ;;  %vm2883_vm7 = vcmp.lt.s32.totalorder %v6589_v36, 2  ;;  %vm2885_vm12 = vcmp.lt.s32.totalorder %v6589_v36, 4 }
 0xf9c   : > { %v2890_v58 = vsel %vm2882_vm4, %v2869_v34, %v2872_v63  ;;  %v3220_v0 = vadd.s32 536870912, %v3219_v11  ;;  %vm2884_vm6 = vcmp.lt.s32.totalorder %v6589_v36, 3  ;;  %v2891_v48 = vsel %vm2885_vm12, %v2878_v62, 920167782 }
 0xf9d   : > { %v2894_v3 = vsel %vm2882_vm4, %v2872_v63, %v2875_v8  ;;  %v3124_v38 = vclz %v4206_v46  ;;  %v2887_v53 = vsel %vm2885_vm12, %v2875_v8, 2102212464  ;;  %v2892_v15 = vsel %vm2884_vm6, %v2875_v8, %v2891_v48 }
 0xf9e   : > { %v2895_v47 = vsel %vm2885_vm12, %v2881_v51, 1326507024  ;;  %v6649_v18 = vshrl.u32 %v3220_v0, 30  ;;  %v2893_v54 = vsel %vm2883_vm7, %v2890_v58, %v2892_v15  ;;  %v2898_v25 = vshll.u32 %v2858_v13, 8 }
 0xf9f   : > { %v2896_v9 = vsel %vm2884_vm6, %v2878_v62, %v2895_v47  ;;  %v4207_v45 = vadd.s32 4294967294, %v3124_v38  ;;  %v2886_v50 = vsel %vm2882_vm4, %v2866_v57, %v2869_v34  ;;  %v2888_v20 = vsel %vm2884_vm6, %v2872_v63, %v2887_v53 }
 0xfa0   : > { %v2897_v2 = vsel %vm2883_vm7, %v2894_v3, %v2896_v9  ;;  %v3222_v10 = vshll.u32 %v6649_v18, 30  ;;  %v6661_v51 = vmul.u32.u64.low %v2898_v25, %v2893_v54  ;;  %v6662_v46 = vmul.u32.u64.high %v2898_v25, %v2893_v54, %v6661_v51 }
 0xfa1   : > { %v6658_v14 = vmul.u32.u64.low %v2898_v25, %v2897_v2  ;;  %v6659_v8 = vmul.u32.u64.high %v2898_v25, %v2897_v2, %v6658_v14  ;;  %vm4208_vm13 = vcmp.lt.s32.totalorder %v4207_v45, 0  ;;  %v2968_v62 = vsub.s32 32, %v6633_v30 }
 0xfa2   : > { %v3127_v13 = vsel %vm4208_vm13, 0, %v4207_v45  ;;  %v6666_v58 = vsub.s32 %v3219_v11, %v3222_v10  ;;  %v3112_v34 = vadd.s32 %v6562_v1, %v6559_v23  ;;  %v2889_v63 = vsel %vm2883_vm7, %v2886_v50, %v2888_v20 }
 0xfa3   : > { %v3128_v57 = vsub.s32 32, %v3127_v13  ;;  %v3132_v0 = vsub.s32 4294967266, %v3127_v13  ;;  %vm2907_vm14 = vc.u32 %v6659_v8, %v6661_v51  ;;  %v2953_v3 = vand.u32 2147483647, %v6510_v59 }
 0xfa4   : > { %v3225_v48 = vsub.s32 0, %v6666_v58  ;;  %v2908_v11 = vadd.s32 1, %v6662_v46  ;;  %v3129_v15 = vshll.u32 %v6623_v39, %v3127_v13  ;;  %v2905_v1 = vmul.u32 %v2898_v25, %v2889_v63 }
 0xfa5   : > { %v3130_v38 = vshrl.u32 %v3112_v34, %v3128_v57  ;;  %v3133_v53 = vadd.s32 127, %v3132_v0  ;;  %v6680_v47 = vshrl.u32 %v6553_v22, 5  ;;  %v2971_v9 = vshrl.u32 %v7343_v26, %v2968_v62 }
 0xfa6   : > { %v4210_v23 = vmin.u32 %v3225_v48, %v6666_v58  ;;  %v2909_v54 = vsel %vm2907_vm14, %v2908_v11, %v6662_v46  ;;  %v2960_v10 = vand.u32 8388607, %v2953_v3  ;;  %v2970_v39 = vshll.u32 %v7374_v44, %v6633_v30 }
 0xfa7   : > { %v3134_v36 = vshll.u32 %v3133_v53, 23  ;;  %v3131_v45 = vor.u32 %v3130_v38, %v3129_v15  ;;  %v2910_v2 = vadd.s32 %v2909_v54, %v2905_v1  ;;  %v2974_v25 = vshrl.u32 %v7344_v35, %v2968_v62 }
 0xfa8   : > { %v3227_v50 = vclz %v4210_v23  ;;  %v2980_v22 = vshrl.u32 %v7362_v6, %v2968_v62  ;;  %v2973_v46 = vshll.u32 %v7343_v26, %v6633_v30  ;;  %v2977_v34 = vshrl.u32 %v7345_v17, %v2968_v62 }
 0xfa9   : > { %v3135_v20 = vor.u32 4788187, %v3134_v36  ;;  %v2911_v13 = vadd.s32 536870912, %v2910_v2  ;;  %v2972_v0 = vor.u32 %v2971_v9, %v2970_v39  ;;  %v2979_v63 = vshll.u32 %v7345_v17, %v6633_v30 }
 0xfaa   : > { %v4211_v14 = vadd.s32 4294967294, %v3227_v50  ;;  %v2983_v48 = vshrl.u32 %v7363_v27, %v2968_v62  ;;  %v3138_v38 = vcvt.s32.f32 %v3131_v45  ;;  %v2976_v11 = vshll.u32 %v7344_v35, %v6633_v30 }
 0xfab   : > { %v3136_v57 = vand.u32 2147483647, %v3135_v20  ;;  %v6696_v53 = vshrl.u32 %v2911_v13, 30  ;;  %v2975_v23 = vor.u32 %v2974_v25, %v2973_v46  ;;  %v2981_v1 = vor.u32 %v2980_v22, %v2979_v63 }
 0xfac   : > { %vm4212_vm15 = vcmp.lt.s32.totalorder %v4211_v14, 0  ;;  %v2982_v36 = vshll.u32 %v7362_v6, %v6633_v30  ;;  %v2978_v20 = vor.u32 %v2977_v34, %v2976_v11  ;;  %vm3058_vm3 = vcmp.lt.s32.totalorder %v6501_v28, 0 }
 0xfad   : > { %v3230_v15 = vsel %vm4212_vm15, 0, %v4211_v14  ;;  %v3139_v54 = vmul.f32 %v3138_v38, %v3136_v57  ;;  %v2913_v50 = vshll.u32 %v6696_v53, 30  ;;  %v2961_v13 = vor.u32 8388608, %v2960_v10 }
 0xfae   : > { %v3235_v9 = vsub.s32 4294967266, %v3230_v15  ;;  %v2984_v45 = vor.u32 %v2983_v48, %v2982_v36  ;;  %vm2985_vm1 = vcmp.lt.s32.totalorder %v6680_v47, 1  ;;  %vm2988_vm5 = vcmp.lt.s32.totalorder %v6680_v47, 4 }
 0xfaf   : > { %v2914_v39 = vsub.s32 %v2910_v2, %v2913_v50  ;;  %v2969_v25 = vshrl.u32 %v7374_v44, %v2968_v62  ;;  %vm2987_vm2 = vcmp.lt.s32.totalorder %v6680_v47, 3  ;;  %v2993_v30 = vsel %vm2985_vm1, %v2972_v0, %v2975_v23 }
 0xfb0   : > { %v2994_v22 = vsel %vm2988_vm5, %v2981_v1, 920167782  ;;  %v3140_v14 = vxor.u32 2147483648, %v3139_v54  ;;  %v3236_v46 = vadd.s32 127, %v3235_v9  ;;  %v2990_v57 = vsel %vm2988_vm5, %v2978_v20, 2102212464 }
 0xfb1   : > { %v2916_v34 = vsub.s32 0, %v2914_v39  ;;  %vm2986_vm4 = vcmp.lt.s32.totalorder %v6680_v47, 2  ;;  %v2995_v2 = vsel %vm2987_vm2, %v2978_v20, %v2994_v22  ;;  %v2997_v10 = vsel %vm2985_vm1, %v2975_v23, %v2978_v20 }
 0xfb2   : > { %v2998_v63 = vsel %vm2988_vm5, %v2984_v45, 1326507024  ;;  %v3215_v62 = vadd.s32 %v6598_v16, %v6604_v19  ;;  %v2989_v38 = vsel %vm2985_vm1, %v2969_v25, %v2972_v0  ;;  %v2996_v11 = vsel %vm2986_vm4, %v2993_v30, %v2995_v2 }
 0xfb3   : > { %v4198_v48 = vmin.u32 %v2916_v34, %v2914_v39  ;;  %v3231_v36 = vsub.s32 32, %v3230_v15  ;;  %v2991_v9 = vsel %vm2987_vm2, %v2975_v23, %v2990_v57  ;;  %v2999_v50 = vsel %vm2987_vm2, %v2981_v1, %v2998_v63 }
 0xfb4   : > { %v3001_v22 = vshll.u32 %v2961_v13, 8  ;;  %v3141_v20 = vsel %vm3058_vm3, %v3140_v14, %v3139_v54  ;;  %v3237_v45 = vshll.u32 %v3236_v46, 23  ;;  %v3000_v19 = vsel %vm2986_vm4, %v2997_v10, %v2999_v50 }
 0xfb5   : > { %v2918_v16 = vclz %v4198_v48  ;;  %vm6738_vm7 = vcmp.le.f32.partialorder %v3056_v52, 0.7853982  ;;  %v3233_v54 = vshrl.u32 %v3215_v62, %v3231_v36  ;;  %v2992_v13 = vsel %vm2986_vm4, %v2989_v38, %v2991_v9 }
 0xfb6   : > { %v6729_v0 = vmul.u32.u64.low %v3001_v22, %v3000_v19  ;;  %v6730_v25 = vmul.u32.u64.high %v3001_v22, %v3000_v19, %v6729_v0  ;;  %v6732_v30 = vmul.u32.u64.low %v3001_v22, %v2996_v11  ;;  %v6733_v34 = vmul.u32.u64.high %v3001_v22, %v2996_v11, %v6732_v30 }
 0xfb7   : > { %v4199_v23 = vadd.s32 4294967294, %v2918_v16  ;;  %v3144_v14 = vsel %vm6738_vm7, %v6501_v28, %v3141_v20  ;;  %v3232_v46 = vshll.u32 %v6666_v58, %v3230_v15  ;;  %v2906_v57 = vadd.s32 %v6661_v51, %v6659_v8 }
 0xfb8   : > { %v3238_v2 = vor.u32 4788187, %v3237_v45  ;;  %vm3010_vm6 = vc.u32 %v6730_v25, %v6732_v30  ;;  %v3011_v52 = vadd.s32 1, %v6733_v34  ;;  %v3008_v62 = vmul.u32 %v3001_v22, %v2992_v13 }
 0xfb9   : > { %vm4200_vm12 = vcmp.lt.s32.totalorder %v4199_v23, 0  ;;  %4533 = vcosq.f32 %v3144_v14  ;;  %v3234_v48 = vor.u32 %v3233_v54, %v3232_v46  ;;  %v3142_v51 = vsub.s32 4, %v6594_v49 }
 0xfba   : > { %v2921_v10 = vsel %vm4200_vm12, 0, %v4199_v23  ;;  %v3012_v38 = vsel %vm3010_vm6, %v3011_v52, %v6733_v34  ;;  %4535 = vsinq.f32 %v3144_v14  ;;  %v3239_v36 = vand.u32 2147483647, %v3238_v2 }
 0xfbb   : > { %v2922_v63 = vsub.s32 32, %v2921_v10  ;;  %v2926_v47 = vsub.s32 4294967266, %v2921_v10  ;;  %v2923_v58 = vshll.u32 %v2914_v39, %v2921_v10  ;;  %v3013_v8 = vadd.s32 %v3012_v38, %v3008_v62 }
 0xfbc   : > { %v3241_v45 = vcvt.s32.f32 %v3234_v48  ;;  %v3143_v22 = vsel %vm3058_vm3, %v3142_v51, %v6594_v49  ;;  %vm2852_vm14 = vcmp.lt.s32.totalorder %v6507_v56, 0  ;;  %v2936_v49 = vsub.s32 4, %v6696_v53 }
 0xfbd   : > { %v2924_v15 = vshrl.u32 %v2906_v57, %v2922_v63  ;;  %v2927_v11 = vadd.s32 127, %v2926_v47  ;;  %v3014_v20 = vadd.s32 536870912, %v3013_v8  ;;  %v3145_v46 = vsel %vm6738_vm7, 0, %v3143_v22 }
 0xfbe   : > { %v3242_v0 = vmul.f32 %v3241_v45, %v3239_v36  ;;  %v7377_v63 = vand.u32 2147483647, %v6507_v56  ;;  %v3149_v62 = vand.u32 3, %v3145_v46  ;;  %vm3161_vm15 = vcmp.lt.s32.totalorder %v6504_v37, 0 }
 0xfbf   : > { %v2925_v9 = vor.u32 %v2924_v15, %v2923_v58  ;;  %v2928_v50 = vshll.u32 %v2927_v11, 23  ;;  %v6755_v19 = vshrl.u32 %v3014_v20, 30  ;;  %v2937_v51 = vsel %vm2852_vm14, %v2936_v49, %v6696_v53 }
 0xfc0   : > { %v3243_v2 = vxor.u32 2147483648, %v3242_v0  ;;  %vm6765_vm13 = vcmp.le.f32.partialorder %v7377_v63, 0.7853982  ;;  %vm3151_vm3 = vcmp.eq.s32.totalorder %v3149_v62, 0  ;;  %vm3154_vm1 = vcmp.eq.s32.totalorder %v3149_v62, 2 }
 0xfc1   : > { %v2929_v16 = vor.u32 4788187, %v2928_v50  ;;  %v2932_v39 = vcvt.s32.f32 %v2925_v9  ;;  %v3016_v23 = vshll.u32 %v6755_v19, 30  ;;  %v7380_v20 = vand.u32 2147483647, %v6504_v37 }
 0xfc2   : > { %v3244_v11 = vsel %vm3161_vm15, %v3243_v2, %v3242_v0  ;;  %v2939_v22 = vsel %vm6765_vm13, 0, %v2937_v51  ;;  %vm3150_vm4 = vcmp.lt.s32.totalorder %v3149_v62, 2  ;;  %vm3148_vm7 = vweird.f32 %v6501_v28  ;;  %v6792_v2 = vpop.permute.xlu1 %3267 }
 0xfc3   : > { %v2930_v34 = vand.u32 2147483647, %v2929_v16  ;;  %v4534_v54 = vpop.eup %4533  ;;  %v3017_v14 = vsub.s32 %v3013_v8, %v3016_v23  ;;  %vm6780_vm5 = vcmp.le.f32.partialorder %v7380_v20, 0.7853982 }
 0xfc4   : > { %v4536_v57 = vpop.eup %4535  ;;  %v3155_v1 = vxor.u32 2147483648, %v4534_v54  ;;  %v3247_v16 = vsel %vm6780_vm5, %v6504_v37, %v3244_v11 }
 0xfc5   : > { %v2933_v13 = vmul.f32 %v2932_v39, %v2930_v34  ;;  %v3019_v52 = vsub.s32 0, %v3017_v14  ;;  %v3152_v58 = vxor.u32 2147483648, %v4536_v57  ;;  %v3009_v34 = vadd.s32 %v6732_v30, %v6730_v25 }
 0xfc6   : > { %v3156_v50 = vsel %vm3154_vm1, %v3155_v1, %v4536_v57  ;;  %v3272_v11 = vpop.permute.xlu1 %3271 }
 0xfc7   : > { %v2934_v10 = vxor.u32 2147483648, %v2933_v13  ;;  %v4202_v38 = vmin.u32 %v3019_v52, %v3017_v14  ;;  %v3153_v9 = vsel %vm3151_vm3, %v4534_v54, %v3152_v58  ;;  %v2943_v54 = vand.u32 3, %v2939_v22 }
 0xfc8   : > { %v3157_v0 = vsel %vm3150_vm4, %v3153_v9, %v3156_v50  ;;  %v3245_v52 = vsub.s32 4, %v6649_v18  ;;  %vm2955_vm3 = vcmp.lt.s32.totalorder %v6510_v59, 0  ;;  %vm3251_vm4 = vweird.f32 %v6504_v37 }
 0xfc9   : > { %v2935_v48 = vsel %vm2852_vm14, %v2934_v10, %v2933_v13  ;;  %v3021_v8 = vclz %v4202_v38  ;;  %v3158_v10 = vsel %vm3148_vm7, nan, %v3157_v0  ;;  %vm2948_vm12 = vcmp.eq.s32.totalorder %v2943_v54, 2 }
 0xfca   : > { %v2938_v15 = vsel %vm6765_vm13, %v6507_v56, %v2935_v48  ;;  %v3264_v30 = vsub.f32 1.0, %v3158_v10  ;;  %vm2945_vm6 = vcmp.eq.s32.totalorder %v2943_v54, 0  ;;  %vm2944_vm13 = vcmp.lt.s32.totalorder %v2943_v54, 2 }
 0xfcb   : > { %4537 = vcosq.f32 %v2938_v15  ;;  %v4203_v36 = vadd.s32 4294967294, %v3021_v8  ;;  %vm2942_vm14 = vweird.f32 %v6507_v56 }
 0xfcc   : > { %4539 = vsinq.f32 %v2938_v15  ;;  %v3276_v51 = vmul.f32 %v3272_v11, %v3264_v30  ;;  %v4585_v30 = vld [vmem:[#allocation2] sm:$0xff] }
 0xfcd   : > { %vm4204_vm2 = vcmp.lt.s32.totalorder %v4203_v36, 0  ;;  %4541 = vcosq.f32 %v3247_v16 }
 0xfce   : > { %v3024_v53 = vsel %vm4204_vm2, 0, %v4203_v36  ;;  %4543 = vsinq.f32 %v3247_v16 }
 0xfcf   : > { %v3025_v39 = vsub.s32 32, %v3024_v53  ;;  %v3029_v23 = vsub.s32 4294967266, %v3024_v53  ;;  %v3026_v13 = vshll.u32 %v3017_v14, %v3024_v53  ;;  %v3246_v14 = vsel %vm3161_vm15, %v3245_v52, %v6649_v18 }
 0xfd0   : > { %v3248_v20 = vsel %vm6780_vm5, 0, %v3246_v14  ;;  %vm6804_vm15 = vcmp.le.f32.partialorder %v2953_v3, 0.7853982 }
 0xfd1   : > { %v3027_v46 = vshrl.u32 %v3009_v34, %v3025_v39  ;;  %v3030_v57 = vadd.s32 127, %v3029_v23  ;;  %v3252_v0 = vand.u32 3, %v3248_v20  ;;  %v3280_v34 = vadd.f32 %v3276_v51, %v6492_v21 }
 0xfd2   : > { %v3039_v39 = vsub.s32 4, %v6755_v19 }
 0xfd3   : > { %v3028_v47 = vor.u32 %v3027_v46, %v3026_v13  ;;  %v3031_v49 = vshll.u32 %v3030_v57, 23  ;;  %vm3254_vm1 = vcmp.eq.s32.totalorder %v3252_v0, 0  ;;  %vm3257_vm5 = vcmp.eq.s32.totalorder %v3252_v0, 2 }
 0xfd4   : > { %v3040_v21 = vsel %vm2955_vm3, %v3039_v39, %v6755_v19  ;;  %vm3253_vm2 = vcmp.lt.s32.totalorder %v3252_v0, 2 }
 0xfd5   : > { %v4538_v63 = vpop.eup %4537  ;;  %v3032_v38 = vor.u32 4788187, %v3031_v49  ;;  %v3035_v15 = vcvt.s32.f32 %v3028_v47  ;;  %v3042_v52 = vsel %vm6804_vm15, 0, %v3040_v21 }
 0xfd6   : > { %v4540_v62 = vpop.eup %4539  ;;  %v2949_v25 = vxor.u32 2147483648, %v4538_v63 }
 0xfd7   : > { %v2946_v48 = vxor.u32 2147483648, %v4540_v62  ;;  %v3033_v1 = vand.u32 2147483647, %v3032_v38  ;;  %v4542_v36 = vpop.eup %4541 }
 0xfd8   : > { %v2950_v28 = vsel %vm2948_vm12, %v2949_v25, %v4540_v62  ;;  %v4544_v16 = vpop.eup %4543  ;;  %v3258_v54 = vxor.u32 2147483648, %v4542_v36 }
 0xfd9   : > { %v2947_v58 = vsel %vm2945_vm6, %v4538_v63, %v2946_v48  ;;  %v3036_v50 = vmul.f32 %v3035_v15, %v3033_v1  ;;  %v3255_v23 = vxor.u32 2147483648, %v4544_v16 }
 0xfda   : > { %v2951_v8 = vsel %vm2944_vm13, %v2947_v58, %v2950_v28  ;;  %v3259_v10 = vsel %vm3257_vm5, %v3258_v54, %v4544_v16  ;;  %vm3045_vm13 = vweird.f32 %v6510_v59 }
 0xfdb   : > { %v2952_v9 = vsel %vm2942_vm14, nan, %v2951_v8  ;;  %v3037_v18 = vxor.u32 2147483648, %v3036_v50  ;;  %v3256_v57 = vsel %vm3254_vm1, %v4542_v36, %v3255_v23  ;;  %vm3295_vm14 = vcmask 1006592  }
 0xfdc   : > { %v3262_v22 = vsub.f32 1.0, %v2952_v9  ;;  %v3260_v63 = vsel %vm3253_vm2, %v3256_v57, %v3259_v10 }
 0xfdd   : > { %v3038_v45 = vsel %vm2955_vm3, %v3037_v18, %v3036_v50  ;;  %v3261_v47 = vsel %vm3251_vm4, nan, %v3260_v63  ;;  %vm3301_vm3 = vcmask 965632  }
 0xfde   : > { %v3274_v56 = vmul.f32 %v6792_v2, %v3262_v22  ;;  %v3041_v13 = vsel %vm6804_vm15, %v6510_v59, %v3038_v45  ;;  %v3265_v25 = vsub.f32 1.0, %v3261_v47  ;;  %vm3338_vm15 = vcmask 39936  }
 0xfdf   : > { %4545 = vcosq.f32 %v3041_v13 }
 0xfe0   : > { %v3278_v3 = vadd.f32 %v3274_v56, %v6496_v5  ;;  %4547 = vsinq.f32 %v3041_v13  ;;  %v3046_v5 = vand.u32 3, %v3042_v52  ;;  %v3277_v14 = vmul.f32 %v3272_v11, %v3265_v25 }
 0xfe2   : > { %v3282_v46 = vpack.c.bf16 %v3280_v34, %v3278_v3  ;;  %vm3051_vm7 = vcmp.eq.s32.totalorder %v3046_v5, 2  ;;  %vm3048_vm12 = vcmp.eq.s32.totalorder %v3046_v5, 0  ;;  %vm3047_vm6 = vcmp.lt.s32.totalorder %v3046_v5, 2 }
 0xfe3   : > { %v3281_v8 = vadd.f32 %v3277_v14, %v6494_v43 }
 0xfe4   : > { %3291 = vrot.lane.b32.xlu1 %v3282_v46, %s4673_s8 }
 0xfe8   : > { %3297 = vrot.lane.b32.xlu1 %v3282_v46, %s4674_s10 }
 0xfe9   : > { %v4546_v49 = vpop.eup %4545 }
 0xfea   : > { %v4548_v62 = vpop.eup %4547  ;;  %v3052_v19 = vxor.u32 2147483648, %v4546_v49 }
 0xfeb   : > { %v3049_v48 = vxor.u32 2147483648, %v4548_v62 }
 0xfec   : > { %3320 = vrot.lane.b32.xlu1 %v4585_v30, %s4675_s11  ;;  %v3053_v38 = vsel %vm3051_vm7, %v3052_v19, %v4548_v62 }
 0xfed   : > { %v3050_v28 = vsel %vm3048_vm12, %v4546_v49, %v3049_v48 }
 0xfee   : > { %v3054_v37 = vsel %vm3047_vm6, %v3050_v28, %v3053_v38 }
 0xfef   : > { %v3055_v58 = vsel %vm3045_vm13, nan, %v3054_v37 }
 0xff0   : > { %3322 = vrot.lane.b32.xlu1 %v3282_v46, %s4675_s11  ;;  %v3263_v1 = vsub.f32 1.0, %v3055_v58 }
 0xff2   : > { %v3275_v15 = vmul.f32 %v6792_v2, %v3263_v1 }
 0xff4   : > { %v3279_v51 = vadd.f32 %v3275_v15, %v6498_v31 }
 0xff6   : > { %v3283_v36 = vpack.c.bf16 %v3281_v8, %v3279_v51 }
 0xff8   : > { %3285 = vst.msk [vmem:[#allocation2 + $0x10] sm:$0xff] %vm262_vm0, %v3283_v36 }
 0xfff   : > { %v3288_v9 = vld [vmem:[#allocation2 + $0x10] sm:$0xff] }
0x1000   : > { %3293 = vrot.lane.b32.xlu0 %v3288_v9, %s4673_s8 }
0x1004   : > { %3299 = vrot.lane.b32.xlu0 %v3288_v9, %s4674_s10 }
0x1008   : > { %3324 = vrot.lane.b32.xlu0 %v3288_v9, %s4675_s11 }
0x1056   : > { %v3292_v59 = vpop.permute.xlu1 %3291 }
0x1057   : > { %3326 = vrot.lane.b32.xlu0 %v3292_v59, %s4675_s11 }
0x105a   : > { %v3298_v11 = vpop.permute.xlu1 %3297 }
0x105e   : > { %v3321_v43 = vpop.permute.xlu1 %3320 }
0x1062   : > { %v3323_v22 = vpop.permute.xlu1 %3322 }
0x1063   : > { %v3339_v53 = vsel %vm3338_vm15, %v3321_v43, %v3323_v22 }
0x1072   : > { %v3294_v2 = vpop.permute.xlu0 %3293 }
0x1073   : > { %v3296_v50 = vsel %vm3295_vm14, %v3292_v59, %v3294_v2  ;;  %3330 = vrot.lane.b32.xlu1 %v3294_v2, %s4675_s11 }
0x1074   : > { %3328 = vrot.lane.b32.xlu0 %v3296_v50, %s4675_s11 }
0x1076   : > { %v3300_v31 = vpop.permute.xlu0 %3299 }
0x1077   : > { %v3302_v20 = vsel %vm3301_vm3, %v3298_v11, %v3300_v31 }
0x1078   : > { %3334 = vrot.lane.b32.xlu1 %v3302_v20, %s4675_s11  ;;  %3336 = vrot.lane.b32.xlu0 %v3300_v31, %s4675_s11 }
0x107a   : > { %v3325_v16 = vpop.permute.xlu0 %3324 }
0x107b   : > { %v3340_v18 = vsel %vm3338_vm15, %v3323_v22, %v3325_v16 }
0x107c   : > { %3332 = vrot.lane.b32.xlu1 %v3298_v11, %s4675_s11  ;;  %3307 = vperm.xlu0 %4430, %v6466_v29   ;;  %s7238_s11 = scalar_lea.hbm %s7287_s5, %s4243_s7 }
0x107d   : > { %3354 = vmatprep.subr.bf16.mxu0 %v3340_v18 }
0x107e   : > { %3355 = vmatpush1.bf16.msra.mxu0 %v3339_v53 }
0x1080   : > { %3311 = vperm.xlu1 %4435, %v6480_v4   ;;  %4437 = vset.pattern.permute.xlu0 %v7331_v40 }
0x1084   : > { %4436 = vset.pattern.permute.xlu1 %v7331_v40  ;;  %v4447_v40 = vld [vmem:[%s7284_s2 + $0x10] sm:$0xff]  }
0x10c9   : > { %v3327_v56 = vpop.permute.xlu0 %3326 }
0x10e5   : > { %v3331_v0 = vpop.permute.xlu1 %3330 }
0x10e6   : > { %v3329_v34 = vpop.permute.xlu0 %3328 }
0x10e7   : > { %v3341_v45 = vsel %vm3338_vm15, %v3327_v56, %v3329_v34  ;;  %v3342_v39 = vsel %vm3338_vm15, %v3329_v34, %v3331_v0 }
0x10e8   : > { %3356 = vmatprep.subr.bf16.mxu0 %v3342_v39  ;;  %v4587_v39 = vld [vmem:[%s4795_s13 + $0x28] sm:$0xff] }
0x10e9   : > { %3357 = vmatpush1.bf16.msra.mxu0 %v3341_v45  ;;  %v4586_v45 = vld [vmem:[%s4795_s13 + $0x20] sm:$0xff] }
0x10ea   : > { %v3335_v29 = vpop.permute.xlu1 %3334  ;;  %v3337_v23 = vpop.permute.xlu0 %3336 }
0x10eb   : > { %v3344_v54 = vsel %vm3338_vm15, %v3335_v29, %v3337_v23 }
0x10ec   : > { %3358 = vmatprep.subr.bf16.mxu0 %v3344_v54 }
0x10ee   : > { %v3333_v13 = vpop.permute.xlu1 %3332 }
0x10ef   : > { %v3343_v4 = vsel %vm3338_vm15, %v3333_v13, %v3335_v29  ;;  %v6889_v29 = vld [vmem:[%s7286_s4 + $0x20] sm:$0xff] }
0x10f0   : > { %3359 = vmatpush1.bf16.msra.mxu0 %v3343_v4 }
0x10f3   : > { %4216 = vmatmul.mubr.msk.bf16.vlgmr.msra.gmra.mrb[8].mxu0 %vm845_vm11, %v4447_v40 }
0x10fb   : > { %v3308_v3 = vpop.permute.xlu0 %3307 }
0x10ff   : > { %v3312_v57 = vpop.permute.xlu1 %3311 }
0x11c6   : > { %v3388_v46 = vpop.f32.mrb[8].mxu0 }
0x11c7   : > { %v3390_v21 = vpop.f32.mrb[9].mxu0  ;;  %v6857_v63 = vadd.f32 %v3388_v46, %v3308_v3 }
0x11c8   : > { %v6855_v10 = vadd.f32 %v3390_v21, %v3308_v3  ;;  %v3392_v52 = vpop.f32.mrb[10].mxu0 }
0x11c9   : > { %v3394_v5 = vpop.f32.mrb[11].mxu0  ;;  %v6865_v19 = vadd.f32 %v3392_v52, %v3312_v57  ;;  %v3405_v28 = vmul.f32 %v6857_v63, %v6857_v63 }
0x11ca   : > { %v3406_v47 = vmul.f32 %v6855_v10, %v6855_v10  ;;  %v6861_v49 = vadd.f32 %v3394_v5, %v3312_v57  ;;  %v3397_v62 = vsel %vm262_vm0, %v6855_v10, 0.0 }
0x11cb   : > { %v3398_v25 = vadd.f32 %v3397_v62, %v6857_v63  ;;  %v3407_v1 = vmul.f32 %v6865_v19, %v6865_v19 }
0x11cc   : > { %v3408_v30 = vmul.f32 %v6861_v49, %v6861_v49  ;;  %v3401_v48 = vsel %vm262_vm0, %v6861_v49, 0.0  ;;  %v3409_v38 = vsel %vm262_vm0, %v3406_v47, 0.0 }
0x11cd   : > { %3399 = vadd.xlane.f32.xlu0 %v3398_v25  ;;  %v3402_v37 = vadd.f32 %v3401_v48, %v6865_v19  ;;  %v3410_v14 = vadd.f32 %v3409_v38, %v3405_v28 }
0x11ce   : > { %v3413_v58 = vsel %vm262_vm0, %v3408_v30, 0.0 }
0x11cf   : > { %3403 = vadd.xlane.f32.xlu1 %v3402_v37  ;;  %v3414_v15 = vadd.f32 %v3413_v58, %v3407_v1 }
0x11d1   : > { %3411 = vadd.xlane.f32.xlu0 %v3410_v14 }
0x11d5   : > { %3415 = vadd.xlane.f32.xlu0 %v3414_v15 }
0x125a   : > { %v3400_v8 = vpop.xlane.xlu0 %3399 }
0x125b   : > { %v3417_v51 = vmul.f32 0.005, %v3400_v8 }
0x125c   : > { %v3404_v36 = vpop.xlane.xlu1 %3403 }
0x125d   : > { %v3418_v59 = vmul.f32 0.005, %v3404_v36  ;;  %v3421_v11 = vmul.f32 %v3417_v51, %v3417_v51  ;;  %v3432_v23 = vsub.f32 %v6855_v10, %v3417_v51 }
0x125e   : > { %v3412_v9 = vpop.xlane.xlu0 %3411 }
0x125f   : > { %v3419_v2 = vmul.f32 0.005, %v3412_v9  ;;  %v3422_v16 = vmul.f32 %v3418_v59, %v3418_v59  ;;  %v3433_v3 = vsub.f32 %v6865_v19, %v3418_v59  ;;  %v3434_v21 = vsub.f32 %v6861_v49, %v3418_v59 }
0x1261   : > { %v3423_v50 = vsub.f32 %v3419_v2, %v3421_v11 }
0x1262   : > { %v3416_v43 = vpop.xlane.xlu0 %3415 }
0x1263   : > { %v3425_v31 = vadd.f32 1e-05, %v3423_v50  ;;  %v3420_v20 = vmul.f32 0.005, %v3416_v43 }
0x1265   : > { %4549 = vrsqrt.f32 %v3425_v31  ;;  %v3424_v22 = vsub.f32 %v3420_v20, %v3422_v16 }
0x1267   : > { %v3426_v18 = vadd.f32 1e-05, %v3424_v22 }
0x1269   : > { %4551 = vrsqrt.f32 %v3426_v18 }
0x126f   : > { %v4550_v53 = vpop.eup %4549 }
0x1270   : > { %v3429_v56 = vmul.f32 %v4550_v53, %v6473_v32  ;;  %v3431_v32 = vsub.f32 %v6857_v63, %v3417_v51 }
0x1272   : > { %3437 = vperm.xlu1 %4436, %v3429_v56  }
0x1273   : > { %v4552_v0 = vpop.eup %4551 }
0x1274   : > { %v3430_v34 = vmul.f32 %v4552_v0, %v6471_v12 }
0x1276   : > { %4438 = vset.pattern.permute.xlu1 %v7332_v60  ;;  %3442 = vperm.xlu0 %4437, %v3430_v34   ;;  %v6895_v60 = vld [vmem:[%s7286_s4 + $0x28] sm:$0xff] }
0x1277   : > { %3450 = vperm.xlu1 %4438, %v4586_v45  }
0x127a   : > { %4442 = vset.pattern.permute.xlu0 %v7333_v55 }
0x127b   : > { %3454 = vperm.xlu1 %4438, %v4587_v39  }
0x127f   : > { %4439 = vset.pattern.permute.xlu1 %v7360_v61 }
0x1280   : > { %3462 = vperm.xlu1 %4439, %v6889_v29  }
0x1284   : > { %3466 = vperm.xlu1 %4439, %v6895_v60  }
0x1288   : > { %4440 = vset.pattern.permute.xlu1 %v7361_v42 }
0x1289   : > { %3890 = vperm.xlu1 %4440, %v6889_v29  }
0x128d   : > { %3894 = vperm.xlu1 %4440, %v6895_v60  }
0x1291   : > { %4441 = vset.pattern.permute.xlu1 %v7333_v55 }
0x12f1   : > { %v3438_v61 = vpop.permute.xlu1 %3437 }
0x12f2   : > { %v3445_v13 = vmul.f32 %v3438_v61, %v3431_v32  ;;  %v3446_v4 = vmul.f32 %v3438_v61, %v3432_v23 }
0x12f5   : > { %v3443_v40 = vpop.permute.xlu0 %3442 }
0x12f6   : > { %v3451_v12 = vpop.permute.xlu1 %3450  ;;  %v3447_v55 = vmul.f32 %v3443_v40, %v3433_v3  ;;  %v3448_v10 = vmul.f32 %v3443_v40, %v3434_v21 }
0x12f7   : > { %v6905_v46 = vadd.f32 %v3451_v12, %v3445_v13  ;;  %v6907_v42 = vadd.f32 %v3451_v12, %v3446_v4 }
0x12fa   : > { %v3455_v54 = vpop.permute.xlu1 %3454 }
0x12fb   : > { %v6916_v5 = vadd.f32 %v3455_v54, %v3447_v55  ;;  %v6921_v25 = vadd.f32 %v3455_v54, %v3448_v10 }
0x12ff   : > { %v3463_v57 = vpop.permute.xlu1 %3462 }
0x1300   : > { %v6911_v52 = vmul.f32 %v3463_v57, %v6905_v46  ;;  %v6914_v63 = vmul.f32 %v3463_v57, %v6907_v42 }
0x1302   : > { %v3473_v47 = vand.u32 2147483647, %v6911_v52  ;;  %v3476_v62 = vand.u32 2139095040, %v6911_v52  ;;  %v3576_v19 = vand.u32 2147483647, %v6914_v63  ;;  %v3579_v49 = vand.u32 2139095040, %v6914_v63 }
0x1303   : > { %v3467_v30 = vpop.permute.xlu1 %3466 }
0x1304   : > { %v3477_v48 = vshrl.u32 %v3476_v62, 23  ;;  %v3480_v38 = vand.u32 8388607, %v3473_v47  ;;  %v3583_v28 = vand.u32 8388607, %v3576_v19  ;;  %v6929_v37 = vmul.f32 %v3467_v30, %v6916_v5 }
0x1305   : > { %v3580_v14 = vshrl.u32 %v3579_v49, 23  ;;  %v6932_v58 = vmul.f32 %v3467_v30, %v6921_v25 }
0x1306   : > { %v4217_v1 = vadd.s32 4294967169, %v3477_v48  ;;  %v3679_v15 = vand.u32 2147483647, %v6929_v37  ;;  %v3481_v8 = vor.u32 8388608, %v3480_v38  ;;  %v3682_v36 = vand.u32 2139095040, %v6929_v37 }
0x1307   : > { %v4221_v51 = vadd.s32 4294967169, %v3580_v14  ;;  %v3584_v59 = vor.u32 8388608, %v3583_v28  ;;  %v3785_v43 = vand.u32 2139095040, %v6932_v58 }
0x1308   : > { %v3483_v9 = vadd.s32 1, %v4217_v1  ;;  %v3683_v2 = vshrl.u32 %v3682_v36, 23  ;;  %v6938_v50 = vand.u32 8388607, %v3679_v15  ;;  %v6941_v20 = vshll.u32 %v3481_v8, 8 }
0x1309   : > { %v3586_v11 = vadd.s32 1, %v4221_v51  ;;  %v6943_v56 = vshll.u32 %v3584_v59, 8  ;;  %v6948_v39 = vshrl.u32 %v3785_v43, 23 }
0x130a   : > { %vm3484_vm1 = vcmp.gt.s32.totalorder %v3483_v9, 0  ;;  %v4225_v16 = vadd.s32 4294967169, %v3683_v2  ;;  %v3687_v45 = vor.u32 8388608, %v6938_v50 }
0x130b   : > { %v3485_v31 = vsel %vm3484_vm1, %v3483_v9, 0  ;;  %vm3587_vm5 = vcmp.gt.s32.totalorder %v3586_v11, 0 }
0x130c   : > { %v3486_v22 = vshrl.u32 %v3485_v31, 5  ;;  %v3487_v18 = vand.u32 31, %v3485_v31  ;;  %v3588_v53 = vsel %vm3587_vm5, %v3586_v11, 0  ;;  %v6952_v23 = vadd.s32 1, %v4225_v16 }
0x130d   : > { %v6945_v0 = vshrl.u32 %v3588_v53, 5  ;;  %v3590_v34 = vand.u32 31, %v3588_v53 }
0x130e   : > { %v3488_v61 = vsub.s32 32, %v3487_v18  ;;  %v3490_v12 = vshll.u32 %v7374_v44, %v3487_v18  ;;  %v3493_v32 = vshll.u32 %v7343_v26, %v3487_v18  ;;  %v3496_v54 = vshll.u32 %v7344_v35, %v3487_v18 }
0x130f   : > { %v3499_v13 = vshll.u32 %v7345_v17, %v3487_v18  ;;  %v3502_v4 = vshll.u32 %v7362_v6, %v3487_v18  ;;  %vm3505_vm2 = vcmp.lt.s32.totalorder %v3486_v22, 1  ;;  %vm3506_vm4 = vcmp.lt.s32.totalorder %v3486_v22, 2 }
0x1310   : > { %v3491_v40 = vshrl.u32 %v7343_v26, %v3488_v61  ;;  %v3494_v3 = vshrl.u32 %v7344_v35, %v3488_v61  ;;  %v3497_v21 = vshrl.u32 %v7345_v17, %v3488_v61  ;;  %v3489_v57 = vshrl.u32 %v7374_v44, %v3488_v61 }
0x1311   : > { %v3500_v55 = vshrl.u32 %v7362_v6, %v3488_v61  ;;  %v3503_v10 = vshrl.u32 %v7363_v27, %v3488_v61  ;;  %vm3507_vm7 = vcmp.lt.s32.totalorder %v3486_v22, 3  ;;  %v3591_v48 = vsub.s32 32, %v3590_v34 }
0x1312   : > { %v3492_v62 = vor.u32 %v3491_v40, %v3490_v12  ;;  %v3495_v49 = vor.u32 %v3494_v3, %v3493_v32  ;;  %v3498_v30 = vor.u32 %v3497_v21, %v3496_v54  ;;  %vm3508_vm12 = vcmp.lt.s32.totalorder %v3486_v22, 4 }
0x1313   : > { %v3501_v38 = vor.u32 %v3500_v55, %v3499_v13  ;;  %v3504_v28 = vor.u32 %v3503_v10, %v3502_v4  ;;  %v3593_v14 = vshll.u32 %v7374_v44, %v3590_v34  ;;  %v3596_v2 = vshll.u32 %v7343_v26, %v3590_v34 }
0x1314   : > { %v3509_v1 = vsel %vm3505_vm2, %v3489_v57, %v3492_v62  ;;  %v3510_v8 = vsel %vm3508_vm12, %v3498_v30, 2102212464  ;;  %v3513_v51 = vsel %vm3505_vm2, %v3492_v62, %v3495_v49  ;;  %v3517_v36 = vsel %vm3505_vm2, %v3495_v49, %v3498_v30 }
0x1315   : > { %v3511_v9 = vsel %vm3507_vm7, %v3495_v49, %v3510_v8  ;;  %v3514_v59 = vsel %vm3508_vm12, %v3501_v38, 920167782  ;;  %v3518_v11 = vsel %vm3508_vm12, %v3504_v28, 1326507024  ;;  %v3592_v16 = vshrl.u32 %v7374_v44, %v3591_v48 }
0x1316   : > { %v3515_v43 = vsel %vm3507_vm7, %v3498_v30, %v3514_v59  ;;  %v3519_v31 = vsel %vm3507_vm7, %v3501_v38, %v3518_v11  ;;  %v3594_v18 = vshrl.u32 %v7343_v26, %v3591_v48  ;;  %v3512_v53 = vsel %vm3506_vm4, %v3509_v1, %v3511_v9 }
0x1317   : > { %v3516_v61 = vsel %vm3506_vm4, %v3513_v51, %v3515_v43  ;;  %v3520_v12 = vsel %vm3506_vm4, %v3517_v36, %v3519_v31  ;;  %v3597_v32 = vshrl.u32 %v7344_v35, %v3591_v48  ;;  %v3599_v57 = vshll.u32 %v7344_v35, %v3590_v34 }
0x1318   : > { %v6978_v54 = vmul.u32.u64.low %v6941_v20, %v3520_v12  ;;  %v6979_v13 = vmul.u32.u64.high %v6941_v20, %v3520_v12, %v6978_v54  ;;  %v6982_v4 = vmul.u32.u64.low %v6941_v20, %v3516_v61  ;;  %v6983_v40 = vmul.u32.u64.high %v6941_v20, %v3516_v61, %v6982_v4 }
0x1319   : > { %v3595_v3 = vor.u32 %v3594_v18, %v3593_v14  ;;  %v3598_v21 = vor.u32 %v3597_v32, %v3596_v2  ;;  %v3600_v55 = vshrl.u32 %v7345_v17, %v3591_v48  ;;  %v3528_v22 = vmul.u32 %v6941_v20, %v3512_v53 }
0x131a   : > { %v3602_v10 = vshll.u32 %v7345_v17, %v3590_v34  ;;  %v3603_v62 = vshrl.u32 %v7362_v6, %v3591_v48  ;;  %v3606_v49 = vshrl.u32 %v7363_v27, %v3591_v48  ;;  %v3605_v38 = vshll.u32 %v7362_v6, %v3590_v34 }
0x131b   : > { %v3601_v30 = vor.u32 %v3600_v55, %v3599_v57  ;;  %vm3608_vm6 = vcmp.lt.s32.totalorder %v6945_v0, 1  ;;  %vm3609_vm13 = vcmp.lt.s32.totalorder %v6945_v0, 2  ;;  %vm3530_vm14 = vc.u32 %v6979_v13, %v6982_v4 }
0x131c   : > { %v3531_v28 = vadd.s32 1, %v6983_v40  ;;  %v3604_v14 = vor.u32 %v3603_v62, %v3602_v10  ;;  %vm3610_vm3 = vcmp.lt.s32.totalorder %v6945_v0, 3  ;;  %v3607_v20 = vor.u32 %v3606_v49, %v3605_v38 }
0x131d   : > { %vm3611_vm15 = vcmp.lt.s32.totalorder %v6945_v0, 4  ;;  %v3612_v1 = vsel %vm3608_vm6, %v3592_v16, %v3595_v3  ;;  %v3616_v48 = vsel %vm3608_vm6, %v3595_v3, %v3598_v21  ;;  %v3620_v36 = vsel %vm3608_vm6, %v3598_v21, %v3601_v30 }
0x131e   : > { %v3532_v8 = vsel %vm3530_vm14, %v3531_v28, %v6983_v40  ;;  %v3613_v34 = vsel %vm3611_vm15, %v3601_v30, 2102212464  ;;  %v3617_v51 = vsel %vm3611_vm15, %v3604_v14, 920167782  ;;  %v3621_v2 = vsel %vm3611_vm15, %v3607_v20, 1326507024 }
0x131f   : > { %v3533_v9 = vadd.s32 %v3532_v8, %v3528_v22  ;;  %v3614_v59 = vsel %vm3610_vm3, %v3598_v21, %v3613_v34  ;;  %v3618_v11 = vsel %vm3610_vm3, %v3601_v30, %v3617_v51  ;;  %v3622_v18 = vsel %vm3610_vm3, %v3604_v14, %v3621_v2 }
0x1320   : > { %v3615_v43 = vsel %vm3609_vm13, %v3612_v1, %v3614_v59  ;;  %v3619_v31 = vsel %vm3609_vm13, %v3616_v48, %v3618_v11  ;;  %vm3690_vm1 = vcmp.gt.s32.totalorder %v6952_v23, 0  ;;  %v3623_v53 = vsel %vm3609_vm13, %v3620_v36, %v3622_v18 }
0x1321   : > { %v3534_v16 = vadd.s32 536870912, %v3533_v9  ;;  %v7009_v61 = vmul.u32.u64.low %v6943_v56, %v3619_v31  ;;  %v7010_v12 = vmul.u32.u64.high %v6943_v56, %v3619_v31, %v7009_v61  ;;  %v3691_v40 = vsel %vm3690_vm1, %v6952_v23, 0 }
0x1322   : > { %v7014_v32 = vmul.u32.u64.low %v6943_v56, %v3623_v53  ;;  %v7015_v54 = vmul.u32.u64.high %v6943_v56, %v3623_v53, %v7014_v32  ;;  %v4229_v3 = vadd.s32 4294967169, %v6948_v39  ;;  %v3693_v57 = vand.u32 31, %v3691_v40 }
0x1323   : > { %v7019_v21 = vshrl.u32 %v3534_v16, 30  ;;  %v3631_v55 = vmul.u32 %v6943_v56, %v3615_v43  ;;  %v7024_v0 = vshll.u32 %v3687_v45, 8  ;;  %v3634_v10 = vadd.s32 1, %v7010_v12 }
0x1324   : > { %v3692_v62 = vshrl.u32 %v3691_v40, 5  ;;  %v3694_v49 = vsub.s32 32, %v3693_v57  ;;  %vm3633_vm5 = vc.u32 %v7015_v54, %v7009_v61  ;;  %v3696_v39 = vshll.u32 %v7374_v44, %v3693_v57 }
0x1325   : > { %v3536_v22 = vshll.u32 %v7019_v21, 30  ;;  %v3699_v23 = vshll.u32 %v7343_v26, %v3693_v57  ;;  %v3792_v30 = vadd.s32 1, %v4229_v3  ;;  %v3635_v50 = vsel %vm3633_vm5, %v3634_v10, %v7010_v12 }
0x1326   : > { %v3697_v56 = vshrl.u32 %v7343_v26, %v3694_v49  ;;  %v3702_v45 = vshll.u32 %v7344_v35, %v3693_v57  ;;  %v3636_v28 = vadd.s32 %v3635_v50, %v3631_v55  ;;  %v3700_v14 = vshrl.u32 %v7344_v35, %v3694_v49 }
0x1327   : > { %v7032_v38 = vsub.s32 %v3533_v9, %v3536_v22  ;;  %v3703_v20 = vshrl.u32 %v7345_v17, %v3694_v49  ;;  %v3705_v1 = vshll.u32 %v7345_v17, %v3693_v57  ;;  %v3706_v34 = vshrl.u32 %v7362_v6, %v3694_v49 }
0x1328   : > { %v3698_v8 = vor.u32 %v3697_v56, %v3696_v39  ;;  %v3708_v51 = vshll.u32 %v7362_v6, %v3693_v57  ;;  %v3637_v36 = vadd.s32 536870912, %v3636_v28  ;;  %v3701_v9 = vor.u32 %v3700_v14, %v3699_v23 }
0x1329   : > { %v3539_v48 = vsub.s32 0, %v7032_v38  ;;  %v3704_v59 = vor.u32 %v3703_v20, %v3702_v45  ;;  %v3709_v11 = vshrl.u32 %v7363_v27, %v3694_v49  ;;  %v3695_v43 = vshrl.u32 %v7374_v44, %v3694_v49 }
0x132a   : > { %v3707_v31 = vor.u32 %v3706_v34, %v3705_v1  ;;  %vm3711_vm2 = vcmp.lt.s32.totalorder %v3692_v62, 1  ;;  %v7046_v18 = vshrl.u32 %v3637_v36, 30  ;;  %vm3713_vm4 = vcmp.lt.s32.totalorder %v3692_v62, 3 }
0x132b   : > { %v4218_v2 = vmin.u32 %v3539_v48, %v7032_v38  ;;  %v3710_v16 = vor.u32 %v3709_v11, %v3708_v51  ;;  %vm3714_vm7 = vcmp.lt.s32.totalorder %v3692_v62, 4  ;;  %v3715_v12 = vsel %vm3711_vm2, %v3695_v43, %v3698_v8 }
0x132c   : > { %v3716_v32 = vsel %vm3714_vm7, %v3704_v59, 2102212464  ;;  %v3719_v40 = vsel %vm3711_vm2, %v3698_v8, %v3701_v9  ;;  %v3639_v3 = vshll.u32 %v7046_v18, 30  ;;  %v3720_v55 = vsel %vm3714_vm7, %v3707_v31, 920167782 }
0x132d   : > { %v3541_v53 = vclz %v4218_v2  ;;  %v3717_v57 = vsel %vm3713_vm4, %v3701_v9, %v3716_v32  ;;  %v3723_v22 = vsel %vm3711_vm2, %v3701_v9, %v3704_v59  ;;  %vm3712_vm12 = vcmp.lt.s32.totalorder %v3692_v62, 2 }
0x132e   : > { %v3721_v49 = vsel %vm3713_vm4, %v3704_v59, %v3720_v55  ;;  %v3724_v39 = vsel %vm3714_vm7, %v3710_v16, 1326507024  ;;  %v7051_v23 = vsub.s32 %v3636_v28, %v3639_v3  ;;  %v3718_v50 = vsel %vm3712_vm12, %v3715_v12, %v3717_v57 }
0x132f   : > { %v4219_v10 = vadd.s32 4294967294, %v3541_v53  ;;  %v3722_v56 = vsel %vm3712_vm12, %v3719_v40, %v3721_v49  ;;  %v3725_v45 = vsel %vm3713_vm4, %v3707_v31, %v3724_v39  ;;  %v3529_v28 = vadd.s32 %v6982_v4, %v6979_v13 }
0x1330   : > { %v3726_v14 = vsel %vm3712_vm12, %v3723_v22, %v3725_v45  ;;  %v7055_v20 = vmul.u32.u64.low %v7024_v0, %v3722_v56  ;;  %v7056_v1 = vmul.u32.u64.high %v7024_v0, %v3722_v56, %v7055_v20  ;;  %v3642_v8 = vsub.s32 0, %v7051_v23 }
0x1331   : > { %vm4220_vm6 = vcmp.lt.s32.totalorder %v4219_v10, 0  ;;  %v7061_v34 = vmul.u32.u64.low %v7024_v0, %v3726_v14  ;;  %v7062_v51 = vmul.u32.u64.high %v7024_v0, %v3726_v14, %v7061_v34  ;;  %vm3793_vm13 = vcmp.gt.s32.totalorder %v3792_v30, 0 }
0x1332   : > { %v3544_v48 = vsel %vm4220_vm6, 0, %v4219_v10  ;;  %v4222_v9 = vmin.u32 %v3642_v8, %v7051_v23  ;;  %v3782_v59 = vand.u32 2147483647, %v6932_v58  ;;  %v3794_v11 = vsel %vm3793_vm13, %v3792_v30, 0 }
0x1333   : > { %v3545_v36 = vsub.s32 32, %v3544_v48  ;;  %v3549_v62 = vsub.s32 4294967266, %v3544_v48  ;;  %v3734_v31 = vmul.u32 %v7024_v0, %v3718_v50  ;;  %v3737_v16 = vadd.s32 1, %v7056_v1 }
0x1334   : > { %v3546_v53 = vshll.u32 %v7032_v38, %v3544_v48  ;;  %v3644_v12 = vclz %v4222_v9  ;;  %vm3736_vm14 = vc.u32 %v7062_v51, %v7055_v20  ;;  %v3796_v13 = vand.u32 31, %v3794_v11 }
0x1335   : > { %v3547_v2 = vshrl.u32 %v3529_v28, %v3545_v36  ;;  %v3550_v43 = vadd.s32 127, %v3549_v62  ;;  %v3738_v32 = vsel %vm3736_vm14, %v3737_v16, %v7056_v1  ;;  %v3789_v0 = vand.u32 8388607, %v3782_v59 }
0x1336   : > { %v4223_v3 = vadd.s32 4294967294, %v3644_v12  ;;  %v3739_v57 = vadd.s32 %v3738_v32, %v3734_v31  ;;  %v3797_v30 = vsub.s32 32, %v3796_v13  ;;  %v3799_v49 = vshll.u32 %v7374_v44, %v3796_v13 }
0x1337   : > { %v3551_v4 = vshll.u32 %v3550_v43, 23  ;;  %v3548_v40 = vor.u32 %v3547_v2, %v3546_v53  ;;  %v3802_v45 = vshll.u32 %v7343_v26, %v3796_v13  ;;  %v3790_v48 = vor.u32 8388608, %v3789_v0 }
0x1338   : > { %vm4224_vm3 = vcmp.lt.s32.totalorder %v4223_v3, 0  ;;  %v3740_v22 = vadd.s32 536870912, %v3739_v57  ;;  %v3800_v38 = vshrl.u32 %v7343_v26, %v3797_v30  ;;  %v3803_v39 = vshrl.u32 %v7344_v35, %v3797_v30 }
0x1339   : > { %v3552_v55 = vor.u32 4788187, %v3551_v4  ;;  %v3555_v50 = vcvt.s32.f32 %v3548_v40  ;;  %v3806_v14 = vshrl.u32 %v7345_v17, %v3797_v30  ;;  %v7083_v1 = vsel %vm4224_vm3, 0, %v4223_v3 }
0x133a   : > { %v7079_v56 = vshrl.u32 %v3740_v22, 30  ;;  %v3795_v8 = vshrl.u32 %v3794_v11, 5  ;;  %v3805_v34 = vshll.u32 %v7344_v35, %v3796_v13  ;;  %v3801_v62 = vor.u32 %v3800_v38, %v3799_v49 }
0x133b   : > { %v3553_v10 = vand.u32 2147483647, %v3552_v55  ;;  %v3804_v9 = vor.u32 %v3803_v39, %v3802_v45  ;;  %v3808_v2 = vshll.u32 %v7345_v17, %v3796_v13  ;;  %v3809_v43 = vshrl.u32 %v7362_v6, %v3797_v30 }
0x133c   : > { %v3742_v36 = vshll.u32 %v7079_v56, 30  ;;  %v3811_v31 = vshll.u32 %v7362_v6, %v3796_v13  ;;  %v3812_v26 = vshrl.u32 %v7363_v27, %v3797_v30  ;;  %vm3475_vm15 = vcmp.lt.s32.totalorder %v6911_v52, 0 }
0x133d   : > { %v3556_v28 = vmul.f32 %v3555_v50, %v3553_v10  ;;  %v3807_v53 = vor.u32 %v3806_v14, %v3805_v34  ;;  %v3652_v11 = vsub.s32 4294967266, %v7083_v1  ;;  %v3810_v35 = vor.u32 %v3809_v43, %v3808_v2 }
0x133e   : > { %v3743_v16 = vsub.s32 %v3739_v57, %v3742_v36  ;;  %v3813_v12 = vor.u32 %v3812_v26, %v3811_v31  ;;  %v3830_v4 = vshll.u32 %v3790_v48, 8  ;;  %vm3814_vm1 = vcmp.lt.s32.totalorder %v3795_v8, 1 }
0x133f   : > { %v3557_v32 = vxor.u32 2147483648, %v3556_v28  ;;  %vm3817_vm5 = vcmp.lt.s32.totalorder %v3795_v8, 4  ;;  %v3798_v17 = vshrl.u32 %v7374_v44, %v3797_v30  ;;  %vm3816_vm2 = vcmp.lt.s32.totalorder %v3795_v8, 3 }
0x1340   : > { %v3745_v40 = vsub.s32 0, %v3743_v16  ;;  %v3822_v6 = vsel %vm3814_vm1, %v3801_v62, %v3804_v9  ;;  %v3823_v13 = vsel %vm3817_vm5, %v3810_v35, 920167782  ;;  %vm3815_vm4 = vcmp.lt.s32.totalorder %v3795_v8, 2 }
0x1341   : > { %v3819_v3 = vsel %vm3817_vm5, %v3807_v53, 2102212464  ;;  %v3824_v57 = vsel %vm3816_vm2, %v3807_v53, %v3823_v13  ;;  %v3653_v55 = vadd.s32 127, %v3652_v11  ;;  %v3826_v22 = vsel %vm3814_vm1, %v3804_v9, %v3807_v53 }
0x1342   : > { %v4226_v27 = vmin.u32 %v3745_v40, %v3743_v16  ;;  %v3825_v0 = vsel %vm3815_vm4, %v3822_v6, %v3824_v57  ;;  %v3827_v38 = vsel %vm3817_vm5, %v3813_v12, 1326507024  ;;  %v3558_v10 = vsel %vm3475_vm15, %v3557_v32, %v3556_v28 }
0x1343   : > { %v3818_v44 = vsel %vm3814_vm1, %v3798_v17, %v3801_v62  ;;  %v3828_v30 = vsel %vm3816_vm2, %v3810_v35, %v3827_v38  ;;  %v3820_v39 = vsel %vm3816_vm2, %v3804_v9, %v3819_v3  ;;  %v3648_v2 = vsub.s32 32, %v7083_v1 }
0x1344   : > { %v3747_v49 = vclz %v4226_v27  ;;  %v3829_v50 = vsel %vm3815_vm4, %v3826_v22, %v3828_v30  ;;  %v7101_v45 = vmul.u32.u64.low %v3830_v4, %v3825_v0  ;;  %v7102_v14 = vmul.u32.u64.high %v3830_v4, %v3825_v0, %v7101_v45 }
0x1345   : > { %v7105_v34 = vmul.u32.u64.low %v3830_v4, %v3829_v50  ;;  %v7106_v36 = vmul.u32.u64.high %v3830_v4, %v3829_v50, %v7105_v34  ;;  %vm7111_vm7 = vcmp.le.f32.partialorder %v3473_v47, 0.7853982  ;;  %v3821_v62 = vsel %vm3815_vm4, %v3818_v44, %v3820_v39 }
0x1346   : > { %v4227_v48 = vadd.s32 4294967294, %v3747_v49  ;;  %v3561_v9 = vsel %vm7111_vm7, %v6911_v52, %v3558_v10  ;;  %v3632_v43 = vadd.s32 %v7009_v61, %v7015_v54  ;;  %v3654_v31 = vshll.u32 %v3653_v55, 23 }
0x1347   : > { %v3840_v53 = vadd.s32 1, %v7102_v14  ;;  %v3735_v47 = vadd.s32 %v7055_v20, %v7062_v51  ;;  %v3837_v32 = vmul.u32 %v3830_v4, %v3821_v62  ;;  %vm3839_vm6 = vc.u32 %v7106_v36, %v7101_v45 }
0x1348   : > { %vm4228_vm12 = vcmp.lt.s32.totalorder %v4227_v48, 0  ;;  %v3650_v12 = vshrl.u32 %v3632_v43, %v3648_v2  ;;  %4553 = vcosq.f32 %v3561_v9  ;;  %v3649_v54 = vshll.u32 %v7051_v23, %v7083_v1 }
0x1349   : > { %v3750_v26 = vsel %vm4228_vm12, 0, %v4227_v48  ;;  %v3841_v61 = vsel %vm3839_vm6, %v3840_v53, %v7102_v14  ;;  %v3655_v6 = vor.u32 4788187, %v3654_v31  ;;  %4555 = vsinq.f32 %v3561_v9 }
0x134a   : > { %v3751_v11 = vsub.s32 32, %v3750_v26  ;;  %v3755_v35 = vsub.s32 4294967266, %v3750_v26  ;;  %v3752_v8 = vshll.u32 %v3743_v16, %v3750_v26  ;;  %v3842_v13 = vadd.s32 %v3841_v61, %v3837_v32  ;;  %v4590_v32 = vld [vmem:[#allocation2] sm:$0xff] }
0x134b   : > { %v3651_v27 = vor.u32 %v3650_v12, %v3649_v54  ;;  %v3559_v4 = vsub.s32 4, %v7019_v21  ;;  %v3656_v55 = vand.u32 2147483647, %v3655_v6  ;;  %vm3681_vm13 = vcmp.lt.s32.totalorder %v6929_v37, 0 }
0x134c   : > { %v3753_v40 = vshrl.u32 %v3735_v47, %v3751_v11  ;;  %v3756_v17 = vadd.s32 127, %v3755_v35  ;;  %v3843_v3 = vadd.s32 536870912, %v3842_v13  ;;  %vm7141_vm14 = vcmp.le.f32.partialorder %v3679_v15, 0.7853982 }
0x134d   : > { %v3658_v38 = vcvt.s32.f32 %v3651_v27  ;;  %v3560_v23 = vsel %vm3475_vm15, %v3559_v4, %v7019_v21  ;;  %v3765_v21 = vsub.s32 4, %v7079_v56  ;;  %vm3578_vm3 = vcmp.lt.s32.totalorder %v6914_v63, 0 }
0x134e   : > { %v3754_v20 = vor.u32 %v3753_v40, %v3752_v8  ;;  %v3757_v51 = vshll.u32 %v3756_v17, 23  ;;  %v7130_v0 = vshrl.u32 %v3843_v3, 30  ;;  %v3562_v50 = vsel %vm7111_vm7, 0, %v3560_v23 }
0x134f   : > { %v3659_v44 = vmul.f32 %v3658_v38, %v3656_v55  ;;  %v3566_v43 = vand.u32 3, %v3562_v50  ;;  %v3766_v15 = vsel %vm3681_vm13, %v3765_v21, %v7079_v56  ;;  %vm7155_vm2 = vcmp.le.f32.partialorder %v3576_v19, 0.7853982 }
0x1350   : > { %v3758_v57 = vor.u32 4788187, %v3757_v51  ;;  %v3761_v22 = vcvt.s32.f32 %v3754_v20  ;;  %v3845_v10 = vshll.u32 %v7130_v0, 30  ;;  %v3768_v8 = vsel %vm7141_vm14, 0, %v3766_v15 }
0x1351   : > { %v3660_v62 = vxor.u32 2147483648, %v3659_v44  ;;  %vm3568_vm15 = vcmp.eq.s32.totalorder %v3566_v43, 0  ;;  %vm3571_vm1 = vcmp.eq.s32.totalorder %v3566_v43, 2  ;;  %vm3567_vm4 = vcmp.lt.s32.totalorder %v3566_v43, 2 }
0x1352   : > { %v3759_v16 = vand.u32 2147483647, %v3758_v57  ;;  %v4554_v49 = vpop.eup %4553  ;;  %v3846_v30 = vsub.s32 %v3842_v13, %v3845_v10  ;;  %v3838_v17 = vadd.s32 %v7101_v45, %v7106_v36  ;;  %vm3565_vm7 = vweird.f32 %v6911_v52  ;;  %v7168_v45 = vpop.permute.xlu1 %3890 }
0x1353   : > { %v4556_v14 = vpop.eup %4555  ;;  %v3572_v26 = vxor.u32 2147483648, %v4554_v49  ;;  %v3661_v47 = vsel %vm3578_vm3, %v3660_v62, %v3659_v44  ;;  %v3772_v19 = vand.u32 3, %v3768_v8 }
0x1354   : > { %v3762_v1 = vmul.f32 %v3761_v22, %v3759_v16  ;;  %v3848_v48 = vsub.s32 0, %v3846_v30  ;;  %v3569_v31 = vxor.u32 2147483648, %v4556_v14  ;;  %v3664_v56 = vsel %vm7155_vm2, %v6914_v63, %v3661_v47 }
0x1355   : > { %v3573_v12 = vsel %vm3571_vm1, %v3572_v26, %v4556_v14  ;;  %v3662_v22 = vsub.s32 4, %v7046_v18  ;;  %vm3777_vm12 = vcmp.eq.s32.totalorder %v3772_v19, 2  ;;  %vm3774_vm6 = vcmp.eq.s32.totalorder %v3772_v19, 0 }
0x1356   : > { %v3763_v39 = vxor.u32 2147483648, %v3762_v1  ;;  %v4230_v9 = vmin.u32 %v3848_v48, %v3846_v30  ;;  %v3570_v35 = vsel %vm3568_vm15, %v4554_v49, %v3569_v31  ;;  %vm3784_vm15 = vcmp.lt.s32.totalorder %v6932_v58, 0 }
0x1357   : > { %v3574_v6 = vsel %vm3567_vm4, %v3570_v35, %v3573_v12  ;;  %vm7180_vm1 = vcmp.le.f32.partialorder %v3782_v59, 0.7853982  ;;  %v3868_v31 = vsub.s32 4, %v7130_v0  ;;  %vm3668_vm4 = vweird.f32 %v6914_v63 }
0x1358   : > { %v3764_v34 = vsel %vm3681_vm13, %v3763_v39, %v3762_v1  ;;  %v3850_v53 = vclz %v4230_v9  ;;  %v3575_v3 = vsel %vm3565_vm7, nan, %v3574_v6  ;;  %vm3773_vm13 = vcmp.lt.s32.totalorder %v3772_v19, 2 }
0x1359   : > { %v3767_v28 = vsel %vm7141_vm14, %v6929_v37, %v3764_v34  ;;  %v3885_v52 = vsub.f32 1.0, %v3575_v3  ;;  %vm3771_vm14 = vweird.f32 %v6929_v37  ;;  %v3895_v34 = vpop.permute.xlu1 %3894  ;;  %v3869_v59 = vsel %vm3784_vm15, %v3868_v31, %v7130_v0 }
0x135a   : > { %4557 = vcosq.f32 %v3767_v28  ;;  %v4231_v11 = vadd.s32 4294967294, %v3850_v53  ;;  %v3871_v12 = vsel %vm7180_vm1, 0, %v3869_v59 }
0x135b   : > { %4559 = vsinq.f32 %v3767_v28  ;;  %v3897_v14 = vmul.f32 %v7168_v45, %v3885_v52 }
0x135c   : > { %vm4232_vm5 = vcmp.lt.s32.totalorder %v4231_v11, 0  ;;  %4561 = vcosq.f32 %v3664_v56 }
0x135d   : > { %v3853_v40 = vsel %vm4232_vm5, 0, %v4231_v11  ;;  %4563 = vsinq.f32 %v3664_v56  ;;  %v3901_v28 = vadd.f32 %v3897_v14, %v6905_v46 }
0x135e   : > { %v3854_v61 = vsub.s32 32, %v3853_v40  ;;  %v3858_v54 = vsub.s32 4294967266, %v3853_v40  ;;  %v3855_v13 = vshll.u32 %v3846_v30, %v3853_v40  ;;  %v3663_v30 = vsel %vm3578_vm3, %v3662_v22, %v7046_v18 }
0x135f   : > { %v3665_v62 = vsel %vm7155_vm2, 0, %v3663_v30  ;;  %v3875_v40 = vand.u32 3, %v3871_v12 }
0x1360   : > { %v3856_v20 = vshrl.u32 %v3838_v17, %v3854_v61  ;;  %v3859_v51 = vadd.s32 127, %v3858_v54  ;;  %v3669_v53 = vand.u32 3, %v3665_v62 }
0x1361   : > { %vm3880_vm7 = vcmp.eq.s32.totalorder %v3875_v40, 2 }
0x1362   : > { %v3857_v57 = vor.u32 %v3856_v20, %v3855_v13  ;;  %v3860_v55 = vshll.u32 %v3859_v51, 23  ;;  %vm3671_vm3 = vcmp.eq.s32.totalorder %v3669_v53, 0  ;;  %vm3674_vm5 = vcmp.eq.s32.totalorder %v3669_v53, 2 }
0x1363   : > { %vm3670_vm2 = vcmp.lt.s32.totalorder %v3669_v53, 2 }
0x1364   : > { %v4558_v27 = vpop.eup %4557  ;;  %v3861_v38 = vor.u32 4788187, %v3860_v55  ;;  %v3864_v49 = vcvt.s32.f32 %v3857_v57 }
0x1365   : > { %v4560_v4 = vpop.eup %4559  ;;  %v3778_v16 = vxor.u32 2147483648, %v4558_v27 }
0x1366   : > { %v3775_v36 = vxor.u32 2147483648, %v4560_v4  ;;  %v3862_v1 = vand.u32 2147483647, %v3861_v38  ;;  %v4562_v2 = vpop.eup %4561 }
0x1367   : > { %v3779_v10 = vsel %vm3777_vm12, %v3778_v16, %v4560_v4  ;;  %v4564_v43 = vpop.eup %4563  ;;  %v3675_v11 = vxor.u32 2147483648, %v4562_v2  ;;  %vm3877_vm12 = vcmp.eq.s32.totalorder %v3875_v40, 0 }
0x1368   : > { %v3776_v23 = vsel %vm3774_vm6, %v4558_v27, %v3775_v36  ;;  %v3865_v50 = vmul.f32 %v3864_v49, %v3862_v1  ;;  %v3672_v47 = vxor.u32 2147483648, %v4564_v43  ;;  %vm3876_vm6 = vcmp.lt.s32.totalorder %v3875_v40, 2 }
0x1369   : > { %v3780_v44 = vsel %vm3773_vm13, %v3776_v23, %v3779_v10  ;;  %vm3874_vm13 = vweird.f32 %v6932_v58 }
0x136a   : > { %v3781_v39 = vsel %vm3771_vm14, nan, %v3780_v44  ;;  %v3866_v21 = vxor.u32 2147483648, %v3865_v50  ;;  %v3673_v46 = vsel %vm3671_vm3, %v4562_v2, %v3672_v47 }
0x136b   : > { %v3887_v48 = vsub.f32 1.0, %v3781_v39 }
0x136c   : > { %v3867_v18 = vsel %vm3784_vm15, %v3866_v21, %v3865_v50 }
0x136d   : > { %v3899_v9 = vmul.f32 %v3895_v34, %v3887_v48  ;;  %v3870_v15 = vsel %vm7180_vm1, %v6932_v58, %v3867_v18 }
0x136e   : > { %4565 = vcosq.f32 %v3870_v15 }
0x136f   : > { %v3903_v26 = vadd.f32 %v3899_v9, %v6916_v5  ;;  %4567 = vsinq.f32 %v3870_v15  ;;  %v3676_v5 = vsel %vm3674_vm5, %v3675_v11, %v4564_v43 }
0x1370   : > { %v3677_v8 = vsel %vm3670_vm2, %v3673_v46, %v3676_v5 }
0x1371   : > { %v3905_v35 = vpack.c.bf16 %v3903_v26, %v3901_v28  ;;  %v3678_v56 = vsel %vm3668_vm4, nan, %v3677_v8 }
0x1372   : > { %v3886_v6 = vsub.f32 1.0, %v3678_v56 }
0x1373   : > { %3919 = vrot.lane.b32.xlu0 %v3905_v35, %s4666_s25  ;;  %3914 = vrot.lane.b32.xlu1 %v3905_v35, %s4665_s23 }
0x1374   : > { %v3898_v27 = vmul.f32 %v7168_v45, %v3886_v6 }
0x1376   : > { %v3902_v4 = vadd.f32 %v3898_v27, %v6907_v42 }
0x1377   : > { %3941 = vrot.lane.b32.xlu0 %v4590_v32, %s4667_s26 }
0x1378   : > { %v4566_v0 = vpop.eup %4565 }
0x1379   : > { %v4568_v17 = vpop.eup %4567  ;;  %v3881_v61 = vxor.u32 2147483648, %v4566_v0 }
0x137a   : > { %v3878_v54 = vxor.u32 2147483648, %v4568_v17 }
0x137b   : > { %3943 = vrot.lane.b32.xlu0 %v3905_v35, %s4667_s26  ;;  %v3882_v19 = vsel %vm3880_vm7, %v3881_v61, %v4568_v17 }
0x137c   : > { %v3879_v13 = vsel %vm3877_vm12, %v4566_v0, %v3878_v54 }
0x137d   : > { %v3883_v20 = vsel %vm3876_vm6, %v3879_v13, %v3882_v19 }
0x137e   : > { %v3884_v51 = vsel %vm3874_vm13, nan, %v3883_v20 }
0x137f   : > { %v3888_v63 = vsub.f32 1.0, %v3884_v51 }
0x1381   : > { %v3900_v3 = vmul.f32 %v3895_v34, %v3888_v63 }
0x1383   : > { %v3904_v57 = vadd.f32 %v3900_v3, %v6921_v25 }
0x1385   : > { %v3906_v55 = vpack.c.bf16 %v3904_v57, %v3902_v4 }
0x1387   : > { %3908 = vst.msk [vmem:[#allocation2 + $0x10] sm:$0xff] %vm262_vm0, %v3906_v55 }
0x138e   : > { %v3911_v16 = vld [vmem:[#allocation2 + $0x10] sm:$0xff] }
0x138f   : > { %3916 = vrot.lane.b32.xlu1 %v3911_v16, %s4665_s23 }
0x1393   : > { %3921 = vrot.lane.b32.xlu1 %v3911_v16, %s4666_s25  ;;  %s230_s25 = sand.u32 1, %s4645_s19  }
0x1394   : > { %s7241_s22 = scalar_lea.sflag [#allocation4], %s230_s25 }
0x1397   : > { %3945 = vrot.lane.b32.xlu1 %v3911_v16, %s4667_s26 }
0x13e5   : > { %v3915_v58 = vpop.permute.xlu1 %3914  ;;  %v3920_v22 = vpop.permute.xlu0 %3919 }
0x13e6   : > { %3947 = vrot.lane.b32.xlu1 %v3915_v58, %s4667_s26 }
0x13e9   : > { %v3942_v36 = vpop.permute.xlu0 %3941 }
0x13ed   : > { %v3944_v52 = vpop.permute.xlu0 %3943 }
0x13ee   : > { %v3959_v1 = vsel %vm832_vm10, %v3942_v36, %v3944_v52 }
0x1401   : > { %v3917_v45 = vpop.permute.xlu1 %3916 }
0x1402   : > { %v3918_v42 = vsel %vm790_vm8, %v3915_v58, %v3917_v45  ;;  %3951 = vrot.lane.b32.xlu0 %v3917_v45, %s4667_s26 }
0x1403   : > { %3949 = vrot.lane.b32.xlu1 %v3918_v42, %s4667_s26 }
0x1405   : > { %v3922_v25 = vpop.permute.xlu1 %3921 }
0x1406   : > { %v3923_v38 = vsel %vm796_vm9, %v3920_v22, %v3922_v25 }
0x1407   : > { %3955 = vrot.lane.b32.xlu0 %v3923_v38, %s4667_s26  ;;  %3957 = vrot.lane.b32.xlu1 %v3922_v25, %s4667_s26 }
0x1409   : > { %v3946_v10 = vpop.permute.xlu1 %3945 }
0x140a   : > { %v3960_v23 = vsel %vm832_vm10, %v3944_v52, %v3946_v10 }
0x140b   : > { %3953 = vrot.lane.b32.xlu0 %v3920_v22, %s4667_s26  ;;  %3974 = vmatprep.subr.bf16.mxu1 %v3960_v23  ;;  %s4117_s26 = sshll.u32 %s230_s25, 5 }
0x140c   : > { %3975 = vmatpush1.bf16.msra.mxu1 %v3959_v1  ;;  %3928 = vperm.xlu1 %4441, %v6889_v29   ;;  %s232_s30 = scalar_lea.vmem [#allocation3], %s4117_s26 }
0x140d   : > { %s4039_s6 = sshll.u32 %s232_s30, 4  ;;  %s7230_s6 = int_to_ptr.vmem [resolvable:$true] %s4039_s6 }
0x140e   : > { %s4591_s12 = scalar_lea.vmem %s7230_s6, 512  ;;  %p4598_p0 = scmp.lt.s32.totalorder %s7230_s6, %s4596_s9 }
0x140f   : > { %3932 = vperm.xlu0 %4442, %v6895_v60   ;;  %v4448_v60 = vld [vmem:[%s7285_s3 + $0x10] sm:$0xff]   ;;  %p4592_p11 = scmp.ne.s32.totalorder %s7230_s6, %s4591_s12  ;;  %p4599_p1 = scmp.lt.s32.totalorder %s4597_s15, %s4591_s12 }
0x1411   : > { %p4593_p12 = pnand %p4592_p11, %p4747_p5  ;;  %p4600_p2 = por %p4599_p1, %p4598_p0 }
0x1413   : > { %p4594_p13 = pneg %p4593_p12 }
0x1415   : > { %p4601_p3 = pnand %p4600_p2, %p4594_p13 }
0x1458   : > { %v3948_v49 = vpop.permute.xlu1 %3947 }
0x1474   : > { %v3952_v44 = vpop.permute.xlu0 %3951 }
0x1475   : > { %v3950_v30 = vpop.permute.xlu1 %3949 }
0x1476   : > { %v3961_v39 = vsel %vm832_vm10, %v3948_v49, %v3950_v30  ;;  %v3962_v50 = vsel %vm832_vm10, %v3950_v30, %v3952_v44 }
0x1477   : > { %3976 = vmatprep.subr.bf16.mxu1 %v3962_v50 }
0x1478   : > { %3977 = vmatpush1.bf16.msra.mxu1 %v3961_v39 }
0x1479   : > { %v3956_v14 = vpop.permute.xlu0 %3955  ;;  %v3958_v48 = vpop.permute.xlu1 %3957 }
0x147a   : > { %v3964_v34 = vsel %vm832_vm10, %v3956_v14, %v3958_v48 }
0x147b   : > { %3978 = vmatprep.subr.bf16.mxu1 %v3964_v34 }
0x147d   : > { %v3954_v2 = vpop.permute.xlu0 %3953 }
0x147e   : > { %v3963_v29 = vsel %vm832_vm10, %v3954_v2, %v3956_v14 }
0x147f   : > { %3979 = vmatpush1.bf16.msra.mxu1 %v3963_v29 }
0x1482   : > { %4236 = vmatmul.mubr.msk.bf16.vlgmr.msra.gmra.mrb[8].mxu1 %vm845_vm11, %v4448_v60 }
0x148b   : > { %v3929_v21 = vpop.permute.xlu1 %3928 }
0x148e   : > { %v3933_v9 = vpop.permute.xlu0 %3932 }
0x1555   : > { %v4008_v62 = vpop.f32.mrb[8].mxu1 }
0x1556   : > { %v4009_v43 = vadd.f32 %v4008_v62, %v3929_v21  ;;  %v4010_v37 = vpop.f32.mrb[9].mxu1 }
0x1557   : > { %v4011_v18 = vadd.f32 %v4010_v37, %v3929_v21  ;;  %v4012_v28 = vpop.f32.mrb[10].mxu1 }
0x1558   : > { %v4017_v31 = vadd.f32 %v4009_v43, %v6437_v24  ;;  %v4013_v26 = vadd.f32 %v4012_v28, %v3933_v9  ;;  %v4014_v53 = vpop.f32.mrb[11].mxu1 }
0x1559   : > { %v4018_v15 = vadd.f32 %v4011_v18, %v6434_v33  ;;  %v4015_v47 = vadd.f32 %v4014_v53, %v3933_v9 }
0x155a   : > { %4021 = vst [vmem:[%s232_s30] sm:$0xff] %v4017_v31  ;;  %v4019_v11 = vadd.f32 %v4013_v26, %v6440_v7 }
0x155b   : > { %4022 = vst.msk [vmem:[%s232_s30 + $0x8] sm:$0xff] %vm262_vm0, %v4018_v15  ;;  %v4020_v35 = vadd.f32 %v4015_v47, %v6443_v41 }
0x155c   : > { %4023 = vst [vmem:[%s232_s30 + $0x10] sm:$0xff] %v4019_v11 }
0x155d   : > { %4024 = vst.msk [vmem:[%s232_s30 + $0x18] sm:$0xff] %vm262_vm0, %v4020_v35 }
0x155e   : > { %4604 = shalt.err (!%p4601_p3)
}
0x155f   : > { %s4605_s16 = scalar_lea.hbm %s7238_s11, 512  ;;  %s4609_s23 = scalar_lea.hbm %s7287_s5, 1024 }
0x1560   : > { %p4606_p4 = scmp.ne.s32.totalorder %s7238_s11, %s4605_s16  ;;  %p4610_p9 = scmp.lt.u32.totalorder %s7238_s11, %s7287_s5 }
0x1561   : > { %p4611_p10 = scmp.lt.u32.totalorder %s4609_s23, %s4605_s16  ;;  %p4613_p12 = scmp.lt.u32.totalorder %s4605_s16, %s7238_s11 }
0x1562   : > { %p4607_p7 = pnand %p4606_p4, %p4747_p5 }
0x1563   : > { %p4612_p11 = por %p4611_p10, %p4610_p9 }
0x1564   : > { %p4608_p8 = pneg %p4607_p7 }
0x1565   : > { %p4614_p13 = por %p4613_p12, %p4612_p11 }
0x1567   : > { %p4615_p0 = pnand %p4614_p13, %p4608_p8 }
0x1569   : > { %4618 = shalt.err (!%p4615_p0)
}
0x156a   : > { %s4677_s30 = smov 256   ;;  %s4678_s7 = smov 16  }
0x156b   : > { %4341 = dma.vmem_to_hbm [thread:$0]  (%p4747_p5), %s7230_s6, 512, %s7238_s11, %s7241_s22, %s4677_s30, %s4677_s30, %s4678_s7  }
0x156c PF: > { %p4347_p1 = scmp.ge.s32.totalorder %s4653_s21, 2  ;;  %s4054_s8 = sand.u32 1, %s4641_s18  }
0x156d   : > { %s4055_s10 = scalar_lea.sflag [#allocation4], %s4054_s8 }
0x156e   : > { %p4344_p2 = pnand %p4347_p1, %p4751_p6 }
0x1570   : > { %4636 = dma.done.wait (!%p4344_p2), %s4055_s10, 512  }
0x1571   : > { %4638 = vsyncadd (!%p4344_p2), %s4055_s10, 4294966784  ;;  %p15_p3 = scmp.ge.s32.totalorder %s4734_s24, 4   ;;  %s7393_s18 = smov %s4645_s19 }
0x1572   : > { %s7394_s19 = smov %s4649_s20  ;;  %s7395_s20 = smov %s4745_s27 }
0x1573   : > { %s7396_s21 = smov %s4734_s24  ;;  %17 = sbr.rel (!%p15_p3) target bundleno = 3 (0x3), region = 82 }
0x157a   :  { %4060 = vsyncpa [#allocation4], 1 }
0x157b   :  { %4062 = vsyncpa [#allocation4 + $0x1], 1 }

</bundles_post_ra>
